<compile_context>
chip_gen: v7x
topology: tpu7x:2x2x1
jax: 0.10.0
libtpu: 0.0.40
codegen_flags: <defaults>
</compile_context>

<pallas_src>
import functools

import jax
import jax.numpy as jnp
from jax import lax
from jax.experimental import pallas as pl
from jax.experimental.pallas import tpu as pltpu

# Module-level constant in cvar_sensing.encoders (value used to replace NaNs).
NAN_REP = 0.0

LANE = 128
SUBLANE = 8


def _round_up(v, m):
    return (v + m - 1) // m * m


# ---------------------------------------------------------------------------
# Fused kernel: input projection + GRU recurrence + MLP head per time block.
#
#   grid = (num_batch_blocks, num_time_blocks); batch axis "parallel",
#   time axis "arbitrary" (serial recurrence).
#
#   xt_ref   : (t_block, B_blk, Din_pad) f32   time-major input block
#   wih_ref  : (Din_pad, 3*H_pad)        bf16  input weights (gate-padded)
#   bfold_ref: (1, 3*H_pad)              f32   b_ih + b_hh[r,z]
#   whh_ref  : (H_pad, 3*H_pad)          bf16  recurrent weights (gate-padded)
#   bhn_ref  : (1, H_pad)                f32   b_hh for the n gate
#   wmlp_ref : (L, H_pad, H_pad)         bf16
#   bmlp_ref : (L, 1, H_pad)             f32
#   wout_ref : (H_pad, O_pad)            bf16
#   bout_ref : (1, O_pad)                f32
#   out_ref  : (t_block, B_blk, O_pad)   f32   embeddings for the block
#   h_ref    : (B_blk, H_pad)            f32   recurrent state (persists)
#   gi_ref   : (t_block, B_blk, 3*H_pad) f32   block input projection (scratch)
#   st_ref   : (t_block, B_blk, H_pad)   f32   block hidden states (scratch)
# ---------------------------------------------------------------------------
def _fused_gru_mlp_kernel(xt_ref, wih_ref, bfold_ref, whh_ref, bhn_ref,
                          wmlp_ref, bmlp_ref, wout_ref, bout_ref,
                          out_ref,
                          h_ref, gi_ref, st_ref, *,
                          hidden_pad, t_block, tail, num_layer):
    H = hidden_pad
    it = pl.program_id(1)                       # time-block index (serial)
    nt = pl.num_programs(1)
    TB, BB, Din = xt_ref.shape

    # (Re)initialize the recurrent state at the start of every batch block's
    # time sweep.  st_ref is zeroed once so the unwritten tail rows of the last
    # block (sliced off in the wrapper) never contain garbage bit patterns.
    @pl.when(it == 0)
    def _():
        h_ref[...] = jnp.zeros_like(h_ref)
        st_ref[...] = jnp.zeros_like(st_ref)

    # ---- block-wide input projection (hoisted off the serial critical path) --
    xt_rows = xt_ref[...].reshape(TB * BB, Din).astype(wih_ref.dtype)
    gi = jnp.dot(xt_rows, wih_ref[...], preferred_element_type=jnp.float32)
    gi_ref[...] = (gi + bfold_ref[...]).reshape(TB, BB, 3 * H)

    bhn = bhn_ref[...]

    # ---- serial GRU recurrence --------------------------------------------
    def step(s, h):
        gi_s = gi_ref[s]                                       # (B_blk, 3H)
        hb = h.astype(whh_ref.dtype)                           # bf16 MXU input
        # gate-wise, lane-aligned weight slices read inside the loop body
        # (avoids one 48-vreg live value hoisted across the unrolled loop)
        gh_r = jnp.dot(hb, whh_ref[:, 0:H], preferred_element_type=jnp.float32)
        gh_z = jnp.dot(hb, whh_ref[:, H:2 * H], preferred_element_type=jnp.float32)
        gh_n = jnp.dot(hb, whh_ref[:, 2 * H:3 * H], preferred_element_type=jnp.float32)
        r = jax.nn.sigmoid(gi_s[:, 0:H] + gh_r)
        z = jax.nn.sigmoid(gi_s[:, H:2 * H] + gh_z)
        n = jnp.tanh(gi_s[:, 2 * H:3 * H] + r * (gh_n + bhn))
        h_new = (1.0 - z) * n + z * h
        st_ref[s] = h_new
        return h_new

    if tail == t_block:
        # T divides evenly into time blocks: single static loop everywhere.
        h_ref[...] = lax.fori_loop(0, t_block, step, h_ref[...],
                                   unroll=min(t_block, 8))
    else:
        # Full blocks run t_block steps; the last block runs only the valid
        # `tail` steps (no wasted serial iterations on padded timesteps).
        # Both trip counts are static, so the loops stay unrollable.
        @pl.when(it < nt - 1)
        def _():
            h_ref[...] = lax.fori_loop(0, t_block, step, h_ref[...],
                                       unroll=min(t_block, 8))

        @pl.when(it == nt - 1)
        def _():
            h_ref[...] = lax.fori_loop(0, tail, step, h_ref[...],
                                       unroll=min(tail, 8))

    # ---- MLP head + output projection epilogue on the whole block ----------
    a = st_ref[...].reshape(TB * BB, H)
    for l in range(num_layer):                  # static unroll (num_layer small)
        a = jnp.maximum(
            jnp.dot(a.astype(wmlp_ref.dtype), wmlp_ref[l],
                    preferred_element_type=jnp.float32) + bmlp_ref[l], 0.0)
    o = (jnp.dot(a.astype(wout_ref.dtype), wout_ref[...],
                 preferred_element_type=jnp.float32) + bout_ref[...])
    out_ref[...] = o.reshape(TB, BB, -1)


def rnn_forward(t, x, params, *, hidden_size, output_size, num_layer,
                num_batch_blocks=1, mxu_dtype=jnp.bfloat16):
    """t: (B, T) float32, x: (B, T, F) float32 (may contain NaN). Returns (B, T, O).

    num_batch_blocks: set to 2 on v7x when B >= 16 to shard the (batch-
      independent) recurrence across the two TensorCores; leave 1 on v5e/v6e.
    mxu_dtype: dtype of matmul operands (bf16 per perf review; use jnp.float32
      for a bit-tighter match to the f32 reference).
    """
    B, T = t.shape
    F = x.shape[-1]
    Din = F + 1
    H, O, L = hidden_size, output_size, num_layer

    # hardware-friendly padded sizes (zero padding is exact for GRU/MLP math)
    H_pad = _round_up(H, LANE)
    O_pad = _round_up(O, LANE)
    Din_pad = _round_up(Din, SUBLANE)

    nbb = max(1, int(num_batch_blocks))
    B_pad = _round_up(B, SUBLANE * nbb)
    B_blk = B_pad // nbb

    # time blocking: cap raised to 128; last block handles the tail exactly
    t_block = max(SUBLANE, min(128, _round_up(T, SUBLANE)))
    n_tb = pl.cdiv(T, t_block)
    T_pad = n_tb * t_block
    tail = T - (n_tb - 1) * t_block             # 1 <= tail <= t_block

    wih, bih, whh, bhh, wmlp, bmlp, wout, bout = params

    # ---- pad parameters to (8, 128) tiles, gate-wise for the 3H dimension ----
    def pad_gates(w):   # (..., 3*H) -> (..., 3*H_pad)
        lead = w.shape[:-1]
        w3 = w.reshape(lead + (3, H))
        w3 = jnp.pad(w3, [(0, 0)] * len(lead) + [(0, 0), (0, H_pad - H)])
        return w3.reshape(lead + (3 * H_pad,))

    wih_p = jnp.pad(pad_gates(wih.astype(jnp.float32)),
                    ((0, Din_pad - Din), (0, 0))).astype(mxu_dtype)     # (Din_pad, 3H_pad)
    whh_p = jnp.pad(pad_gates(whh.astype(jnp.float32)),
                    ((0, H_pad - H), (0, 0))).astype(mxu_dtype)         # (H_pad, 3H_pad)
    bih_p = pad_gates(bih.astype(jnp.float32))                          # (1, 3H_pad)
    bhh_p = pad_gates(bhh.astype(jnp.float32))                          # (1, 3H_pad)
    # fold b_hh for the r and z gates into the precomputed input projection bias
    b_fold = bih_p.at[:, :2 * H_pad].add(bhh_p[:, :2 * H_pad])
    bhn = bhh_p[:, 2 * H_pad:]                                          # (1, H_pad)

    wmlp_p = jnp.pad(wmlp.astype(jnp.float32),
                     ((0, 0), (0, H_pad - H), (0, H_pad - H))).astype(mxu_dtype)
    bmlp_p = jnp.pad(bmlp.astype(jnp.float32),
                     ((0, 0), (0, 0), (0, H_pad - H)))                  # (L, 1, H_pad)
    wout_p = jnp.pad(wout.astype(jnp.float32),
                     ((0, H_pad - H), (0, O_pad - O))).astype(mxu_dtype)
    bout_p = jnp.pad(bout.astype(jnp.float32), ((0, 0), (0, O_pad - O)))

    # ---- data prep (fused by XLA with the transpose): dt, NaN mask, concat ----
    t_f = t.astype(jnp.float32)
    dt = jnp.concatenate(
        [jnp.zeros((B, 1), jnp.float32), t_f[:, 1:] - t_f[:, :-1]], axis=1)
    xm = jnp.where(jnp.isnan(x), jnp.float32(NAN_REP), x.astype(jnp.float32))
    xt = jnp.concatenate([dt[:, :, None], xm], axis=-1)                 # (B, T, Din)
    xt = jnp.pad(xt, ((0, 0), (0, 0), (0, Din_pad - Din)))
    xt_tm = jnp.transpose(xt, (1, 0, 2))                                # (T, B, Din_pad)
    xt_tm = jnp.pad(xt_tm, ((0, T_pad - T), (0, B_pad - B), (0, 0)))

    # ---- explicit scoped-VMEM budget (v5e default is only 16 MiB) ----
    f32b = 4
    wbytes = jnp.dtype(mxu_dtype).itemsize
    blk_in = t_block * B_blk * Din_pad * f32b
    blk_out = t_block * B_blk * O_pad * f32b
    weights = (Din_pad * 3 * H_pad * wbytes + 3 * H_pad * f32b
               + H_pad * 3 * H_pad * wbytes + H_pad * f32b
               + L * H_pad * H_pad * wbytes + L * H_pad * f32b
               + H_pad * O_pad * wbytes + O_pad * f32b)
    scratch = (B_blk * H_pad + t_block * B_blk * 4 * H_pad) * f32b
    vmem_est = 2 * (blk_in + blk_out) + 2 * weights + scratch
    vmem_limit = int(max(32 * 2**20, min(64 * 2**20, 2 * vmem_est)))

    kernel = functools.partial(_fused_gru_mlp_kernel, hidden_pad=H_pad,
                               t_block=t_block, tail=tail, num_layer=L)

    out_tm = pl.pallas_call(
        kernel,
        out_shape=jax.ShapeDtypeStruct((T_pad, B_pad, O_pad), jnp.float32),
        grid_spec=pltpu.PrefetchScalarGridSpec(
            num_scalar_prefetch=0,
            grid=(nbb, n_tb),
            in_specs=[
                pl.BlockSpec((t_block, B_blk, Din_pad), lambda b, i: (i, b, 0)),
                pl.BlockSpec((Din_pad, 3 * H_pad), lambda b, i: (0, 0)),
                pl.BlockSpec((1, 3 * H_pad), lambda b, i: (0, 0)),
                pl.BlockSpec((H_pad, 3 * H_pad), lambda b, i: (0, 0)),
                pl.BlockSpec((1, H_pad), lambda b, i: (0, 0)),
                pl.BlockSpec((L, H_pad, H_pad), lambda b, i: (0, 0, 0)),
                pl.BlockSpec((L, 1, H_pad), lambda b, i: (0, 0, 0)),
                pl.BlockSpec((H_pad, O_pad), lambda b, i: (0, 0)),
                pl.BlockSpec((1, O_pad), lambda b, i: (0, 0)),
            ],
            out_specs=pl.BlockSpec((t_block, B_blk, O_pad),
                                   lambda b, i: (i, b, 0)),
            scratch_shapes=[
                pltpu.VMEM((B_blk, H_pad), jnp.float32),                 # h
                pltpu.VMEM((t_block, B_blk, 3 * H_pad), jnp.float32),    # gi
                pltpu.VMEM((t_block, B_blk, H_pad), jnp.float32),        # states
            ],
        ),
        compiler_params=pltpu.CompilerParams(
            dimension_semantics=("parallel", "arbitrary"),
            vmem_limit_bytes=vmem_limit),
    )(xt_tm, wih_p, b_fold, whh_p, bhn, wmlp_p, bmlp_p, wout_p, bout_p)

    out = out_tm[:T, :B, :O]
    return jnp.transpose(out, (1, 0, 2))                                 # (B, T, O)


def init_params(key, input_size, output_size, hidden_size, num_layer):
    F = input_size
    Din = F + 1
    H, O, L = hidden_size, output_size, num_layer
    ks = jax.random.split(key, 8)
    s = 1.0 / jnp.sqrt(jnp.float32(H))
    u = lambda k, shape: jax.random.uniform(k, shape, jnp.float32, -s, s)
    wih = u(ks[0], (Din, 3 * H))     # transposed vs torch weight_ih_l0 (3H, Din)
    bih = u(ks[1], (1, 3 * H))
    whh = u(ks[2], (H, 3 * H))
    bhh = u(ks[3], (1, 3 * H))
    wmlp = u(ks[4], (L, H, H))       # num_layer hidden layers (in == hidden here)
    bmlp = u(ks[5], (L, 1, H))
    wout = u(ks[6], (H, O))
    bout = u(ks[7], (1, O))
    return (wih, bih, whh, bhh, wmlp, bmlp, wout, bout)


def ref_forward(t, x, params, *, hidden_size, num_layer):
    """Pure-JAX f32 reference mirroring the PyTorch forward (for verification)."""
    wih, bih, whh, bhh, wmlp, bmlp, wout, bout = params
    H, L = hidden_size, num_layer
    B, T = t.shape
    xm = jnp.where(jnp.isnan(x), NAN_REP, x)
    dt = jnp.zeros_like(t).at[:, 1:].set(t[:, 1:] - t[:, :-1])
    xt = jnp.concatenate([dt[:, :, None], xm], axis=-1)            # (B, T, Din)

    def step(h, xt_t):
        gi = xt_t @ wih + bih
        gh = h @ whh + bhh
        r = jax.nn.sigmoid(gi[:, :H] + gh[:, :H])
        z = jax.nn.sigmoid(gi[:, H:2 * H] + gh[:, H:2 * H])
        n = jnp.tanh(gi[:, 2 * H:] + r * gh[:, 2 * H:])
        h_new = (1.0 - z) * n + z * h
        return h_new, h_new

    h0 = jnp.zeros((B, H), jnp.float32)
    _, hs = lax.scan(step, h0, jnp.transpose(xt, (1, 0, 2)))
    state = jnp.transpose(hs, (1, 0, 2))                           # (B, T, H)

    a = state
    for l in range(L):
        a = jnp.maximum(a @ wmlp[l] + bmlp[l], 0.0)
    return a @ wout + bout


if __name__ == "__main__":
    B, T = 2, 8
    input_size, output_size, hidden_size, num_layer = 4, 16, 32, 2

    key = jax.random.PRNGKey(0)
    k_t, k_x, k_p = jax.random.split(key, 3)

    t = jnp.cumsum(jax.random.uniform(k_t, (B, T), jnp.float32, 0.1, 1.0), axis=1)
    x = jax.random.normal(k_x, (B, T, input_size), jnp.float32)
    # inject some NaNs (exercise the masking path)
    x = x.at[0, 2, 1].set(jnp.nan)
    x = x.at[1, 5, 0].set(jnp.nan)

    params = init_params(k_p, input_size, output_size, hidden_size, num_layer)

    out = rnn_forward(t, x, params, hidden_size=hidden_size,
                      output_size=output_size, num_layer=num_layer)
    out = jax.block_until_ready(out)

    ref = ref_forward(t, x, params, hidden_size=hidden_size, num_layer=num_layer)
    assert out.shape == (B, T, output_size)
    assert not jnp.any(jnp.isnan(out))
    # kernel uses bf16 MXU operands (per perf review) with f32 accumulation;
    # structural bugs produce O(1) mismatches, bf16 rounding stays well below
    # this tolerance at these scales.
    assert jnp.allclose(out, ref, rtol=4e-2, atol=4e-2), "mismatch vs JAX reference"

    print("KERNEL_OK")
</pallas_src>

<mosaic_0001>
module attributes {stable_mosaic.version = 11 : i64} {
  func.func @_fused_gru_mlp_kernel(%arg0: i32, %arg1: i32, %arg2: memref<8x8x8xf32, #tpu.memory_space<vmem>>, %arg3: memref<8x384xbf16, #tpu.memory_space<vmem>>, %arg4: memref<1x384xf32, #tpu.memory_space<vmem>>, %arg5: memref<128x384xbf16, #tpu.memory_space<vmem>>, %arg6: memref<1x128xf32, #tpu.memory_space<vmem>>, %arg7: memref<2x128x128xbf16, #tpu.memory_space<vmem>>, %arg8: memref<2x1x128xf32, #tpu.memory_space<vmem>>, %arg9: memref<128x128xbf16, #tpu.memory_space<vmem>>, %arg10: memref<1x128xf32, #tpu.memory_space<vmem>>, %arg11: memref<8x8x128xf32, #tpu.memory_space<vmem>>, %arg12: memref<8x128xf32, #tpu.memory_space<vmem>>, %arg13: memref<8x8x384xf32, #tpu.memory_space<vmem>>, %arg14: memref<8x8x128xf32, #tpu.memory_space<vmem>>) attributes {dimension_semantics = [#tpu.dimension_semantics<parallel>, #tpu.dimension_semantics<arbitrary>], iteration_bounds = array<i64: 1, 1>, scalar_prefetch = 0 : i64, scratch_operands = 3 : i64, tpu.core_type = #tpu.core_type<tc>, window_params = [{transform_indices = @transform_0, window_bounds = array<i64: 8, 8, 8>}, {pipeline_mode = #tpu.pipeline_mode<synchronous>, transform_indices = @transform_1, window_bounds = array<i64: 8, 384>}, {pipeline_mode = #tpu.pipeline_mode<synchronous>, transform_indices = @transform_2, window_bounds = array<i64: 1, 384>}, {pipeline_mode = #tpu.pipeline_mode<synchronous>, transform_indices = @transform_3, window_bounds = array<i64: 128, 384>}, {pipeline_mode = #tpu.pipeline_mode<synchronous>, transform_indices = @transform_4, window_bounds = array<i64: 1, 128>}, {pipeline_mode = #tpu.pipeline_mode<synchronous>, transform_indices = @transform_5, window_bounds = array<i64: 2, 128, 128>}, {pipeline_mode = #tpu.pipeline_mode<synchronous>, transform_indices = @transform_6, window_bounds = array<i64: 2, 1, 128>}, {pipeline_mode = #tpu.pipeline_mode<synchronous>, transform_indices = @transform_7, window_bounds = array<i64: 128, 128>}, {pipeline_mode = #tpu.pipeline_mode<synchronous>, transform_indices = @transform_8, window_bounds = array<i64: 1, 128>}, {transform_indices = @transform_9, window_bounds = array<i64: 8, 8, 128>}]} {
    %c0_i32 = arith.constant 0 : i32
    %0 = arith.cmpi eq, %arg1, %c0_i32 : i32
    %1 = arith.extui %0 : i1 to i32
    %c0_i32_0 = arith.constant 0 : i32
    %2 = arith.cmpi ne, %1, %c0_i32_0 : i32
    scf.if %2 {
      %cst_169 = arith.constant 0.000000e+00 : f32
      %358 = vector.broadcast %cst_169 : f32 to vector<8x128xf32>
      %c0_170 = arith.constant 0 : index
      %c0_171 = arith.constant 0 : index
      %359 = vector.load %arg12[%c0_170, %c0_171] : memref<8x128xf32, #tpu.memory_space<vmem>>, vector<8x128xf32>
      tpu.vector_store %arg12[%c0_170, %c0_171], %358 {strides = array<i32>} : memref<8x128xf32, #tpu.memory_space<vmem>>, vector<8x128xf32>,
      %cst_172 = arith.constant 0.000000e+00 : f32
      %360 = vector.broadcast %cst_172 : f32 to vector<8x8x128xf32>
      %c0_173 = arith.constant 0 : index
      %c0_174 = arith.constant 0 : index
      %c0_175 = arith.constant 0 : index
      %361 = vector.load %arg14[%c0_173, %c0_174, %c0_175] : memref<8x8x128xf32, #tpu.memory_space<vmem>>, vector<8x8x128xf32>
      tpu.vector_store %arg14[%c0_173, %c0_174, %c0_175], %360 {strides = array<i32>} : memref<8x8x128xf32, #tpu.memory_space<vmem>>, vector<8x8x128xf32>,
    } else {
    }
    %c0 = arith.constant 0 : index
    %c0_1 = arith.constant 0 : index
    %c0_2 = arith.constant 0 : index
    %3 = vector.load %arg2[%c0, %c0_1, %c0_2] : memref<8x8x8xf32, #tpu.memory_space<vmem>>, vector<8x8x8xf32>
    %4 = vector.shape_cast %3 : vector<8x8x8xf32> to vector<64x8xf32>
    %5 = arith.truncf %4 : vector<64x8xf32> to vector<64x8xbf16>
    %c0_3 = arith.constant 0 : index
    %c0_4 = arith.constant 0 : index
    %6 = vector.load %arg3[%c0_3, %c0_4] : memref<8x384xbf16, #tpu.memory_space<vmem>>, vector<8x384xbf16>
    %cst = arith.constant dense<0.000000e+00> : vector<64x384xf32>
    %7 = tpu.matmul %5, %6, %cst {dimension_numbers = #tpu.dot_dimension_numbers<[1], [0], [0], [1], [0, 0, 1, 1], [], []>} : vector<64x8xbf16>, vector<8x384xbf16>, vector<64x384xf32> -> vector<64x384xf32>
    %c0_5 = arith.constant 0 : index
    %c0_6 = arith.constant 0 : index
    %8 = vector.load %arg4[%c0_5, %c0_6] : memref<1x384xf32, #tpu.memory_space<vmem>>, vector<1x384xf32>
    %9 = vector.broadcast %8 : vector<1x384xf32> to vector<64x384xf32>
    %10 = arith.addf %7, %9 : vector<64x384xf32>
    %11 = vector.shape_cast %10 : vector<64x384xf32> to vector<8x8x384xf32>
    %c0_7 = arith.constant 0 : index
    %c0_8 = arith.constant 0 : index
    %c0_9 = arith.constant 0 : index
    %12 = vector.load %arg13[%c0_7, %c0_8, %c0_9] : memref<8x8x384xf32, #tpu.memory_space<vmem>>, vector<8x8x384xf32>
    tpu.vector_store %arg13[%c0_7, %c0_8, %c0_9], %11 {strides = array<i32>} : memref<8x8x384xf32, #tpu.memory_space<vmem>>, vector<8x8x384xf32>,
    %c0_10 = arith.constant 0 : index
    %c0_11 = arith.constant 0 : index
    %13 = vector.load %arg6[%c0_10, %c0_11] : memref<1x128xf32, #tpu.memory_space<vmem>>, vector<1x128xf32>
    %c0_12 = arith.constant 0 : index
    %c0_13 = arith.constant 0 : index
    %14 = vector.load %arg12[%c0_12, %c0_13] : memref<8x128xf32, #tpu.memory_space<vmem>>, vector<8x128xf32>
    %c0_i32_14 = arith.constant 0 : i32
    %15 = arith.index_cast %c0_i32_14 : i32 to index
    %c0_15 = arith.constant 0 : index
    %c0_16 = arith.constant 0 : index
    %16 = vector.load %arg13[%15, %c0_15, %c0_16] : memref<8x8x384xf32, #tpu.memory_space<vmem>>, vector<1x8x384xf32>
    %17 = vector.shape_cast %16 : vector<1x8x384xf32> to vector<8x384xf32>
    %18 = arith.truncf %14 : vector<8x128xf32> to vector<8x128xbf16>
    %c0_17 = arith.constant 0 : index
    %c0_18 = arith.constant 0 : index
    %19 = vector.load %arg5[%c0_17, %c0_18] : memref<128x384xbf16, #tpu.memory_space<vmem>>, vector<128x128xbf16>
    %cst_19 = arith.constant dense<0.000000e+00> : vector<8x128xf32>
    %20 = tpu.matmul %18, %19, %cst_19 {dimension_numbers = #tpu.dot_dimension_numbers<[1], [0], [0], [1], [0, 0, 1, 1], [], []>} : vector<8x128xbf16>, vector<128x128xbf16>, vector<8x128xf32> -> vector<8x128xf32>
    %c0_20 = arith.constant 0 : index
    %c128 = arith.constant 128 : index
    %21 = vector.load %arg5[%c0_20, %c128] : memref<128x384xbf16, #tpu.memory_space<vmem>>, vector<128x128xbf16>
    %cst_21 = arith.constant dense<0.000000e+00> : vector<8x128xf32>
    %22 = tpu.matmul %18, %21, %cst_21 {dimension_numbers = #tpu.dot_dimension_numbers<[1], [0], [0], [1], [0, 0, 1, 1], [], []>} : vector<8x128xbf16>, vector<128x128xbf16>, vector<8x128xf32> -> vector<8x128xf32>
    %c0_22 = arith.constant 0 : index
    %c256 = arith.constant 256 : index
    %23 = vector.load %arg5[%c0_22, %c256] : memref<128x384xbf16, #tpu.memory_space<vmem>>, vector<128x128xbf16>
    %cst_23 = arith.constant dense<0.000000e+00> : vector<8x128xf32>
    %24 = tpu.matmul %18, %23, %cst_23 {dimension_numbers = #tpu.dot_dimension_numbers<[1], [0], [0], [1], [0, 0, 1, 1], [], []>} : vector<8x128xbf16>, vector<128x128xbf16>, vector<8x128xf32> -> vector<8x128xf32>
    %25 = vector.extract_strided_slice %17 {offsets = [0, 0], sizes = [8, 128], strides = [1, 1]} : vector<8x384xf32> to vector<8x128xf32>
    %26 = arith.addf %25, %20 : vector<8x128xf32>
    %27 = arith.negf %26 : vector<8x128xf32>
    %28 = math.exp %27 : vector<8x128xf32>
    %cst_24 = arith.constant 1.000000e+00 : f32
    %29 = vector.broadcast %cst_24 : f32 to vector<8x128xf32>
    %30 = arith.addf %29, %28 : vector<8x128xf32>
    %31 = arith.divf %29, %30 : vector<8x128xf32>
    %32 = vector.extract_strided_slice %17 {offsets = [0, 128], sizes = [8, 128], strides = [1, 1]} : vector<8x384xf32> to vector<8x128xf32>
    %33 = arith.addf %32, %22 : vector<8x128xf32>
    %34 = arith.negf %33 : vector<8x128xf32>
    %35 = math.exp %34 : vector<8x128xf32>
    %cst_25 = arith.constant 1.000000e+00 : f32
    %36 = vector.broadcast %cst_25 : f32 to vector<8x128xf32>
    %37 = arith.addf %36, %35 : vector<8x128xf32>
    %38 = arith.divf %36, %37 : vector<8x128xf32>
    %39 = vector.extract_strided_slice %17 {offsets = [0, 256], sizes = [8, 128], strides = [1, 1]} : vector<8x384xf32> to vector<8x128xf32>
    %40 = vector.broadcast %13 : vector<1x128xf32> to vector<8x128xf32>
    %41 = arith.addf %24, %40 : vector<8x128xf32>
    %42 = arith.mulf %31, %41 : vector<8x128xf32>
    %43 = arith.addf %39, %42 : vector<8x128xf32>
    %44 = math.tanh %43 : vector<8x128xf32>
    %cst_26 = arith.constant 1.000000e+00 : f32
    %45 = vector.broadcast %cst_26 : f32 to vector<8x128xf32>
    %46 = arith.subf %45, %38 : vector<8x128xf32>
    %47 = arith.mulf %46, %44 : vector<8x128xf32>
    %48 = arith.mulf %38, %14 : vector<8x128xf32>
    %49 = arith.addf %47, %48 : vector<8x128xf32>
    %50 = arith.index_cast %c0_i32_14 : i32 to index
    %c0_27 = arith.constant 0 : index
    %c0_28 = arith.constant 0 : index
    %51 = vector.load %arg14[%50, %c0_27, %c0_28] : memref<8x8x128xf32, #tpu.memory_space<vmem>>, vector<1x8x128xf32>
    %52 = vector.shape_cast %51 : vector<1x8x128xf32> to vector<8x128xf32>
    %53 = vector.shape_cast %49 : vector<8x128xf32> to vector<1x8x128xf32>
    tpu.vector_store %arg14[%50, %c0_27, %c0_28], %53 {strides = array<i32>} : memref<8x8x128xf32, #tpu.memory_space<vmem>>, vector<1x8x128xf32>,
    %c1_i32 = arith.constant 1 : i32
    %54 = arith.index_cast %c1_i32 : i32 to index
    %c0_29 = arith.constant 0 : index
    %c0_30 = arith.constant 0 : index
    %55 = vector.load %arg13[%54, %c0_29, %c0_30] : memref<8x8x384xf32, #tpu.memory_space<vmem>>, vector<1x8x384xf32>
    %56 = vector.shape_cast %55 : vector<1x8x384xf32> to vector<8x384xf32>
    %57 = arith.truncf %49 : vector<8x128xf32> to vector<8x128xbf16>
    %c0_31 = arith.constant 0 : index
    %c0_32 = arith.constant 0 : index
    %58 = vector.load %arg5[%c0_31, %c0_32] : memref<128x384xbf16, #tpu.memory_space<vmem>>, vector<128x128xbf16>
    %cst_33 = arith.constant dense<0.000000e+00> : vector<8x128xf32>
    %59 = tpu.matmul %57, %58, %cst_33 {dimension_numbers = #tpu.dot_dimension_numbers<[1], [0], [0], [1], [0, 0, 1, 1], [], []>} : vector<8x128xbf16>, vector<128x128xbf16>, vector<8x128xf32> -> vector<8x128xf32>
    %c0_34 = arith.constant 0 : index
    %c128_35 = arith.constant 128 : index
    %60 = vector.load %arg5[%c0_34, %c128_35] : memref<128x384xbf16, #tpu.memory_space<vmem>>, vector<128x128xbf16>
    %cst_36 = arith.constant dense<0.000000e+00> : vector<8x128xf32>
    %61 = tpu.matmul %57, %60, %cst_36 {dimension_numbers = #tpu.dot_dimension_numbers<[1], [0], [0], [1], [0, 0, 1, 1], [], []>} : vector<8x128xbf16>, vector<128x128xbf16>, vector<8x128xf32> -> vector<8x128xf32>
    %c0_37 = arith.constant 0 : index
    %c256_38 = arith.constant 256 : index
    %62 = vector.load %arg5[%c0_37, %c256_38] : memref<128x384xbf16, #tpu.memory_space<vmem>>, vector<128x128xbf16>
    %cst_39 = arith.constant dense<0.000000e+00> : vector<8x128xf32>
    %63 = tpu.matmul %57, %62, %cst_39 {dimension_numbers = #tpu.dot_dimension_numbers<[1], [0], [0], [1], [0, 0, 1, 1], [], []>} : vector<8x128xbf16>, vector<128x128xbf16>, vector<8x128xf32> -> vector<8x128xf32>
    %64 = vector.extract_strided_slice %56 {offsets = [0, 0], sizes = [8, 128], strides = [1, 1]} : vector<8x384xf32> to vector<8x128xf32>
    %65 = arith.addf %64, %59 : vector<8x128xf32>
    %66 = arith.negf %65 : vector<8x128xf32>
    %67 = math.exp %66 : vector<8x128xf32>
    %cst_40 = arith.constant 1.000000e+00 : f32
    %68 = vector.broadcast %cst_40 : f32 to vector<8x128xf32>
    %69 = arith.addf %68, %67 : vector<8x128xf32>
    %70 = arith.divf %68, %69 : vector<8x128xf32>
    %71 = vector.extract_strided_slice %56 {offsets = [0, 128], sizes = [8, 128], strides = [1, 1]} : vector<8x384xf32> to vector<8x128xf32>
    %72 = arith.addf %71, %61 : vector<8x128xf32>
    %73 = arith.negf %72 : vector<8x128xf32>
    %74 = math.exp %73 : vector<8x128xf32>
    %cst_41 = arith.constant 1.000000e+00 : f32
    %75 = vector.broadcast %cst_41 : f32 to vector<8x128xf32>
    %76 = arith.addf %75, %74 : vector<8x128xf32>
    %77 = arith.divf %75, %76 : vector<8x128xf32>
    %78 = vector.extract_strided_slice %56 {offsets = [0, 256], sizes = [8, 128], strides = [1, 1]} : vector<8x384xf32> to vector<8x128xf32>
    %79 = vector.broadcast %13 : vector<1x128xf32> to vector<8x128xf32>
    %80 = arith.addf %63, %79 : vector<8x128xf32>
    %81 = arith.mulf %70, %80 : vector<8x128xf32>
    %82 = arith.addf %78, %81 : vector<8x128xf32>
    %83 = math.tanh %82 : vector<8x128xf32>
    %cst_42 = arith.constant 1.000000e+00 : f32
    %84 = vector.broadcast %cst_42 : f32 to vector<8x128xf32>
    %85 = arith.subf %84, %77 : vector<8x128xf32>
    %86 = arith.mulf %85, %83 : vector<8x128xf32>
    %87 = arith.mulf %77, %49 : vector<8x128xf32>
    %88 = arith.addf %86, %87 : vector<8x128xf32>
    %89 = arith.index_cast %c1_i32 : i32 to index
    %c0_43 = arith.constant 0 : index
    %c0_44 = arith.constant 0 : index
    %90 = vector.load %arg14[%89, %c0_43, %c0_44] : memref<8x8x128xf32, #tpu.memory_space<vmem>>, vector<1x8x128xf32>
    %91 = vector.shape_cast %90 : vector<1x8x128xf32> to vector<8x128xf32>
    %92 = vector.shape_cast %88 : vector<8x128xf32> to vector<1x8x128xf32>
    tpu.vector_store %arg14[%89, %c0_43, %c0_44], %92 {strides = array<i32>} : memref<8x8x128xf32, #tpu.memory_space<vmem>>, vector<1x8x128xf32>,
    %c2_i32 = arith.constant 2 : i32
    %93 = arith.index_cast %c2_i32 : i32 to index
    %c0_45 = arith.constant 0 : index
    %c0_46 = arith.constant 0 : index
    %94 = vector.load %arg13[%93, %c0_45, %c0_46] : memref<8x8x384xf32, #tpu.memory_space<vmem>>, vector<1x8x384xf32>
    %95 = vector.shape_cast %94 : vector<1x8x384xf32> to vector<8x384xf32>
    %96 = arith.truncf %88 : vector<8x128xf32> to vector<8x128xbf16>
    %c0_47 = arith.constant 0 : index
    %c0_48 = arith.constant 0 : index
    %97 = vector.load %arg5[%c0_47, %c0_48] : memref<128x384xbf16, #tpu.memory_space<vmem>>, vector<128x128xbf16>
    %cst_49 = arith.constant dense<0.000000e+00> : vector<8x128xf32>
    %98 = tpu.matmul %96, %97, %cst_49 {dimension_numbers = #tpu.dot_dimension_numbers<[1], [0], [0], [1], [0, 0, 1, 1], [], []>} : vector<8x128xbf16>, vector<128x128xbf16>, vector<8x128xf32> -> vector<8x128xf32>
    %c0_50 = arith.constant 0 : index
    %c128_51 = arith.constant 128 : index
    %99 = vector.load %arg5[%c0_50, %c128_51] : memref<128x384xbf16, #tpu.memory_space<vmem>>, vector<128x128xbf16>
    %cst_52 = arith.constant dense<0.000000e+00> : vector<8x128xf32>
    %100 = tpu.matmul %96, %99, %cst_52 {dimension_numbers = #tpu.dot_dimension_numbers<[1], [0], [0], [1], [0, 0, 1, 1], [], []>} : vector<8x128xbf16>, vector<128x128xbf16>, vector<8x128xf32> -> vector<8x128xf32>
    %c0_53 = arith.constant 0 : index
    %c256_54 = arith.constant 256 : index
    %101 = vector.load %arg5[%c0_53, %c256_54] : memref<128x384xbf16, #tpu.memory_space<vmem>>, vector<128x128xbf16>
    %cst_55 = arith.constant dense<0.000000e+00> : vector<8x128xf32>
    %102 = tpu.matmul %96, %101, %cst_55 {dimension_numbers = #tpu.dot_dimension_numbers<[1], [0], [0], [1], [0, 0, 1, 1], [], []>} : vector<8x128xbf16>, vector<128x128xbf16>, vector<8x128xf32> -> vector<8x128xf32>
    %103 = vector.extract_strided_slice %95 {offsets = [0, 0], sizes = [8, 128], strides = [1, 1]} : vector<8x384xf32> to vector<8x128xf32>
    %104 = arith.addf %103, %98 : vector<8x128xf32>
    %105 = arith.negf %104 : vector<8x128xf32>
    %106 = math.exp %105 : vector<8x128xf32>
    %cst_56 = arith.constant 1.000000e+00 : f32
    %107 = vector.broadcast %cst_56 : f32 to vector<8x128xf32>
    %108 = arith.addf %107, %106 : vector<8x128xf32>
    %109 = arith.divf %107, %108 : vector<8x128xf32>
    %110 = vector.extract_strided_slice %95 {offsets = [0, 128], sizes = [8, 128], strides = [1, 1]} : vector<8x384xf32> to vector<8x128xf32>
    %111 = arith.addf %110, %100 : vector<8x128xf32>
    %112 = arith.negf %111 : vector<8x128xf32>
    %113 = math.exp %112 : vector<8x128xf32>
    %cst_57 = arith.constant 1.000000e+00 : f32
    %114 = vector.broadcast %cst_57 : f32 to vector<8x128xf32>
    %115 = arith.addf %114, %113 : vector<8x128xf32>
    %116 = arith.divf %114, %115 : vector<8x128xf32>
    %117 = vector.extract_strided_slice %95 {offsets = [0, 256], sizes = [8, 128], strides = [1, 1]} : vector<8x384xf32> to vector<8x128xf32>
    %118 = vector.broadcast %13 : vector<1x128xf32> to vector<8x128xf32>
    %119 = arith.addf %102, %118 : vector<8x128xf32>
    %120 = arith.mulf %109, %119 : vector<8x128xf32>
    %121 = arith.addf %117, %120 : vector<8x128xf32>
    %122 = math.tanh %121 : vector<8x128xf32>
    %cst_58 = arith.constant 1.000000e+00 : f32
    %123 = vector.broadcast %cst_58 : f32 to vector<8x128xf32>
    %124 = arith.subf %123, %116 : vector<8x128xf32>
    %125 = arith.mulf %124, %122 : vector<8x128xf32>
    %126 = arith.mulf %116, %88 : vector<8x128xf32>
    %127 = arith.addf %125, %126 : vector<8x128xf32>
    %128 = arith.index_cast %c2_i32 : i32 to index
    %c0_59 = arith.constant 0 : index
    %c0_60 = arith.constant 0 : index
    %129 = vector.load %arg14[%128, %c0_59, %c0_60] : memref<8x8x128xf32, #tpu.memory_space<vmem>>, vector<1x8x128xf32>
    %130 = vector.shape_cast %129 : vector<1x8x128xf32> to vector<8x128xf32>
    %131 = vector.shape_cast %127 : vector<8x128xf32> to vector<1x8x128xf32>
    tpu.vector_store %arg14[%128, %c0_59, %c0_60], %131 {strides = array<i32>} : memref<8x8x128xf32, #tpu.memory_space<vmem>>, vector<1x8x128xf32>,
    %c3_i32 = arith.constant 3 : i32
    %132 = arith.index_cast %c3_i32 : i32 to index
    %c0_61 = arith.constant 0 : index
    %c0_62 = arith.constant 0 : index
    %133 = vector.load %arg13[%132, %c0_61, %c0_62] : memref<8x8x384xf32, #tpu.memory_space<vmem>>, vector<1x8x384xf32>
    %134 = vector.shape_cast %133 : vector<1x8x384xf32> to vector<8x384xf32>
    %135 = arith.truncf %127 : vector<8x128xf32> to vector<8x128xbf16>
    %c0_63 = arith.constant 0 : index
    %c0_64 = arith.constant 0 : index
    %136 = vector.load %arg5[%c0_63, %c0_64] : memref<128x384xbf16, #tpu.memory_space<vmem>>, vector<128x128xbf16>
    %cst_65 = arith.constant dense<0.000000e+00> : vector<8x128xf32>
    %137 = tpu.matmul %135, %136, %cst_65 {dimension_numbers = #tpu.dot_dimension_numbers<[1], [0], [0], [1], [0, 0, 1, 1], [], []>} : vector<8x128xbf16>, vector<128x128xbf16>, vector<8x128xf32> -> vector<8x128xf32>
    %c0_66 = arith.constant 0 : index
    %c128_67 = arith.constant 128 : index
    %138 = vector.load %arg5[%c0_66, %c128_67] : memref<128x384xbf16, #tpu.memory_space<vmem>>, vector<128x128xbf16>
    %cst_68 = arith.constant dense<0.000000e+00> : vector<8x128xf32>
    %139 = tpu.matmul %135, %138, %cst_68 {dimension_numbers = #tpu.dot_dimension_numbers<[1], [0], [0], [1], [0, 0, 1, 1], [], []>} : vector<8x128xbf16>, vector<128x128xbf16>, vector<8x128xf32> -> vector<8x128xf32>
    %c0_69 = arith.constant 0 : index
    %c256_70 = arith.constant 256 : index
    %140 = vector.load %arg5[%c0_69, %c256_70] : memref<128x384xbf16, #tpu.memory_space<vmem>>, vector<128x128xbf16>
    %cst_71 = arith.constant dense<0.000000e+00> : vector<8x128xf32>
    %141 = tpu.matmul %135, %140, %cst_71 {dimension_numbers = #tpu.dot_dimension_numbers<[1], [0], [0], [1], [0, 0, 1, 1], [], []>} : vector<8x128xbf16>, vector<128x128xbf16>, vector<8x128xf32> -> vector<8x128xf32>
    %142 = vector.extract_strided_slice %134 {offsets = [0, 0], sizes = [8, 128], strides = [1, 1]} : vector<8x384xf32> to vector<8x128xf32>
    %143 = arith.addf %142, %137 : vector<8x128xf32>
    %144 = arith.negf %143 : vector<8x128xf32>
    %145 = math.exp %144 : vector<8x128xf32>
    %cst_72 = arith.constant 1.000000e+00 : f32
    %146 = vector.broadcast %cst_72 : f32 to vector<8x128xf32>
    %147 = arith.addf %146, %145 : vector<8x128xf32>
    %148 = arith.divf %146, %147 : vector<8x128xf32>
    %149 = vector.extract_strided_slice %134 {offsets = [0, 128], sizes = [8, 128], strides = [1, 1]} : vector<8x384xf32> to vector<8x128xf32>
    %150 = arith.addf %149, %139 : vector<8x128xf32>
    %151 = arith.negf %150 : vector<8x128xf32>
    %152 = math.exp %151 : vector<8x128xf32>
    %cst_73 = arith.constant 1.000000e+00 : f32
    %153 = vector.broadcast %cst_73 : f32 to vector<8x128xf32>
    %154 = arith.addf %153, %152 : vector<8x128xf32>
    %155 = arith.divf %153, %154 : vector<8x128xf32>
    %156 = vector.extract_strided_slice %134 {offsets = [0, 256], sizes = [8, 128], strides = [1, 1]} : vector<8x384xf32> to vector<8x128xf32>
    %157 = vector.broadcast %13 : vector<1x128xf32> to vector<8x128xf32>
    %158 = arith.addf %141, %157 : vector<8x128xf32>
    %159 = arith.mulf %148, %158 : vector<8x128xf32>
    %160 = arith.addf %156, %159 : vector<8x128xf32>
    %161 = math.tanh %160 : vector<8x128xf32>
    %cst_74 = arith.constant 1.000000e+00 : f32
    %162 = vector.broadcast %cst_74 : f32 to vector<8x128xf32>
    %163 = arith.subf %162, %155 : vector<8x128xf32>
    %164 = arith.mulf %163, %161 : vector<8x128xf32>
    %165 = arith.mulf %155, %127 : vector<8x128xf32>
    %166 = arith.addf %164, %165 : vector<8x128xf32>
    %167 = arith.index_cast %c3_i32 : i32 to index
    %c0_75 = arith.constant 0 : index
    %c0_76 = arith.constant 0 : index
    %168 = vector.load %arg14[%167, %c0_75, %c0_76] : memref<8x8x128xf32, #tpu.memory_space<vmem>>, vector<1x8x128xf32>
    %169 = vector.shape_cast %168 : vector<1x8x128xf32> to vector<8x128xf32>
    %170 = vector.shape_cast %166 : vector<8x128xf32> to vector<1x8x128xf32>
    tpu.vector_store %arg14[%167, %c0_75, %c0_76], %170 {strides = array<i32>} : memref<8x8x128xf32, #tpu.memory_space<vmem>>, vector<1x8x128xf32>,
    %c4_i32 = arith.constant 4 : i32
    %171 = arith.index_cast %c4_i32 : i32 to index
    %c0_77 = arith.constant 0 : index
    %c0_78 = arith.constant 0 : index
    %172 = vector.load %arg13[%171, %c0_77, %c0_78] : memref<8x8x384xf32, #tpu.memory_space<vmem>>, vector<1x8x384xf32>
    %173 = vector.shape_cast %172 : vector<1x8x384xf32> to vector<8x384xf32>
    %174 = arith.truncf %166 : vector<8x128xf32> to vector<8x128xbf16>
    %c0_79 = arith.constant 0 : index
    %c0_80 = arith.constant 0 : index
    %175 = vector.load %arg5[%c0_79, %c0_80] : memref<128x384xbf16, #tpu.memory_space<vmem>>, vector<128x128xbf16>
    %cst_81 = arith.constant dense<0.000000e+00> : vector<8x128xf32>
    %176 = tpu.matmul %174, %175, %cst_81 {dimension_numbers = #tpu.dot_dimension_numbers<[1], [0], [0], [1], [0, 0, 1, 1], [], []>} : vector<8x128xbf16>, vector<128x128xbf16>, vector<8x128xf32> -> vector<8x128xf32>
    %c0_82 = arith.constant 0 : index
    %c128_83 = arith.constant 128 : index
    %177 = vector.load %arg5[%c0_82, %c128_83] : memref<128x384xbf16, #tpu.memory_space<vmem>>, vector<128x128xbf16>
    %cst_84 = arith.constant dense<0.000000e+00> : vector<8x128xf32>
    %178 = tpu.matmul %174, %177, %cst_84 {dimension_numbers = #tpu.dot_dimension_numbers<[1], [0], [0], [1], [0, 0, 1, 1], [], []>} : vector<8x128xbf16>, vector<128x128xbf16>, vector<8x128xf32> -> vector<8x128xf32>
    %c0_85 = arith.constant 0 : index
    %c256_86 = arith.constant 256 : index
    %179 = vector.load %arg5[%c0_85, %c256_86] : memref<128x384xbf16, #tpu.memory_space<vmem>>, vector<128x128xbf16>
    %cst_87 = arith.constant dense<0.000000e+00> : vector<8x128xf32>
    %180 = tpu.matmul %174, %179, %cst_87 {dimension_numbers = #tpu.dot_dimension_numbers<[1], [0], [0], [1], [0, 0, 1, 1], [], []>} : vector<8x128xbf16>, vector<128x128xbf16>, vector<8x128xf32> -> vector<8x128xf32>
    %181 = vector.extract_strided_slice %173 {offsets = [0, 0], sizes = [8, 128], strides = [1, 1]} : vector<8x384xf32> to vector<8x128xf32>
    %182 = arith.addf %181, %176 : vector<8x128xf32>
    %183 = arith.negf %182 : vector<8x128xf32>
    %184 = math.exp %183 : vector<8x128xf32>
    %cst_88 = arith.constant 1.000000e+00 : f32
    %185 = vector.broadcast %cst_88 : f32 to vector<8x128xf32>
    %186 = arith.addf %185, %184 : vector<8x128xf32>
    %187 = arith.divf %185, %186 : vector<8x128xf32>
    %188 = vector.extract_strided_slice %173 {offsets = [0, 128], sizes = [8, 128], strides = [1, 1]} : vector<8x384xf32> to vector<8x128xf32>
    %189 = arith.addf %188, %178 : vector<8x128xf32>
    %190 = arith.negf %189 : vector<8x128xf32>
    %191 = math.exp %190 : vector<8x128xf32>
    %cst_89 = arith.constant 1.000000e+00 : f32
    %192 = vector.broadcast %cst_89 : f32 to vector<8x128xf32>
    %193 = arith.addf %192, %191 : vector<8x128xf32>
    %194 = arith.divf %192, %193 : vector<8x128xf32>
    %195 = vector.extract_strided_slice %173 {offsets = [0, 256], sizes = [8, 128], strides = [1, 1]} : vector<8x384xf32> to vector<8x128xf32>
    %196 = vector.broadcast %13 : vector<1x128xf32> to vector<8x128xf32>
    %197 = arith.addf %180, %196 : vector<8x128xf32>
    %198 = arith.mulf %187, %197 : vector<8x128xf32>
    %199 = arith.addf %195, %198 : vector<8x128xf32>
    %200 = math.tanh %199 : vector<8x128xf32>
    %cst_90 = arith.constant 1.000000e+00 : f32
    %201 = vector.broadcast %cst_90 : f32 to vector<8x128xf32>
    %202 = arith.subf %201, %194 : vector<8x128xf32>
    %203 = arith.mulf %202, %200 : vector<8x128xf32>
    %204 = arith.mulf %194, %166 : vector<8x128xf32>
    %205 = arith.addf %203, %204 : vector<8x128xf32>
    %206 = arith.index_cast %c4_i32 : i32 to index
    %c0_91 = arith.constant 0 : index
    %c0_92 = arith.constant 0 : index
    %207 = vector.load %arg14[%206, %c0_91, %c0_92] : memref<8x8x128xf32, #tpu.memory_space<vmem>>, vector<1x8x128xf32>
    %208 = vector.shape_cast %207 : vector<1x8x128xf32> to vector<8x128xf32>
    %209 = vector.shape_cast %205 : vector<8x128xf32> to vector<1x8x128xf32>
    tpu.vector_store %arg14[%206, %c0_91, %c0_92], %209 {strides = array<i32>} : memref<8x8x128xf32, #tpu.memory_space<vmem>>, vector<1x8x128xf32>,
    %c5_i32 = arith.constant 5 : i32
    %210 = arith.index_cast %c5_i32 : i32 to index
    %c0_93 = arith.constant 0 : index
    %c0_94 = arith.constant 0 : index
    %211 = vector.load %arg13[%210, %c0_93, %c0_94] : memref<8x8x384xf32, #tpu.memory_space<vmem>>, vector<1x8x384xf32>
    %212 = vector.shape_cast %211 : vector<1x8x384xf32> to vector<8x384xf32>
    %213 = arith.truncf %205 : vector<8x128xf32> to vector<8x128xbf16>
    %c0_95 = arith.constant 0 : index
    %c0_96 = arith.constant 0 : index
    %214 = vector.load %arg5[%c0_95, %c0_96] : memref<128x384xbf16, #tpu.memory_space<vmem>>, vector<128x128xbf16>
    %cst_97 = arith.constant dense<0.000000e+00> : vector<8x128xf32>
    %215 = tpu.matmul %213, %214, %cst_97 {dimension_numbers = #tpu.dot_dimension_numbers<[1], [0], [0], [1], [0, 0, 1, 1], [], []>} : vector<8x128xbf16>, vector<128x128xbf16>, vector<8x128xf32> -> vector<8x128xf32>
    %c0_98 = arith.constant 0 : index
    %c128_99 = arith.constant 128 : index
    %216 = vector.load %arg5[%c0_98, %c128_99] : memref<128x384xbf16, #tpu.memory_space<vmem>>, vector<128x128xbf16>
    %cst_100 = arith.constant dense<0.000000e+00> : vector<8x128xf32>
    %217 = tpu.matmul %213, %216, %cst_100 {dimension_numbers = #tpu.dot_dimension_numbers<[1], [0], [0], [1], [0, 0, 1, 1], [], []>} : vector<8x128xbf16>, vector<128x128xbf16>, vector<8x128xf32> -> vector<8x128xf32>
    %c0_101 = arith.constant 0 : index
    %c256_102 = arith.constant 256 : index
    %218 = vector.load %arg5[%c0_101, %c256_102] : memref<128x384xbf16, #tpu.memory_space<vmem>>, vector<128x128xbf16>
    %cst_103 = arith.constant dense<0.000000e+00> : vector<8x128xf32>
    %219 = tpu.matmul %213, %218, %cst_103 {dimension_numbers = #tpu.dot_dimension_numbers<[1], [0], [0], [1], [0, 0, 1, 1], [], []>} : vector<8x128xbf16>, vector<128x128xbf16>, vector<8x128xf32> -> vector<8x128xf32>
    %220 = vector.extract_strided_slice %212 {offsets = [0, 0], sizes = [8, 128], strides = [1, 1]} : vector<8x384xf32> to vector<8x128xf32>
    %221 = arith.addf %220, %215 : vector<8x128xf32>
    %222 = arith.negf %221 : vector<8x128xf32>
    %223 = math.exp %222 : vector<8x128xf32>
    %cst_104 = arith.constant 1.000000e+00 : f32
    %224 = vector.broadcast %cst_104 : f32 to vector<8x128xf32>
    %225 = arith.addf %224, %223 : vector<8x128xf32>
    %226 = arith.divf %224, %225 : vector<8x128xf32>
    %227 = vector.extract_strided_slice %212 {offsets = [0, 128], sizes = [8, 128], strides = [1, 1]} : vector<8x384xf32> to vector<8x128xf32>
    %228 = arith.addf %227, %217 : vector<8x128xf32>
    %229 = arith.negf %228 : vector<8x128xf32>
    %230 = math.exp %229 : vector<8x128xf32>
    %cst_105 = arith.constant 1.000000e+00 : f32
    %231 = vector.broadcast %cst_105 : f32 to vector<8x128xf32>
    %232 = arith.addf %231, %230 : vector<8x128xf32>
    %233 = arith.divf %231, %232 : vector<8x128xf32>
    %234 = vector.extract_strided_slice %212 {offsets = [0, 256], sizes = [8, 128], strides = [1, 1]} : vector<8x384xf32> to vector<8x128xf32>
    %235 = vector.broadcast %13 : vector<1x128xf32> to vector<8x128xf32>
    %236 = arith.addf %219, %235 : vector<8x128xf32>
    %237 = arith.mulf %226, %236 : vector<8x128xf32>
    %238 = arith.addf %234, %237 : vector<8x128xf32>
    %239 = math.tanh %238 : vector<8x128xf32>
    %cst_106 = arith.constant 1.000000e+00 : f32
    %240 = vector.broadcast %cst_106 : f32 to vector<8x128xf32>
    %241 = arith.subf %240, %233 : vector<8x128xf32>
    %242 = arith.mulf %241, %239 : vector<8x128xf32>
    %243 = arith.mulf %233, %205 : vector<8x128xf32>
    %244 = arith.addf %242, %243 : vector<8x128xf32>
    %245 = arith.index_cast %c5_i32 : i32 to index
    %c0_107 = arith.constant 0 : index
    %c0_108 = arith.constant 0 : index
    %246 = vector.load %arg14[%245, %c0_107, %c0_108] : memref<8x8x128xf32, #tpu.memory_space<vmem>>, vector<1x8x128xf32>
    %247 = vector.shape_cast %246 : vector<1x8x128xf32> to vector<8x128xf32>
    %248 = vector.shape_cast %244 : vector<8x128xf32> to vector<1x8x128xf32>
    tpu.vector_store %arg14[%245, %c0_107, %c0_108], %248 {strides = array<i32>} : memref<8x8x128xf32, #tpu.memory_space<vmem>>, vector<1x8x128xf32>,
    %c6_i32 = arith.constant 6 : i32
    %249 = arith.index_cast %c6_i32 : i32 to index
    %c0_109 = arith.constant 0 : index
    %c0_110 = arith.constant 0 : index
    %250 = vector.load %arg13[%249, %c0_109, %c0_110] : memref<8x8x384xf32, #tpu.memory_space<vmem>>, vector<1x8x384xf32>
    %251 = vector.shape_cast %250 : vector<1x8x384xf32> to vector<8x384xf32>
    %252 = arith.truncf %244 : vector<8x128xf32> to vector<8x128xbf16>
    %c0_111 = arith.constant 0 : index
    %c0_112 = arith.constant 0 : index
    %253 = vector.load %arg5[%c0_111, %c0_112] : memref<128x384xbf16, #tpu.memory_space<vmem>>, vector<128x128xbf16>
    %cst_113 = arith.constant dense<0.000000e+00> : vector<8x128xf32>
    %254 = tpu.matmul %252, %253, %cst_113 {dimension_numbers = #tpu.dot_dimension_numbers<[1], [0], [0], [1], [0, 0, 1, 1], [], []>} : vector<8x128xbf16>, vector<128x128xbf16>, vector<8x128xf32> -> vector<8x128xf32>
    %c0_114 = arith.constant 0 : index
    %c128_115 = arith.constant 128 : index
    %255 = vector.load %arg5[%c0_114, %c128_115] : memref<128x384xbf16, #tpu.memory_space<vmem>>, vector<128x128xbf16>
    %cst_116 = arith.constant dense<0.000000e+00> : vector<8x128xf32>
    %256 = tpu.matmul %252, %255, %cst_116 {dimension_numbers = #tpu.dot_dimension_numbers<[1], [0], [0], [1], [0, 0, 1, 1], [], []>} : vector<8x128xbf16>, vector<128x128xbf16>, vector<8x128xf32> -> vector<8x128xf32>
    %c0_117 = arith.constant 0 : index
    %c256_118 = arith.constant 256 : index
    %257 = vector.load %arg5[%c0_117, %c256_118] : memref<128x384xbf16, #tpu.memory_space<vmem>>, vector<128x128xbf16>
    %cst_119 = arith.constant dense<0.000000e+00> : vector<8x128xf32>
    %258 = tpu.matmul %252, %257, %cst_119 {dimension_numbers = #tpu.dot_dimension_numbers<[1], [0], [0], [1], [0, 0, 1, 1], [], []>} : vector<8x128xbf16>, vector<128x128xbf16>, vector<8x128xf32> -> vector<8x128xf32>
    %259 = vector.extract_strided_slice %251 {offsets = [0, 0], sizes = [8, 128], strides = [1, 1]} : vector<8x384xf32> to vector<8x128xf32>
    %260 = arith.addf %259, %254 : vector<8x128xf32>
    %261 = arith.negf %260 : vector<8x128xf32>
    %262 = math.exp %261 : vector<8x128xf32>
    %cst_120 = arith.constant 1.000000e+00 : f32
    %263 = vector.broadcast %cst_120 : f32 to vector<8x128xf32>
    %264 = arith.addf %263, %262 : vector<8x128xf32>
    %265 = arith.divf %263, %264 : vector<8x128xf32>
    %266 = vector.extract_strided_slice %251 {offsets = [0, 128], sizes = [8, 128], strides = [1, 1]} : vector<8x384xf32> to vector<8x128xf32>
    %267 = arith.addf %266, %256 : vector<8x128xf32>
    %268 = arith.negf %267 : vector<8x128xf32>
    %269 = math.exp %268 : vector<8x128xf32>
    %cst_121 = arith.constant 1.000000e+00 : f32
    %270 = vector.broadcast %cst_121 : f32 to vector<8x128xf32>
    %271 = arith.addf %270, %269 : vector<8x128xf32>
    %272 = arith.divf %270, %271 : vector<8x128xf32>
    %273 = vector.extract_strided_slice %251 {offsets = [0, 256], sizes = [8, 128], strides = [1, 1]} : vector<8x384xf32> to vector<8x128xf32>
    %274 = vector.broadcast %13 : vector<1x128xf32> to vector<8x128xf32>
    %275 = arith.addf %258, %274 : vector<8x128xf32>
    %276 = arith.mulf %265, %275 : vector<8x128xf32>
    %277 = arith.addf %273, %276 : vector<8x128xf32>
    %278 = math.tanh %277 : vector<8x128xf32>
    %cst_122 = arith.constant 1.000000e+00 : f32
    %279 = vector.broadcast %cst_122 : f32 to vector<8x128xf32>
    %280 = arith.subf %279, %272 : vector<8x128xf32>
    %281 = arith.mulf %280, %278 : vector<8x128xf32>
    %282 = arith.mulf %272, %244 : vector<8x128xf32>
    %283 = arith.addf %281, %282 : vector<8x128xf32>
    %284 = arith.index_cast %c6_i32 : i32 to index
    %c0_123 = arith.constant 0 : index
    %c0_124 = arith.constant 0 : index
    %285 = vector.load %arg14[%284, %c0_123, %c0_124] : memref<8x8x128xf32, #tpu.memory_space<vmem>>, vector<1x8x128xf32>
    %286 = vector.shape_cast %285 : vector<1x8x128xf32> to vector<8x128xf32>
    %287 = vector.shape_cast %283 : vector<8x128xf32> to vector<1x8x128xf32>
    tpu.vector_store %arg14[%284, %c0_123, %c0_124], %287 {strides = array<i32>} : memref<8x8x128xf32, #tpu.memory_space<vmem>>, vector<1x8x128xf32>,
    %c7_i32 = arith.constant 7 : i32
    %288 = arith.index_cast %c7_i32 : i32 to index
    %c0_125 = arith.constant 0 : index
    %c0_126 = arith.constant 0 : index
    %289 = vector.load %arg13[%288, %c0_125, %c0_126] : memref<8x8x384xf32, #tpu.memory_space<vmem>>, vector<1x8x384xf32>
    %290 = vector.shape_cast %289 : vector<1x8x384xf32> to vector<8x384xf32>
    %291 = arith.truncf %283 : vector<8x128xf32> to vector<8x128xbf16>
    %c0_127 = arith.constant 0 : index
    %c0_128 = arith.constant 0 : index
    %292 = vector.load %arg5[%c0_127, %c0_128] : memref<128x384xbf16, #tpu.memory_space<vmem>>, vector<128x128xbf16>
    %cst_129 = arith.constant dense<0.000000e+00> : vector<8x128xf32>
    %293 = tpu.matmul %291, %292, %cst_129 {dimension_numbers = #tpu.dot_dimension_numbers<[1], [0], [0], [1], [0, 0, 1, 1], [], []>} : vector<8x128xbf16>, vector<128x128xbf16>, vector<8x128xf32> -> vector<8x128xf32>
    %c0_130 = arith.constant 0 : index
    %c128_131 = arith.constant 128 : index
    %294 = vector.load %arg5[%c0_130, %c128_131] : memref<128x384xbf16, #tpu.memory_space<vmem>>, vector<128x128xbf16>
    %cst_132 = arith.constant dense<0.000000e+00> : vector<8x128xf32>
    %295 = tpu.matmul %291, %294, %cst_132 {dimension_numbers = #tpu.dot_dimension_numbers<[1], [0], [0], [1], [0, 0, 1, 1], [], []>} : vector<8x128xbf16>, vector<128x128xbf16>, vector<8x128xf32> -> vector<8x128xf32>
    %c0_133 = arith.constant 0 : index
    %c256_134 = arith.constant 256 : index
    %296 = vector.load %arg5[%c0_133, %c256_134] : memref<128x384xbf16, #tpu.memory_space<vmem>>, vector<128x128xbf16>
    %cst_135 = arith.constant dense<0.000000e+00> : vector<8x128xf32>
    %297 = tpu.matmul %291, %296, %cst_135 {dimension_numbers = #tpu.dot_dimension_numbers<[1], [0], [0], [1], [0, 0, 1, 1], [], []>} : vector<8x128xbf16>, vector<128x128xbf16>, vector<8x128xf32> -> vector<8x128xf32>
    %298 = vector.extract_strided_slice %290 {offsets = [0, 0], sizes = [8, 128], strides = [1, 1]} : vector<8x384xf32> to vector<8x128xf32>
    %299 = arith.addf %298, %293 : vector<8x128xf32>
    %300 = arith.negf %299 : vector<8x128xf32>
    %301 = math.exp %300 : vector<8x128xf32>
    %cst_136 = arith.constant 1.000000e+00 : f32
    %302 = vector.broadcast %cst_136 : f32 to vector<8x128xf32>
    %303 = arith.addf %302, %301 : vector<8x128xf32>
    %304 = arith.divf %302, %303 : vector<8x128xf32>
    %305 = vector.extract_strided_slice %290 {offsets = [0, 128], sizes = [8, 128], strides = [1, 1]} : vector<8x384xf32> to vector<8x128xf32>
    %306 = arith.addf %305, %295 : vector<8x128xf32>
    %307 = arith.negf %306 : vector<8x128xf32>
    %308 = math.exp %307 : vector<8x128xf32>
    %cst_137 = arith.constant 1.000000e+00 : f32
    %309 = vector.broadcast %cst_137 : f32 to vector<8x128xf32>
    %310 = arith.addf %309, %308 : vector<8x128xf32>
    %311 = arith.divf %309, %310 : vector<8x128xf32>
    %312 = vector.extract_strided_slice %290 {offsets = [0, 256], sizes = [8, 128], strides = [1, 1]} : vector<8x384xf32> to vector<8x128xf32>
    %313 = vector.broadcast %13 : vector<1x128xf32> to vector<8x128xf32>
    %314 = arith.addf %297, %313 : vector<8x128xf32>
    %315 = arith.mulf %304, %314 : vector<8x128xf32>
    %316 = arith.addf %312, %315 : vector<8x128xf32>
    %317 = math.tanh %316 : vector<8x128xf32>
    %cst_138 = arith.constant 1.000000e+00 : f32
    %318 = vector.broadcast %cst_138 : f32 to vector<8x128xf32>
    %319 = arith.subf %318, %311 : vector<8x128xf32>
    %320 = arith.mulf %319, %317 : vector<8x128xf32>
    %321 = arith.mulf %311, %283 : vector<8x128xf32>
    %322 = arith.addf %320, %321 : vector<8x128xf32>
    %323 = arith.index_cast %c7_i32 : i32 to index
    %c0_139 = arith.constant 0 : index
    %c0_140 = arith.constant 0 : index
    %324 = vector.load %arg14[%323, %c0_139, %c0_140] : memref<8x8x128xf32, #tpu.memory_space<vmem>>, vector<1x8x128xf32>
    %325 = vector.shape_cast %324 : vector<1x8x128xf32> to vector<8x128xf32>
    %326 = vector.shape_cast %322 : vector<8x128xf32> to vector<1x8x128xf32>
    tpu.vector_store %arg14[%323, %c0_139, %c0_140], %326 {strides = array<i32>} : memref<8x8x128xf32, #tpu.memory_space<vmem>>, vector<1x8x128xf32>,
    %c8_i32 = arith.constant 8 : i32
    %c0_141 = arith.constant 0 : index
    %c0_142 = arith.constant 0 : index
    %327 = vector.load %arg12[%c0_141, %c0_142] : memref<8x128xf32, #tpu.memory_space<vmem>>, vector<8x128xf32>
    tpu.vector_store %arg12[%c0_141, %c0_142], %322 {strides = array<i32>} : memref<8x128xf32, #tpu.memory_space<vmem>>, vector<8x128xf32>,
    %c0_143 = arith.constant 0 : index
    %c0_144 = arith.constant 0 : index
    %c0_145 = arith.constant 0 : index
    %328 = vector.load %arg14[%c0_143, %c0_144, %c0_145] : memref<8x8x128xf32, #tpu.memory_space<vmem>>, vector<8x8x128xf32>
    %329 = vector.shape_cast %328 : vector<8x8x128xf32> to vector<64x128xf32>
    %330 = arith.truncf %329 : vector<64x128xf32> to vector<64x128xbf16>
    %c0_146 = arith.constant 0 : index
    %c0_147 = arith.constant 0 : index
    %c0_148 = arith.constant 0 : index
    %331 = vector.load %arg7[%c0_146, %c0_147, %c0_148] : memref<2x128x128xbf16, #tpu.memory_space<vmem>>, vector<1x128x128xbf16>
    %332 = vector.shape_cast %331 : vector<1x128x128xbf16> to vector<128x128xbf16>
    %cst_149 = arith.constant dense<0.000000e+00> : vector<64x128xf32>
    %333 = tpu.matmul %330, %332, %cst_149 {dimension_numbers = #tpu.dot_dimension_numbers<[1], [0], [0], [1], [0, 0, 1, 1], [], []>} : vector<64x128xbf16>, vector<128x128xbf16>, vector<64x128xf32> -> vector<64x128xf32>
    %c0_150 = arith.constant 0 : index
    %c0_151 = arith.constant 0 : index
    %c0_152 = arith.constant 0 : index
    %334 = vector.load %arg8[%c0_150, %c0_151, %c0_152] : memref<2x1x128xf32, #tpu.memory_space<vmem>>, vector<1x1x128xf32>
    %335 = vector.shape_cast %334 : vector<1x1x128xf32> to vector<1x128xf32>
    %336 = vector.broadcast %335 : vector<1x128xf32> to vector<64x128xf32>
    %337 = arith.addf %333, %336 : vector<64x128xf32>
    %cst_153 = arith.constant 0.000000e+00 : f32
    %338 = vector.broadcast %cst_153 : f32 to vector<64x128xf32>
    %339 = arith.maximumf %337, %338 : vector<64x128xf32>
    %340 = arith.truncf %339 : vector<64x128xf32> to vector<64x128xbf16>
    %c1 = arith.constant 1 : index
    %c0_154 = arith.constant 0 : index
    %c0_155 = arith.constant 0 : index
    %341 = vector.load %arg7[%c1, %c0_154, %c0_155] : memref<2x128x128xbf16, #tpu.memory_space<vmem>>, vector<1x128x128xbf16>
    %342 = vector.shape_cast %341 : vector<1x128x128xbf16> to vector<128x128xbf16>
    %cst_156 = arith.constant dense<0.000000e+00> : vector<64x128xf32>
    %343 = tpu.matmul %340, %342, %cst_156 {dimension_numbers = #tpu.dot_dimension_numbers<[1], [0], [0], [1], [0, 0, 1, 1], [], []>} : vector<64x128xbf16>, vector<128x128xbf16>, vector<64x128xf32> -> vector<64x128xf32>
    %c1_157 = arith.constant 1 : index
    %c0_158 = arith.constant 0 : index
    %c0_159 = arith.constant 0 : index
    %344 = vector.load %arg8[%c1_157, %c0_158, %c0_159] : memref<2x1x128xf32, #tpu.memory_space<vmem>>, vector<1x1x128xf32>
    %345 = vector.shape_cast %344 : vector<1x1x128xf32> to vector<1x128xf32>
    %346 = vector.broadcast %345 : vector<1x128xf32> to vector<64x128xf32>
    %347 = arith.addf %343, %346 : vector<64x128xf32>
    %cst_160 = arith.constant 0.000000e+00 : f32
    %348 = vector.broadcast %cst_160 : f32 to vector<64x128xf32>
    %349 = arith.maximumf %347, %348 : vector<64x128xf32>
    %350 = arith.truncf %349 : vector<64x128xf32> to vector<64x128xbf16>
    %c0_161 = arith.constant 0 : index
    %c0_162 = arith.constant 0 : index
    %351 = vector.load %arg9[%c0_161, %c0_162] : memref<128x128xbf16, #tpu.memory_space<vmem>>, vector<128x128xbf16>
    %cst_163 = arith.constant dense<0.000000e+00> : vector<64x128xf32>
    %352 = tpu.matmul %350, %351, %cst_163 {dimension_numbers = #tpu.dot_dimension_numbers<[1], [0], [0], [1], [0, 0, 1, 1], [], []>} : vector<64x128xbf16>, vector<128x128xbf16>, vector<64x128xf32> -> vector<64x128xf32>
    %c0_164 = arith.constant 0 : index
    %c0_165 = arith.constant 0 : index
    %353 = vector.load %arg10[%c0_164, %c0_165] : memref<1x128xf32, #tpu.memory_space<vmem>>, vector<1x128xf32>
    %354 = vector.broadcast %353 : vector<1x128xf32> to vector<64x128xf32>
    %355 = arith.addf %352, %354 : vector<64x128xf32>
    %356 = vector.shape_cast %355 : vector<64x128xf32> to vector<8x8x128xf32>
    %c0_166 = arith.constant 0 : index
    %c0_167 = arith.constant 0 : index
    %c0_168 = arith.constant 0 : index
    %357 = vector.load %arg11[%c0_166, %c0_167, %c0_168] : memref<8x8x128xf32, #tpu.memory_space<vmem>>, vector<8x8x128xf32>
    tpu.vector_store %arg11[%c0_166, %c0_167, %c0_168], %356 {strides = array<i32>} : memref<8x8x128xf32, #tpu.memory_space<vmem>>, vector<8x8x128xf32>,
    return
  }
  func.func @transform_0(%arg0: i32, %arg1: i32) -> (i32, i32, i32) {
    %c0_i32 = arith.constant 0 : i32
    %c0_i32_0 = arith.constant 0 : i32
    return %arg1, %arg0, %c0_i32 : i32, i32, i32
  }
  func.func @transform_1(%arg0: i32, %arg1: i32) -> (i32, i32) {
    %c0_i32 = arith.constant 0 : i32
    %c0_i32_0 = arith.constant 0 : i32
    %c0_i32_1 = arith.constant 0 : i32
    return %c0_i32, %c0_i32_0 : i32, i32
  }
  func.func @transform_2(%arg0: i32, %arg1: i32) -> (i32, i32) {
    %c0_i32 = arith.constant 0 : i32
    %c0_i32_0 = arith.constant 0 : i32
    %c0_i32_1 = arith.constant 0 : i32
    return %c0_i32, %c0_i32_0 : i32, i32
  }
  func.func @transform_3(%arg0: i32, %arg1: i32) -> (i32, i32) {
    %c0_i32 = arith.constant 0 : i32
    %c0_i32_0 = arith.constant 0 : i32
    %c0_i32_1 = arith.constant 0 : i32
    return %c0_i32, %c0_i32_0 : i32, i32
  }
  func.func @transform_4(%arg0: i32, %arg1: i32) -> (i32, i32) {
    %c0_i32 = arith.constant 0 : i32
    %c0_i32_0 = arith.constant 0 : i32
    %c0_i32_1 = arith.constant 0 : i32
    return %c0_i32, %c0_i32_0 : i32, i32
  }
  func.func @transform_5(%arg0: i32, %arg1: i32) -> (i32, i32, i32) {
    %c0_i32 = arith.constant 0 : i32
    %c0_i32_0 = arith.constant 0 : i32
    %c0_i32_1 = arith.constant 0 : i32
    %c0_i32_2 = arith.constant 0 : i32
    return %c0_i32, %c0_i32_0, %c0_i32_1 : i32, i32, i32
  }
  func.func @transform_6(%arg0: i32, %arg1: i32) -> (i32, i32, i32) {
    %c0_i32 = arith.constant 0 : i32
    %c0_i32_0 = arith.constant 0 : i32
    %c0_i32_1 = arith.constant 0 : i32
    %c0_i32_2 = arith.constant 0 : i32
    return %c0_i32, %c0_i32_0, %c0_i32_1 : i32, i32, i32
  }
  func.func @transform_7(%arg0: i32, %arg1: i32) -> (i32, i32) {
    %c0_i32 = arith.constant 0 : i32
    %c0_i32_0 = arith.constant 0 : i32
    %c0_i32_1 = arith.constant 0 : i32
    return %c0_i32, %c0_i32_0 : i32, i32
  }
  func.func @transform_8(%arg0: i32, %arg1: i32) -> (i32, i32) {
    %c0_i32 = arith.constant 0 : i32
    %c0_i32_0 = arith.constant 0 : i32
    %c0_i32_1 = arith.constant 0 : i32
    return %c0_i32, %c0_i32_0 : i32, i32
  }
  func.func @transform_9(%arg0: i32, %arg1: i32) -> (i32, i32, i32) {
    %c0_i32 = arith.constant 0 : i32
    %c0_i32_0 = arith.constant 0 : i32
    return %arg1, %arg0, %c0_i32 : i32, i32, i32
  }
}

</mosaic_0001>

<bundles_post_ra>
// kernel: tpu_custom_call.1
= control target key start
LH: loop header
LB: loop body
LE: loop exit
PB: predicated region body
PF: predicated region fallthrough
CT: control target
= control target key end

     0   :  { %14 = vsyncpa [#allocation6], 0  ;;  %s5681_s0 = inlined_call_operand.hbm [shape: f32[8,8,8], index: 0, kind: input, shape index: {}]   ;;  %s5682_s1 = inlined_call_operand.hbm [shape: bf16[8,384], index: 1, kind: input, shape index: {}]   ;;  %s5683_s2 = inlined_call_operand.vmem [shape: f32[1,384], index: 2, kind: input, shape index: {}]   ;;  %s5684_s3 = inlined_call_operand.hbm [shape: bf16[128,384], index: 3, kind: input, shape index: {}]   ;;  %s5685_s4 = inlined_call_operand.vmem [shape: f32[1,128], index: 4, kind: input, shape index: {}]   ;;  %s5686_s5 = inlined_call_operand.hbm [shape: bf16[2,128,128], index: 5, kind: input, shape index: {}]   ;;  %s5687_s6 = inlined_call_operand.vmem [shape: f32[2,1,128], index: 6, kind: input, shape index: {}]   ;;  %s5688_s7 = inlined_call_operand.hbm [shape: bf16[128,128], index: 7, kind: input, shape index: {}]   ;;  %s5689_s8 = inlined_call_operand.vmem [shape: f32[1,128], index: 8, kind: input, shape index: {}]   ;;  %s5690_s9 = inlined_call_operand.hbm [shape: f32[8,8,128], index: 9, kind: output, shape index: {}]  }
   0x1   :  { %15 = vsyncpa [#allocation9], 0 }
   0x2   :  { %16 = vsyncpa [#allocation12], 0 }
   0x3   :  { %17 = vsyncpa [#allocation7], 0  ;;  %s5078_s30 = smov [#allocation8]   ;;  %s5079_s11 = smov [#allocation11]  }
   0x4   :  { %s36_s10 = sshll.u32 %s5078_s30, 4  ;;  %s61_s12 = sshll.u32 %s5079_s11, 4  ;;  %s37_s10 = int_to_ptr.vmem [resolvable:$true] %s36_s10  ;;  %s5144_s12 = int_to_ptr.vmem [resolvable:$true] %s61_s12 }
   0x5   :  { %s4938_s15 = scalar_lea.hbm %s5682_s1, 192 }
   0x6   :  { %p4939_p0 = scmp.ne.s32.totalorder %s5682_s1, %s4938_s15  ;;  %p4942_p1 = scmp.lt.u32.totalorder %s4938_s15, %s5682_s1 }
   0x8   :  { %p4944_p2 = pnand %p4942_p1, %p4939_p0 }
   0xa   :  { %4947 = shalt.err (!%p4944_p2)
}
   0xb   :  { %s4948_s20 = scalar_lea.vmem %s37_s10, 192  ;;  %p4953_p4 = scmp.lt.s32.totalorder %s37_s10, %s37_s10 }
   0xc   :  { %p4949_p3 = scmp.ne.s32.totalorder %s37_s10, %s4948_s20  ;;  %p4954_p5 = scmp.lt.s32.totalorder %s4948_s20, %s4948_s20 }
   0xe   :  { %p4955_p6 = por %p4954_p5, %p4953_p4 }
  0x10   :  { %p4956_p7 = pnand %p4955_p6, %p4949_p3 }
  0x12   :  { %4959 = shalt.err (!%p4956_p7)
}
  0x13   :  { %39 = dma.hbm_to_vmem [thread:$0]  %s5682_s1, 192, %s37_s10, [#allocation9]  }
  0x14   :  { %s4960_s25 = scalar_lea.hbm %s5686_s5, 2048 }
  0x15   :  { %p4961_p8 = scmp.ne.s32.totalorder %s5686_s5, %s4960_s25  ;;  %p4964_p9 = scmp.lt.u32.totalorder %s4960_s25, %s5686_s5 }
  0x17   :  { %p4966_p10 = pnand %p4964_p9, %p4961_p8 }
  0x19   :  { %4969 = shalt.err (!%p4966_p10)
}
  0x1a   :  { %s4970_s30 = scalar_lea.vmem %s5144_s12, 2048  ;;  %p4975_p12 = scmp.lt.s32.totalorder %s5144_s12, %s5144_s12 }
  0x1b   :  { %p4971_p11 = scmp.ne.s32.totalorder %s5144_s12, %s4970_s30  ;;  %p4976_p13 = scmp.lt.s32.totalorder %s4970_s30, %s4970_s30 }
  0x1d   :  { %p4977_p0 = por %p4976_p13, %p4975_p12 }
  0x1f   :  { %p4978_p1 = pnand %p4977_p0, %p4971_p11 }
  0x21   :  { %4981 = shalt.err (!%p4978_p1)
}
  0x22   :  { %s5080_s1 = smov 64   ;;  %s5081_s10 = smov 4  }
  0x23   :  { %67 = dma.hbm_to_vmem [thread:$0]  %s5686_s5, 2048, %s5144_s12, [#allocation12], %s5080_s1, %s5080_s1, %s5081_s10  }
  0x24   :  { %s5082_s14 = smov [#allocation5]   ;;  %s4982_s18 = scalar_lea.hbm %s5681_s0, 1024 }
  0x25   :  { %s23_s15 = sshll.u32 %s5082_s14, 4  ;;  %p4983_p2 = scmp.ne.s32.totalorder %s5681_s0, %s4982_s18  ;;  %s24_s15 = int_to_ptr.vmem [resolvable:$true] %s23_s15 }
  0x26   :  { %p4986_p3 = scmp.lt.u32.totalorder %s4982_s18, %s5681_s0 }
  0x28   :  { %p4988_p4 = pnand %p4986_p3, %p4983_p2 }
  0x2a   :  { %4991 = shalt.err (!%p4988_p4)
}
  0x2b   :  { %s4992_s23 = scalar_lea.vmem %s24_s15, 1024  ;;  %p4997_p6 = scmp.lt.s32.totalorder %s24_s15, %s24_s15 }
  0x2c   :  { %p4993_p5 = scmp.ne.s32.totalorder %s24_s15, %s4992_s23  ;;  %p4998_p7 = scmp.lt.s32.totalorder %s4992_s23, %s4992_s23 }
  0x2e   :  { %p4999_p8 = por %p4998_p7, %p4997_p6 }
  0x30   :  { %p5000_p9 = pnand %p4999_p8, %p4993_p5 }
  0x32   :  { %5003 = shalt.err (!%p5000_p9)
}
  0x33   :  { %s5083_s5 = smov 128   ;;  %s5084_s12 = smov 8  }
  0x34   :  { %29 = dma.hbm_to_vmem [thread:$0]  %s5681_s0, 1024, %s24_s15, [#allocation6], %s5083_s5, %s5083_s5, %s5084_s12  }
  0x35   :  { %s5085_s26 = smov [#allocation10]   ;;  %s5004_s30 = scalar_lea.hbm %s5684_s3, 3072 }
  0x36   :  { %s47_s27 = sshll.u32 %s5085_s26, 4  ;;  %p5005_p10 = scmp.ne.s32.totalorder %s5684_s3, %s5004_s30  ;;  %s48_s27 = int_to_ptr.vmem [resolvable:$true] %s47_s27 }
  0x37   :  { %p5008_p11 = scmp.lt.u32.totalorder %s5004_s30, %s5684_s3 }
  0x39   :  { %p5010_p12 = pnand %p5008_p11, %p5005_p10 }
  0x3b   :  { %5013 = shalt.err (!%p5010_p12)
}
  0x3c   :  { %s5014_s17 = scalar_lea.vmem %s48_s27, 3072  ;;  %p5019_p0 = scmp.lt.s32.totalorder %s48_s27, %s48_s27 }
  0x3d   :  { %p5015_p13 = scmp.ne.s32.totalorder %s48_s27, %s5014_s17  ;;  %p5020_p1 = scmp.lt.s32.totalorder %s5014_s17, %s5014_s17 }
  0x3f   :  { %p5021_p2 = por %p5020_p1, %p5019_p0 }
  0x41   :  { %p5022_p3 = pnand %p5021_p2, %p5015_p13 }
  0x43   :  { %5025 = shalt.err (!%p5022_p3)
}
  0x44   :  { %s5086_s0 = smov 192   ;;  %s5087_s15 = smov 12  }
  0x45   :  { %53 = dma.hbm_to_vmem [thread:$0]  %s5684_s3, 3072, %s48_s27, [#allocation9], %s5086_s0, %s5086_s0, %s5087_s15  }
  0x46   :  { %s5088_s20 = smov [#allocation13]   ;;  %s5026_s24 = scalar_lea.hbm %s5688_s7, 1024 }
  0x47   :  { %s75_s21 = sshll.u32 %s5088_s20, 4  ;;  %p5027_p4 = scmp.ne.s32.totalorder %s5688_s7, %s5026_s24  ;;  %s76_s21 = int_to_ptr.vmem [resolvable:$true] %s75_s21 }
  0x48   :  { %p5030_p5 = scmp.lt.u32.totalorder %s5026_s24, %s5688_s7 }
  0x4a   :  { %p5032_p6 = pnand %p5030_p5, %p5027_p4 }
  0x4c   :  { %5035 = shalt.err (!%p5032_p6)
}
  0x4d   :  { %s5036_s30 = scalar_lea.vmem %s76_s21, 1024  ;;  %p5041_p8 = scmp.lt.s32.totalorder %s76_s21, %s76_s21 }
  0x4e   :  { %p5037_p7 = scmp.ne.s32.totalorder %s76_s21, %s5036_s30  ;;  %p5042_p9 = scmp.lt.s32.totalorder %s5036_s30, %s5036_s30 }
  0x50   :  { %p5043_p10 = por %p5042_p9, %p5041_p8 }
  0x52   :  { %p5044_p11 = pnand %p5043_p10, %p5037_p7 }
  0x54   :  { %5047 = shalt.err (!%p5044_p11)
}
  0x55   :  { %81 = dma.hbm_to_vmem [thread:$0]  %s5688_s7, 1024, %s76_s21, [#allocation12], %s5080_s1, %s5080_s1, %s5081_s10  }
  0x56   :  { %5070 = dma.done.wait [#allocation6], 1024  }
  0x57   :  { %5071 = vsyncadd [#allocation6], 4294966272 }
  0x58   :  { %5072 = dma.done.wait [#allocation9], 3264  }
  0x59   :  { %5073 = vsyncadd [#allocation9], 4294964032 }
  0x5a   :  { %5074 = dma.done.wait [#allocation12], 3072  }
  0x5b   :  { %5075 = vsyncadd [#allocation12], 4294964224  ;;  %v5089_v0 = vmov 0   ;;  %vm165_vm0 = vcmask 1043456   ;;  %v125_v1 = vld [vmem:[#allocation8] sm:$0xff]  ;;  %v114_v6 = vld [vmem:[#allocation5 + $0x8] sm:$0xff]  ;;  %v129_v61 = vlaneseq }
  0x5c   :  { %207 = vmatprep.mubr.bf16.mxu0 %v5089_v0  ;;  %v4639_v2 = vld [vmem:[#allocation8 + $0x8] ss:$0 sps:$4 sm:$0xff]   ;;  %v3538_v3 = vcombine.high %v125_v1, %v125_v1  ;;  %v3537_v4 = vcombine.low %v125_v1, %v125_v1  ;;  %v113_v5 = vld [vmem:[#allocation5] sm:$0xff]  ;;  %vm152_vm1 = vcmask 64512   ;;  %v115_v7 = vld [vmem:[#allocation5 + $0x10] sm:$0xff]  ;;  %v5090_v15 = vmov 0.0  }
  0x5d   :  { %4621 = vmatprep.subr.msk.bf16.mxu1 %vm165_vm0, %v4639_v2  ;;  %v173_v8 = vsel %vm165_vm0, %v4639_v2, 0  ;;  %v121_v9 = vpack.c.bf16 %v114_v6, %v113_v5  ;;  %v116_v10 = vld [vmem:[#allocation5 + $0x18] sm:$0xff]  ;;  %v117_v16 = vld [vmem:[#allocation5 + $0x20] sm:$0xff]  ;;  %v4644_v17 = vld [vmem:[#allocation10 + $0x1c] ss:$12 sps:$4 sm:$0xff]   ;;  %vm5091_vm2 = vmmov 0  }
  0x5e   :  { %3540 = vmatprep.subr.msk.bf16.mxu0 %vm165_vm0, %v3538_v3  ;;  %v167_v11 = vsel %vm165_vm0, %v3537_v4, 0  ;;  %4044 = vmatpush3.bf16.msra.mxu1 %v173_v8  ;;  %v122_v12 = vpack.c.bf16 %v116_v10, %v115_v7  ;;  %v4641_v13 = vld [vmem:[#allocation10] ss:$12 sps:$4 sm:$0xff]   ;;  %v4642_v14 = vld [vmem:[#allocation10 + $0x4] ss:$12 sps:$4 sm:$0xff]   ;;  %v5092_v37 = vmov 0.0|0.0  }
  0x5f   :  { %176 = vmatpush1.bf16.msra.mxu0 %v167_v11  ;;  %4045 = vmatprep.mubr.msk.bf16.mxu1 %vm152_vm1, %v121_v9  ;;  %v4643_v18 = vld [vmem:[#allocation10 + $0x18] ss:$12 sps:$4 sm:$0xff]   ;;  %v118_v19 = vld [vmem:[#allocation5 + $0x28] sm:$0xff]  ;;  %v120_v25 = vld [vmem:[#allocation5 + $0x38] sm:$0xff]  ;;  %v130_v62 = vshrl.u32 %v129_v61, 7 }
  0x60   :  { %4053 = vmatprep.subr.bf16.mxu0 %v5090_v15  ;;  %4073 = vmatprep.subr.bf16.mxu1 %v5090_v15  ;;  %v4646_v20 = vld [vmem:[#allocation10 + $0x34] ss:$12 sps:$4 sm:$0xff]   ;;  %v123_v21 = vpack.c.bf16 %v118_v19, %v117_v16  ;;  %v4645_v22 = vld [vmem:[#allocation10 + $0x30] ss:$12 sps:$4 sm:$0xff]   ;;  %v4648_v23 = vld [vmem:[#allocation10 + $0x4c] ss:$12 sps:$4 sm:$0xff]  }
  0x61   :  { %4046 = vmatmul.mubr.msk.bf16.vlgmr.msra.gmra.mrb[0].mxu1 %vm152_vm1, %v122_v12  ;;  %v119_v24 = vld [vmem:[#allocation5 + $0x30] sm:$0xff]  ;;  %v4649_v29 = vld [vmem:[#allocation10 + $0x60] ss:$12 sps:$4 sm:$0xff]   ;;  %v4653_v32 = vld [vmem:[#allocation10 + $0x90] ss:$12 sps:$4 sm:$0xff]   ;;  %v139_v63 = vsub.s32 2, %v130_v62 }
  0x62   :  { %3541 = vmatmul.mubr.msk.bf16.vlgmr.msra.gmra.mrb[0].mxu0 %vm152_vm1, %v121_v9  ;;  %4074 = vmatpush3.bf16.msra.mxu1 %v4642_v14  ;;  %v4647_v26 = vld [vmem:[#allocation10 + $0x48] ss:$12 sps:$4 sm:$0xff]   ;;  %v124_v27 = vpack.c.bf16 %v120_v25, %v119_v24  ;;  %v4650_v28 = vld [vmem:[#allocation10 + $0x64] ss:$12 sps:$4 sm:$0xff]   ;;  %v4656_v34 = vld [vmem:[#allocation10 + $0xac] ss:$12 sps:$4 sm:$0xff]  }
  0x63   :  { %4054 = vmatpush3.bf16.msra.mxu0 %v4641_v13  ;;  %4075 = vmatprep.subr.bf16.mxu1 %v5090_v15  ;;  %v4652_v30 = vld [vmem:[#allocation10 + $0x7c] ss:$12 sps:$4 sm:$0xff]   ;;  %v4651_v31 = vld [vmem:[#allocation10 + $0x78] ss:$12 sps:$4 sm:$0xff]   ;;  %v4654_v33 = vld [vmem:[#allocation10 + $0x94] ss:$12 sps:$4 sm:$0xff]  }
  0x64   :  { %4055 = vmatprep.subr.bf16.mxu0 %v5090_v15  ;;  %217 = vmatprep.mubr.bf16.mxu0 %v5089_v0  ;;  %v4655_v35 = vld [vmem:[#allocation10 + $0xa8] ss:$12 sps:$4 sm:$0xff]   ;;  %v4658_v38 = vld [vmem:[#allocation10 + $0x20] ss:$12 sps:$4 sm:$0xff]   ;;  %v4659_v39 = vld [vmem:[#allocation10 + $0x38] ss:$12 sps:$4 sm:$0xff]  }
  0x65   :  { %4049 = vmatprep.mubr.msk.bf16.mxu1 %vm152_vm1, %v123_v21  ;;  %v4657_v36 = vld [vmem:[#allocation10 + $0x8] ss:$12 sps:$4 sm:$0xff]   ;;  %v4660_v40 = vld [vmem:[#allocation10 + $0x50] ss:$12 sps:$4 sm:$0xff]   ;;  %v4662_v42 = vld [vmem:[#allocation10 + $0x80] ss:$12 sps:$4 sm:$0xff]  }
  0x66   :  { %4076 = vmatpush3.bf16.msra.mxu1 %v4644_v17  ;;  %v4661_v41 = vld [vmem:[#allocation10 + $0x68] ss:$12 sps:$4 sm:$0xff]   ;;  %v4663_v43 = vld [vmem:[#allocation10 + $0x98] ss:$12 sps:$4 sm:$0xff]   ;;  %v4664_v44 = vld [vmem:[#allocation10 + $0xb0] ss:$12 sps:$4 sm:$0xff]  }
  0x67   :  { %4056 = vmatpush3.bf16.msra.mxu0 %v4643_v18  ;;  %4077 = vmatprep.subr.bf16.mxu1 %v5090_v15  ;;  %v4665_v45 = vld [vmem:[#allocation10] ss:$12 sps:$4 sm:$0xff]   ;;  %v4666_v46 = vld [vmem:[#allocation10 + $0x4] ss:$12 sps:$4 sm:$0xff]   ;;  %v4668_v48 = vld [vmem:[#allocation10 + $0x1c] ss:$12 sps:$4 sm:$0xff]  }
  0x68   :  { %4057 = vmatprep.subr.bf16.mxu0 %v5090_v15  ;;  %v4667_v47 = vld [vmem:[#allocation10 + $0x18] ss:$12 sps:$4 sm:$0xff]   ;;  %v4669_v49 = vld [vmem:[#allocation10 + $0x30] ss:$12 sps:$4 sm:$0xff]   ;;  %v4670_v50 = vld [vmem:[#allocation10 + $0x34] ss:$12 sps:$4 sm:$0xff]  }
  0x69   :  { %4050 = vmatmul.mubr.msk.bf16.gmra.mrb[4].mxu1 %vm152_vm1, %v124_v27  ;;  %v4671_v51 = vld [vmem:[#allocation10 + $0x48] ss:$12 sps:$4 sm:$0xff]   ;;  %v4672_v52 = vld [vmem:[#allocation10 + $0x4c] ss:$12 sps:$4 sm:$0xff]   ;;  %v4674_v54 = vld [vmem:[#allocation10 + $0x64] ss:$12 sps:$4 sm:$0xff]  }
  0x6a   :  { %3542 = vmatmul.mubr.msk.bf16.gmra.mrb[4].mxu0 %vm152_vm1, %v122_v12  ;;  %4078 = vmatpush3.bf16.msra.mxu1 %v4646_v20  ;;  %v4673_v53 = vld [vmem:[#allocation10 + $0x60] ss:$12 sps:$4 sm:$0xff]   ;;  %v4675_v55 = vld [vmem:[#allocation10 + $0x78] ss:$12 sps:$4 sm:$0xff]   ;;  %v4676_v56 = vld [vmem:[#allocation10 + $0x7c] ss:$12 sps:$4 sm:$0xff]  }
  0x6b   :  { %4058 = vmatpush3.bf16.msra.mxu0 %v4645_v22  ;;  %4079 = vmatprep.subr.bf16.mxu1 %v5090_v15  ;;  %v4677_v57 = vld [vmem:[#allocation10 + $0x90] ss:$12 sps:$4 sm:$0xff]   ;;  %v4678_v58 = vld [vmem:[#allocation10 + $0x94] ss:$12 sps:$4 sm:$0xff]   ;;  %v4680_v60 = vld [vmem:[#allocation10 + $0xac] ss:$12 sps:$4 sm:$0xff]  }
  0x6c   :  { %4059 = vmatprep.subr.bf16.mxu0 %v5090_v15  ;;  %227 = vmatprep.mubr.bf16.mxu0 %v5089_v0  ;;  %v4679_v59 = vld [vmem:[#allocation10 + $0xa8] ss:$12 sps:$4 sm:$0xff]   ;;  %v131_v1 = vsub.s32 0, %v130_v62  ;;  %v135_v3 = vsub.s32 1, %v130_v62 }
  0x6d   :  { %4089 = vmatprep.mubr.msk.bf16.mxu1 %vm5091_vm2, %v5090_v15 }
  0x6e   :  { %4080 = vmatpush3.bf16.msra.mxu1 %v4648_v23 }
  0x6f   :  { %4060 = vmatpush3.bf16.msra.mxu0 %v4647_v26  ;;  %4081 = vmatprep.subr.bf16.mxu1 %v5090_v15 }
  0x70   :  { %4061 = vmatprep.subr.bf16.mxu0 %v5090_v15 }
  0x72   :  { %3543 = vmatmul.mubr.msk.bf16.gmra.mrb[8].mxu0 %vm152_vm1, %v123_v21  ;;  %4082 = vmatpush3.bf16.msra.mxu1 %v4650_v28 }
  0x73   :  { %4062 = vmatpush3.bf16.msra.mxu0 %v4649_v29  ;;  %4083 = vmatprep.subr.bf16.mxu1 %v5090_v15 }
  0x74   :  { %4063 = vmatprep.subr.bf16.mxu0 %v5090_v15  ;;  %237 = vmatprep.mubr.bf16.mxu0 %v5089_v0  ;;  %v127_v0 = vld [vmem:[%s5683_s2] sm:$0x7] }
  0x75   :  { %v5287_v2 = vrot.slane %v127_v0, %v139_v63  ;;  %v132_v4 = vrot.slane %v127_v0, %v131_v1  ;;  %v136_v11 = vrot.slane %v127_v0, %v135_v3 }
  0x76   :  { %4084 = vmatpush3.bf16.msra.mxu1 %v4652_v30 }
  0x77   :  { %4064 = vmatpush3.bf16.msra.mxu0 %v4651_v31  ;;  %4085 = vmatprep.subr.bf16.mxu1 %v5090_v15 }
  0x78   :  { %4065 = vmatprep.subr.bf16.mxu0 %v5090_v15 }
  0x7a   :  { %3544 = vmatmul.mubr.msk.bf16.gmra.mrb[12].mxu0 %vm152_vm1, %v124_v27  ;;  %4086 = vmatpush3.bf16.msra.mxu1 %v4654_v33 }
  0x7b   :  { %4066 = vmatpush3.bf16.msra.mxu0 %v4653_v32  ;;  %4087 = vmatprep.subr.bf16.mxu1 %v5090_v15 }
  0x7c   :  { %4067 = vmatprep.subr.bf16.mxu0 %v5090_v15  ;;  %4069 = vmatprep.mubr.msk.bf16.mxu0 %vm5091_vm2, %v5090_v15 }
  0x7e   :  { %4088 = vmatpush3.bf16.msra.mxu1 %v4656_v34 }
  0x7f   :  { %4068 = vmatpush3.bf16.msra.mxu0 %v4655_v35  ;;  %4113 = vmatprep.subr.bf16.mxu1 %v5090_v15 }
  0x80   :  { %4093 = vmatprep.subr.bf16.mxu0 %v5090_v15 }
  0x81   :  { %4090 = vmatmul.mubr.bf16.vlgmr.msra.gmra.mrb[8].mxu1 %v5092_v37 }
  0x82   :  { %4070 = vmatmul.mubr.bf16.vlgmr.msra.gmra.mrb[16].mxu0 %v5092_v37  ;;  %4129 = vmatprep.mubr.msk.bf16.mxu1 %vm5091_vm2, %v5090_v15 }
  0x83   :  { %4094 = vmatpush3.bf16.msra.mxu0 %v4657_v36  ;;  %4109 = vmatprep.mubr.msk.bf16.mxu0 %vm5091_vm2, %v5090_v15 }
  0x84   :  { %4095 = vmatprep.subr.bf16.mxu0 %v5090_v15  ;;  %4114 = vmatpush3.bf16.msra.mxu1 %v4665_v45 }
  0x85   :  { %4115 = vmatprep.subr.bf16.mxu1 %v5090_v15 }
  0x87   :  { %4096 = vmatpush3.bf16.msra.mxu0 %v4658_v38 }
  0x88   :  { %4097 = vmatprep.subr.bf16.mxu0 %v5090_v15  ;;  %4116 = vmatpush3.bf16.msra.mxu1 %v4667_v47 }
  0x89   :  { %4117 = vmatprep.subr.bf16.mxu1 %v5090_v15 }
  0x8b   :  { %4098 = vmatpush3.bf16.msra.mxu0 %v4659_v39 }
  0x8c   :  { %4099 = vmatprep.subr.bf16.mxu0 %v5090_v15  ;;  %4118 = vmatpush3.bf16.msra.mxu1 %v4669_v49 }
  0x8d   :  { %4119 = vmatprep.subr.bf16.mxu1 %v5090_v15 }
  0x8f   :  { %4100 = vmatpush3.bf16.msra.mxu0 %v4660_v40 }
  0x90   :  { %4101 = vmatprep.subr.bf16.mxu0 %v5090_v15  ;;  %4120 = vmatpush3.bf16.msra.mxu1 %v4671_v51 }
  0x91   :  { %4121 = vmatprep.subr.bf16.mxu1 %v5090_v15 }
  0x93   :  { %4102 = vmatpush3.bf16.msra.mxu0 %v4661_v41 }
  0x94   :  { %4103 = vmatprep.subr.bf16.mxu0 %v5090_v15  ;;  %4122 = vmatpush3.bf16.msra.mxu1 %v4673_v53 }
  0x95   :  { %4123 = vmatprep.subr.bf16.mxu1 %v5090_v15 }
  0x97   :  { %4104 = vmatpush3.bf16.msra.mxu0 %v4662_v42 }
  0x98   :  { %4105 = vmatprep.subr.bf16.mxu0 %v5090_v15  ;;  %4124 = vmatpush3.bf16.msra.mxu1 %v4675_v55 }
  0x99   :  { %4125 = vmatprep.subr.bf16.mxu1 %v5090_v15 }
  0x9b   :  { %4106 = vmatpush3.bf16.msra.mxu0 %v4663_v43 }
  0x9c   :  { %4107 = vmatprep.subr.bf16.mxu0 %v5090_v15  ;;  %4126 = vmatpush3.bf16.msra.mxu1 %v4677_v57 }
  0x9d   :  { %4127 = vmatprep.subr.bf16.mxu1 %v5090_v15 }
  0x9f   :  { %4108 = vmatpush3.bf16.msra.mxu0 %v4664_v44 }
  0xa0   :  { %4133 = vmatprep.subr.bf16.mxu0 %v5090_v15  ;;  %4128 = vmatpush3.bf16.msra.mxu1 %v4679_v59 }
  0xa1   :  { %4153 = vmatprep.subr.bf16.mxu1 %v5090_v15 }
  0xa2   :  { %4110 = vmatmul.mubr.bf16.vlgmr.msra.gmra.mrb[20].mxu0 %v5092_v37 }
  0xa3   :  { %4149 = vmatprep.mubr.msk.bf16.mxu0 %vm5091_vm2, %v5090_v15  ;;  %4134 = vmatpush3.bf16.msra.mxu0 %v4666_v46 }
  0xa4   :  { %4135 = vmatprep.subr.bf16.mxu0 %v5090_v15 }
  0xa7   :  { %4136 = vmatpush3.bf16.msra.mxu0 %v4668_v48 }
  0xa8   :  { %4137 = vmatprep.subr.bf16.mxu0 %v5090_v15 }
  0xab   :  { %4138 = vmatpush3.bf16.msra.mxu0 %v4670_v50 }
  0xac   :  { %4139 = vmatprep.subr.bf16.mxu0 %v5090_v15 }
  0xaf   :  { %4140 = vmatpush3.bf16.msra.mxu0 %v4672_v52 }
  0xb0   :  { %4141 = vmatprep.subr.bf16.mxu0 %v5090_v15 }
  0xb3   :  { %4142 = vmatpush3.bf16.msra.mxu0 %v4674_v54 }
  0xb4   :  { %4143 = vmatprep.subr.bf16.mxu0 %v5090_v15 }
  0xb7   :  { %4144 = vmatpush3.bf16.msra.mxu0 %v4676_v56 }
  0xb8   :  { %4145 = vmatprep.subr.bf16.mxu0 %v5090_v15 }
  0xbb   :  { %4146 = vmatpush3.bf16.msra.mxu0 %v4678_v58 }
  0xbc   :  { %4147 = vmatprep.subr.bf16.mxu0 %v5090_v15 }
  0xbf   :  { %4148 = vmatpush3.bf16.msra.mxu0 %v4680_v60 }
  0xc0   :  { %4173 = vmatprep.subr.bf16.mxu0 %v5090_v15 }
 0x134   :  { %v4047_v5 = vpop.f32.mrb[0].mxu1 }
 0x135   :  { %v209_v6 = vpop.f32.mrb[0].mxu0  ;;  %v5290_v7 = vadd.f32 %v4047_v5, %v5287_v2  ;;  %v5292_v8 = vpop.f32.mrb[1].mxu1 }
 0x136   :  { %v211_v9 = vpop.f32.mrb[1].mxu0  ;;  %v4048_v10 = vpop.f32.mrb[2].mxu1  ;;  %v210_v53 = vadd.f32 %v209_v6, %v132_v4 }
 0x137   :  { %v213_v12 = vpop.f32.mrb[2].mxu0  ;;  %v5295_v13 = vadd.f32 %v4048_v10, %v5287_v2  ;;  %v285_v14 = vpop.f32.mrb[3].mxu1  ;;  %v212_v52 = vadd.f32 %v211_v9, %v136_v11 }
 0x138   :  { %v5297_v16 = vadd.f32 %v213_v12, %v132_v4  ;;  %v215_v17 = vpop.f32.mrb[3].mxu0  ;;  %v5300_v18 = vadd.f32 %v285_v14, %v5287_v2 }
 0x139   :  { %v5302_v19 = vadd.f32 %v215_v17, %v136_v11 }
 0x13c   :  { %v4051_v27 = vpop.f32.mrb[4].mxu1 }
 0x13d   :  { %v219_v20 = vpop.f32.mrb[4].mxu0  ;;  %v5313_v29 = vadd.f32 %v4051_v27, %v5287_v2  ;;  %v298_v30 = vpop.f32.mrb[5].mxu1 }
 0x13e   :  { %v5304_v21 = vadd.f32 %v219_v20, %v132_v4  ;;  %v221_v22 = vpop.f32.mrb[5].mxu0  ;;  %v5316_v31 = vadd.f32 %v298_v30, %v5287_v2  ;;  %v4052_v32 = vpop.f32.mrb[6].mxu1  ;;  %v283_v20 = vadd.f32 %v5292_v8, %v5287_v2  ;;  %v4683_v8 = vld [vmem:[#allocation10 + $0x38] ss:$12 sps:$4 sm:$0xff]  }
 0x13f   :  { %v5306_v23 = vadd.f32 %v221_v22, %v136_v11  ;;  %v223_v24 = vpop.f32.mrb[6].mxu0  ;;  %v5319_v33 = vadd.f32 %v4052_v32, %v5287_v2  ;;  %v301_v34 = vpop.f32.mrb[7].mxu1 }
 0x140   :  { %v5308_v25 = vadd.f32 %v223_v24, %v132_v4  ;;  %v225_v26 = vpop.f32.mrb[7].mxu0  ;;  %v5322_v35 = vadd.f32 %v301_v34, %v5287_v2  ;;  %v4682_v2 = vld [vmem:[#allocation10 + $0x20] ss:$12 sps:$4 sm:$0xff]  }
 0x141   :  { %v5310_v28 = vadd.f32 %v225_v26, %v136_v11 }
 0x145   :  { %v229_v36 = vpop.f32.mrb[8].mxu0 }
 0x146   :  { %v5324_v37 = vadd.f32 %v229_v36, %v132_v4  ;;  %v231_v38 = vpop.f32.mrb[9].mxu0 }
 0x147   :  { %v5326_v39 = vadd.f32 %v231_v38, %v136_v11  ;;  %v233_v40 = vpop.f32.mrb[10].mxu0 }
 0x148   :  { %v5328_v41 = vadd.f32 %v233_v40, %v132_v4  ;;  %v235_v42 = vpop.f32.mrb[11].mxu0  ;;  %v4681_v40 = vld [vmem:[#allocation10 + $0x8] ss:$12 sps:$4 sm:$0xff]  }
 0x149   :  { %v5330_v43 = vadd.f32 %v235_v42, %v136_v11 }
 0x14d   :  { %v239_v44 = vpop.f32.mrb[12].mxu0 }
 0x14e   :  { %v5332_v45 = vadd.f32 %v239_v44, %v132_v4  ;;  %v241_v46 = vpop.f32.mrb[13].mxu0  ;;  %v4684_v44 = vld [vmem:[#allocation10 + $0x50] ss:$12 sps:$4 sm:$0xff]  }
 0x14f   :  { %v5334_v47 = vadd.f32 %v241_v46, %v136_v11  ;;  %v243_v48 = vpop.f32.mrb[14].mxu0  ;;  %v4685_v46 = vld [vmem:[#allocation10 + $0x68] ss:$12 sps:$4 sm:$0xff]  }
 0x150   :  { %v5336_v49 = vadd.f32 %v243_v48, %v132_v4  ;;  %v245_v50 = vpop.f32.mrb[15].mxu0  ;;  %v5343_v4 = vld [vmem:[%s5685_s4] ss:$0 sm:$0xff]  ;;  %v4686_v48 = vld [vmem:[#allocation10 + $0x80] ss:$12 sps:$4 sm:$0xff]  }
 0x151   :  { %v5338_v51 = vadd.f32 %v245_v50, %v136_v11  ;;  %v4687_v50 = vld [vmem:[#allocation10 + $0x98] ss:$12 sps:$4 sm:$0xff]  }
 0x154   :  { %v545_v54 = vpop.f32.mrb[8].mxu1 }
 0x155   :  { %v441_v55 = vpop.f32.mrb[16].mxu0  ;;  %v574_v56 = vadd.f32 %v545_v54, %v212_v52  ;;  %v4091_v57 = vpop.f32.mrb[9].mxu1  ;;  %v4688_v52 = vld [vmem:[#allocation10 + $0xb0] ss:$12 sps:$4 sm:$0xff]  }
 0x156   :  { %v567_v58 = vadd.f32 %v441_v55, %v210_v53  ;;  %v4071_v59 = vpop.f32.mrb[17].mxu0  ;;  %v548_v60 = vpop.f32.mrb[10].mxu1  ;;  %v4689_v53 = vld [vmem:[#allocation10] ss:$12 sps:$4 sm:$0xff]   ;;  %v4690_v54 = vld [vmem:[#allocation10 + $0x4] ss:$12 sps:$4 sm:$0xff]  }
 0x157   :  { %v444_v61 = vpop.f32.mrb[18].mxu0  ;;  %v4092_v62 = vpop.f32.mrb[11].mxu1  ;;  %v3566_v1 = vmul.f32 -1.442695, %v574_v56  ;;  %v4691_v55 = vld [vmem:[#allocation10 + $0x18] ss:$12 sps:$4 sm:$0xff]  }
 0x158   :  { %v3565_v63 = vmul.f32 -1.442695, %v567_v58  ;;  %v4072_v0 = vpop.f32.mrb[19].mxu0  ;;  %v4692_v56 = vld [vmem:[#allocation10 + $0x1c] ss:$12 sps:$4 sm:$0xff]  }
 0x159   :  { %v4693_v57 = vld [vmem:[#allocation10 + $0x30] ss:$12 sps:$4 sm:$0xff]   ;;  %v4694_v58 = vld [vmem:[#allocation10 + $0x34] ss:$12 sps:$4 sm:$0xff]   ;;  %v4696_v60 = vld [vmem:[#allocation10 + $0x4c] ss:$12 sps:$4 sm:$0xff]  }
 0x15a   :  { %4857 = vpow2.f32 %v3565_v63  ;;  %v4695_v59 = vld [vmem:[#allocation10 + $0x48] ss:$12 sps:$4 sm:$0xff]   ;;  %v4697_v61 = vld [vmem:[#allocation10 + $0x60] ss:$12 sps:$4 sm:$0xff]   ;;  %v4698_v62 = vld [vmem:[#allocation10 + $0x64] ss:$12 sps:$4 sm:$0xff]  }
 0x15b   :  { %4859 = vpow2.f32 %v3566_v1  ;;  %v4699_v63 = vld [vmem:[#allocation10 + $0x78] ss:$12 sps:$4 sm:$0xff]   ;;  %v4700_v0 = vld [vmem:[#allocation10 + $0x7c] ss:$12 sps:$4 sm:$0xff]  }
 0x15c   :  { %v4701_v1 = vld [vmem:[#allocation10 + $0x90] ss:$12 sps:$4 sm:$0xff]  }
 0x164   :  { %v4858_v3 = vpop.eup %4857 }
 0x165   :  { %v571_v5 = vadd.f32 1.0, %v4858_v3  ;;  %v4860_v10 = vpop.eup %4859  ;;  %v4702_v3 = vld [vmem:[#allocation10 + $0x94] ss:$12 sps:$4 sm:$0xff]  }
 0x166   :  { %v578_v6 = vadd.f32 1.0, %v4860_v10  ;;  %v4704_v10 = vld [vmem:[#allocation10 + $0xac] ss:$12 sps:$4 sm:$0xff]  }
 0x167   :  { %4861 = vrcp.f32 %v571_v5  ;;  %v4703_v5 = vld [vmem:[#allocation10 + $0xa8] ss:$12 sps:$4 sm:$0xff]  }
 0x168   :  { %4863 = vrcp.f32 %v578_v6 }
 0x171   :  { %v4862_v14 = vpop.eup %4861 }
 0x172   :  { %v4864_v27 = vpop.eup %4863 }
 0x173   :  { %v678_v30 = vsub.f32 1.0, %v4864_v27  ;;  %v680_v36 = vmul.f32 0.0, %v4864_v27 }
 0x175   :  { %v669_v9 = vpop.f32.mrb[20].mxu0 }
 0x176   :  { %v670_v11 = vadd.f32 %v5343_v4, %v669_v9  ;;  %v4111_v12 = vpop.f32.mrb[21].mxu0 }
 0x177   :  { %v672_v17 = vpop.f32.mrb[22].mxu0 }
 0x178   :  { %v675_v22 = vmul.f32 %v4862_v14, %v670_v11  ;;  %v4112_v24 = vpop.f32.mrb[23].mxu0 }
 0x17a   :  { %v676_v26 = vadd.f32 %v675_v22, %v283_v20 }
 0x17c   :  { %4865 = vtanh.f32 %v676_v26 }
 0x186   :  { %v4866_v32 = vpop.eup %4865 }
 0x187   :  { %v679_v34 = vmul.f32 %v4866_v32, %v678_v30 }
 0x189   :  { %v5348_v38 = vadd.f32 %v680_v36, %v679_v34 }
 0x18b   :  { %v687_v42 = vpack.c.bf16 %v5348_v38, %v5348_v38 }
 0x18d   :  { %4130 = vmatmul.mubr.bf16.vlgmr.msra.gmra.mrb[12].mxu1 %v687_v42  ;;  %4150 = vmatmul.mubr.bf16.vlgmr.msra.gmra.mrb[24].mxu0 %v687_v42 }
 0x18e   :  { %4154 = vmatpush3.bf16.msra.mxu1 %v4681_v40  ;;  %4169 = vmatprep.mubr.msk.bf16.mxu1 %vm5091_vm2, %v5090_v15 }
 0x18f   :  { %4155 = vmatprep.subr.bf16.mxu1 %v5090_v15  ;;  %4189 = vmatprep.mubr.msk.bf16.mxu0 %vm5091_vm2, %v5090_v15 }
 0x190   :  { %4174 = vmatpush3.bf16.msra.mxu0 %v4689_v53 }
 0x191   :  { %4175 = vmatprep.subr.bf16.mxu0 %v5090_v15 }
 0x192   :  { %4156 = vmatpush3.bf16.msra.mxu1 %v4682_v2 }
 0x193   :  { %4157 = vmatprep.subr.bf16.mxu1 %v5090_v15 }
 0x194   :  { %4176 = vmatpush3.bf16.msra.mxu0 %v4691_v55 }
 0x195   :  { %4177 = vmatprep.subr.bf16.mxu0 %v5090_v15 }
 0x196   :  { %4158 = vmatpush3.bf16.msra.mxu1 %v4683_v8 }
 0x197   :  { %4159 = vmatprep.subr.bf16.mxu1 %v5090_v15 }
 0x198   :  { %4178 = vmatpush3.bf16.msra.mxu0 %v4693_v57  ;;  %v4705_v57 = vld [vmem:[#allocation10 + $0x8] ss:$12 sps:$4 sm:$0xff]  }
 0x199   :  { %4179 = vmatprep.subr.bf16.mxu0 %v5090_v15 }
 0x19a   :  { %4160 = vmatpush3.bf16.msra.mxu1 %v4684_v44 }
 0x19b   :  { %4161 = vmatprep.subr.bf16.mxu1 %v5090_v15 }
 0x19c   :  { %4180 = vmatpush3.bf16.msra.mxu0 %v4695_v59  ;;  %v4706_v59 = vld [vmem:[#allocation10 + $0x20] ss:$12 sps:$4 sm:$0xff]  }
 0x19d   :  { %4181 = vmatprep.subr.bf16.mxu0 %v5090_v15 }
 0x19e   :  { %4162 = vmatpush3.bf16.msra.mxu1 %v4685_v46 }
 0x19f   :  { %4163 = vmatprep.subr.bf16.mxu1 %v5090_v15 }
 0x1a0   :  { %4182 = vmatpush3.bf16.msra.mxu0 %v4697_v61  ;;  %v4709_v61 = vld [vmem:[#allocation10 + $0x68] ss:$12 sps:$4 sm:$0xff]  }
 0x1a1   :  { %4183 = vmatprep.subr.bf16.mxu0 %v5090_v15 }
 0x1a2   :  { %4164 = vmatpush3.bf16.msra.mxu1 %v4686_v48 }
 0x1a3   :  { %4165 = vmatprep.subr.bf16.mxu1 %v5090_v15 }
 0x1a4   :  { %4184 = vmatpush3.bf16.msra.mxu0 %v4699_v63  ;;  %v4711_v63 = vld [vmem:[#allocation10 + $0x98] ss:$12 sps:$4 sm:$0xff]  }
 0x1a5   :  { %4185 = vmatprep.subr.bf16.mxu0 %v5090_v15 }
 0x1a6   :  { %4166 = vmatpush3.bf16.msra.mxu1 %v4687_v50 }
 0x1a7   :  { %4167 = vmatprep.subr.bf16.mxu1 %v5090_v15 }
 0x1a8   :  { %4186 = vmatpush3.bf16.msra.mxu0 %v4701_v1  ;;  %v4713_v1 = vld [vmem:[#allocation10] ss:$12 sps:$4 sm:$0xff]  }
 0x1a9   :  { %4187 = vmatprep.subr.bf16.mxu0 %v5090_v15 }
 0x1aa   :  { %4168 = vmatpush3.bf16.msra.mxu1 %v4688_v52 }
 0x1ab   :  { %4193 = vmatprep.subr.bf16.mxu1 %v5090_v15 }
 0x1ac   :  { %4188 = vmatpush3.bf16.msra.mxu0 %v4703_v5  ;;  %v4715_v5 = vld [vmem:[#allocation10 + $0x18] ss:$12 sps:$4 sm:$0xff]  }
 0x1ad   :  { %4170 = vmatmul.mubr.bf16.vlgmr.msra.gmra.mrb[16].mxu1 %v687_v42  ;;  %4213 = vmatprep.subr.bf16.mxu0 %v5090_v15 }
 0x1ae   :  { %4209 = vmatprep.mubr.msk.bf16.mxu1 %vm5091_vm2, %v5090_v15  ;;  %4194 = vmatpush3.bf16.msra.mxu1 %v4690_v54 }
 0x1af   :  { %4195 = vmatprep.subr.bf16.mxu1 %v5090_v15 }
 0x1b2   :  { %4196 = vmatpush3.bf16.msra.mxu1 %v4692_v56 }
 0x1b3   :  { %4197 = vmatprep.subr.bf16.mxu1 %v5090_v15 }
 0x1b6   :  { %4198 = vmatpush3.bf16.msra.mxu1 %v4694_v58 }
 0x1b7   :  { %4199 = vmatprep.subr.bf16.mxu1 %v5090_v15 }
 0x1ba   :  { %4200 = vmatpush3.bf16.msra.mxu1 %v4696_v60  ;;  %v4708_v60 = vld [vmem:[#allocation10 + $0x50] ss:$12 sps:$4 sm:$0xff]  }
 0x1bb   :  { %4201 = vmatprep.subr.bf16.mxu1 %v5090_v15 }
 0x1be   :  { %4202 = vmatpush3.bf16.msra.mxu1 %v4698_v62  ;;  %v4710_v62 = vld [vmem:[#allocation10 + $0x80] ss:$12 sps:$4 sm:$0xff]  }
 0x1bf   :  { %4203 = vmatprep.subr.bf16.mxu1 %v5090_v15 }
 0x1c2   :  { %4204 = vmatpush3.bf16.msra.mxu1 %v4700_v0  ;;  %v4712_v0 = vld [vmem:[#allocation10 + $0xb0] ss:$12 sps:$4 sm:$0xff]  }
 0x1c3   :  { %4205 = vmatprep.subr.bf16.mxu1 %v5090_v15 }
 0x1c6   :  { %4206 = vmatpush3.bf16.msra.mxu1 %v4702_v3  ;;  %v4714_v3 = vld [vmem:[#allocation10 + $0x4] ss:$12 sps:$4 sm:$0xff]  }
 0x1c7   :  { %4207 = vmatprep.subr.bf16.mxu1 %v5090_v15 }
 0x1ca   :  { %4208 = vmatpush3.bf16.msra.mxu1 %v4704_v10  ;;  %v4716_v10 = vld [vmem:[#allocation10 + $0x1c] ss:$12 sps:$4 sm:$0xff]  }
 0x1cb   :  { %4233 = vmatprep.subr.bf16.mxu1 %v5090_v15 }
 0x260   :  { %v786_v6 = vpop.f32.mrb[12].mxu1  ;;  %v890_v9 = vpop.f32.mrb[24].mxu0 }
 0x261   :  { %v912_v11 = vadd.f32 %v786_v6, %v5297_v16  ;;  %v919_v12 = vadd.f32 %v890_v9, %v5302_v19  ;;  %v4131_v14 = vpop.f32.mrb[13].mxu1  ;;  %v4151_v17 = vpop.f32.mrb[25].mxu0  ;;  %v4717_v6 = vld [vmem:[#allocation10 + $0x30] ss:$12 sps:$4 sm:$0xff]   ;;  %v4718_v9 = vld [vmem:[#allocation10 + $0x34] ss:$12 sps:$4 sm:$0xff]  }
 0x262   :  { %v789_v20 = vpop.f32.mrb[14].mxu1  ;;  %v893_v22 = vpop.f32.mrb[26].mxu0  ;;  %v4721_v14 = vld [vmem:[#allocation10 + $0x60] ss:$12 sps:$4 sm:$0xff]   ;;  %v4722_v17 = vld [vmem:[#allocation10 + $0x64] ss:$12 sps:$4 sm:$0xff]  }
 0x263   :  { %v3592_v24 = vmul.f32 -1.442695, %v912_v11  ;;  %v4132_v26 = vpop.f32.mrb[15].mxu1  ;;  %v4152_v27 = vpop.f32.mrb[27].mxu0  ;;  %v3593_v30 = vmul.f32 -1.442695, %v919_v12 }
 0x264   :  { %v4719_v11 = vld [vmem:[#allocation10 + $0x48] ss:$12 sps:$4 sm:$0xff]   ;;  %v4720_v12 = vld [vmem:[#allocation10 + $0x4c] ss:$12 sps:$4 sm:$0xff]  }
 0x265   :  { %4867 = vpow2.f32 %v3592_v24  ;;  %v4723_v20 = vld [vmem:[#allocation10 + $0x78] ss:$12 sps:$4 sm:$0xff]   ;;  %v4724_v22 = vld [vmem:[#allocation10 + $0x7c] ss:$12 sps:$4 sm:$0xff]   ;;  %v4726_v26 = vld [vmem:[#allocation10 + $0x94] ss:$12 sps:$4 sm:$0xff]  }
 0x266   :  { %4869 = vpow2.f32 %v3593_v30  ;;  %v4725_v24 = vld [vmem:[#allocation10 + $0x90] ss:$12 sps:$4 sm:$0xff]   ;;  %v4727_v27 = vld [vmem:[#allocation10 + $0xa8] ss:$12 sps:$4 sm:$0xff]   ;;  %v4728_v30 = vld [vmem:[#allocation10 + $0xac] ss:$12 sps:$4 sm:$0xff]  }
 0x26f   :  { %v4868_v32 = vpop.eup %4867 }
 0x270   :  { %v916_v34 = vadd.f32 1.0, %v4868_v32  ;;  %v4870_v36 = vpop.eup %4869 }
 0x271   :  { %v923_v40 = vadd.f32 1.0, %v4870_v36 }
 0x272   :  { %4871 = vrcp.f32 %v916_v34 }
 0x273   :  { %4873 = vrcp.f32 %v923_v40 }
 0x27c   :  { %v4872_v19 = vpop.eup %4871 }
 0x27d   :  { %v4874_v50 = vpop.eup %4873 }
 0x27e   :  { %v1017_v52 = vsub.f32 1.0, %v4874_v50  ;;  %v1019_v55 = vmul.f32 %v4874_v50, %v5348_v38 }
 0x280   :  { %v1008_v42 = vpop.f32.mrb[16].mxu1 }
 0x281   :  { %v1009_v16 = vadd.f32 %v5343_v4, %v1008_v42  ;;  %v4171_v2 = vpop.f32.mrb[17].mxu1 }
 0x282   :  { %v1011_v8 = vpop.f32.mrb[18].mxu1 }
 0x283   :  { %v1014_v44 = vmul.f32 %v4872_v19, %v1009_v16  ;;  %v4172_v46 = vpop.f32.mrb[19].mxu1 }
 0x285   :  { %v1015_v48 = vadd.f32 %v1014_v44, %v5300_v18  ;;  %v4707_v18 = vld [vmem:[#allocation10 + $0x38] ss:$12 sps:$4 sm:$0xff]  }
 0x287   :  { %4875 = vtanh.f32 %v1015_v48 }
 0x291   :  { %v4876_v53 = vpop.eup %4875 }
 0x292   :  { %v1018_v54 = vmul.f32 %v4876_v53, %v1017_v52 }
 0x294   :  { %v5387_v56 = vadd.f32 %v1019_v55, %v1018_v54 }
 0x296   :  { %v1027_v58 = vpack.c.bf16 %v5387_v56, %v5387_v56 }
 0x298   :  { %4190 = vmatmul.mubr.bf16.vlgmr.msra.gmra.mrb[28].mxu0 %v1027_v58  ;;  %4210 = vmatmul.mubr.bf16.vlgmr.msra.gmra.mrb[20].mxu1 %v1027_v58 }
 0x299   :  { %4214 = vmatpush3.bf16.msra.mxu0 %v4705_v57  ;;  %4229 = vmatprep.mubr.msk.bf16.mxu0 %vm5091_vm2, %v5090_v15 }
 0x29a   :  { %4215 = vmatprep.subr.bf16.mxu0 %v5090_v15  ;;  %4249 = vmatprep.mubr.msk.bf16.mxu1 %vm5091_vm2, %v5090_v15 }
 0x29b   :  { %4234 = vmatpush3.bf16.msra.mxu1 %v4713_v1 }
 0x29c   :  { %4235 = vmatprep.subr.bf16.mxu1 %v5090_v15 }
 0x29d   :  { %4216 = vmatpush3.bf16.msra.mxu0 %v4706_v59 }
 0x29e   :  { %4217 = vmatprep.subr.bf16.mxu0 %v5090_v15 }
 0x29f   :  { %4236 = vmatpush3.bf16.msra.mxu1 %v4715_v5  ;;  %v4729_v5 = vld [vmem:[#allocation10 + $0x8] ss:$12 sps:$4 sm:$0xff]  }
 0x2a0   :  { %4237 = vmatprep.subr.bf16.mxu1 %v5090_v15 }
 0x2a1   :  { %4218 = vmatpush3.bf16.msra.mxu0 %v4707_v18 }
 0x2a2   :  { %4219 = vmatprep.subr.bf16.mxu0 %v5090_v15 }
 0x2a3   :  { %4238 = vmatpush3.bf16.msra.mxu1 %v4717_v6  ;;  %v4730_v6 = vld [vmem:[#allocation10 + $0x20] ss:$12 sps:$4 sm:$0xff]  }
 0x2a4   :  { %4239 = vmatprep.subr.bf16.mxu1 %v5090_v15 }
 0x2a5   :  { %4220 = vmatpush3.bf16.msra.mxu0 %v4708_v60 }
 0x2a6   :  { %4221 = vmatprep.subr.bf16.mxu0 %v5090_v15 }
 0x2a7   :  { %4240 = vmatpush3.bf16.msra.mxu1 %v4719_v11  ;;  %v4733_v11 = vld [vmem:[#allocation10 + $0x68] ss:$12 sps:$4 sm:$0xff]  }
 0x2a8   :  { %4241 = vmatprep.subr.bf16.mxu1 %v5090_v15 }
 0x2a9   :  { %4222 = vmatpush3.bf16.msra.mxu0 %v4709_v61 }
 0x2aa   :  { %4223 = vmatprep.subr.bf16.mxu0 %v5090_v15 }
 0x2ab   :  { %4242 = vmatpush3.bf16.msra.mxu1 %v4721_v14  ;;  %v4735_v14 = vld [vmem:[#allocation10 + $0x98] ss:$12 sps:$4 sm:$0xff]  }
 0x2ac   :  { %4243 = vmatprep.subr.bf16.mxu1 %v5090_v15 }
 0x2ad   :  { %4224 = vmatpush3.bf16.msra.mxu0 %v4710_v62 }
 0x2ae   :  { %4225 = vmatprep.subr.bf16.mxu0 %v5090_v15 }
 0x2af   :  { %4244 = vmatpush3.bf16.msra.mxu1 %v4723_v20  ;;  %v4737_v20 = vld [vmem:[#allocation10] ss:$12 sps:$4 sm:$0xff]  }
 0x2b0   :  { %4245 = vmatprep.subr.bf16.mxu1 %v5090_v15 }
 0x2b1   :  { %4226 = vmatpush3.bf16.msra.mxu0 %v4711_v63 }
 0x2b2   :  { %4227 = vmatprep.subr.bf16.mxu0 %v5090_v15 }
 0x2b3   :  { %4246 = vmatpush3.bf16.msra.mxu1 %v4725_v24  ;;  %v4739_v24 = vld [vmem:[#allocation10 + $0x18] ss:$12 sps:$4 sm:$0xff]  }
 0x2b4   :  { %4247 = vmatprep.subr.bf16.mxu1 %v5090_v15 }
 0x2b5   :  { %4228 = vmatpush3.bf16.msra.mxu0 %v4712_v0 }
 0x2b6   :  { %4253 = vmatprep.subr.bf16.mxu0 %v5090_v15 }
 0x2b7   :  { %4248 = vmatpush3.bf16.msra.mxu1 %v4727_v27  ;;  %v4741_v27 = vld [vmem:[#allocation10 + $0x30] ss:$12 sps:$4 sm:$0xff]  }
 0x2b8   :  { %4230 = vmatmul.mubr.bf16.vlgmr.msra.gmra.mrb[32].mxu0 %v1027_v58  ;;  %4273 = vmatprep.subr.bf16.mxu1 %v5090_v15 }
 0x2b9   :  { %4269 = vmatprep.mubr.msk.bf16.mxu0 %vm5091_vm2, %v5090_v15  ;;  %4254 = vmatpush3.bf16.msra.mxu0 %v4714_v3 }
 0x2ba   :  { %4255 = vmatprep.subr.bf16.mxu0 %v5090_v15 }
 0x2bd   :  { %4256 = vmatpush3.bf16.msra.mxu0 %v4716_v10 }
 0x2be   :  { %4257 = vmatprep.subr.bf16.mxu0 %v5090_v15 }
 0x2c1   :  { %4258 = vmatpush3.bf16.msra.mxu0 %v4718_v9  ;;  %v4732_v9 = vld [vmem:[#allocation10 + $0x50] ss:$12 sps:$4 sm:$0xff]  }
 0x2c2   :  { %4259 = vmatprep.subr.bf16.mxu0 %v5090_v15 }
 0x2c5   :  { %4260 = vmatpush3.bf16.msra.mxu0 %v4720_v12  ;;  %v4734_v12 = vld [vmem:[#allocation10 + $0x80] ss:$12 sps:$4 sm:$0xff]  }
 0x2c6   :  { %4261 = vmatprep.subr.bf16.mxu0 %v5090_v15 }
 0x2c9   :  { %4262 = vmatpush3.bf16.msra.mxu0 %v4722_v17  ;;  %v4736_v17 = vld [vmem:[#allocation10 + $0xb0] ss:$12 sps:$4 sm:$0xff]  }
 0x2ca   :  { %4263 = vmatprep.subr.bf16.mxu0 %v5090_v15 }
 0x2cd   :  { %4264 = vmatpush3.bf16.msra.mxu0 %v4724_v22  ;;  %v4738_v22 = vld [vmem:[#allocation10 + $0x4] ss:$12 sps:$4 sm:$0xff]  }
 0x2ce   :  { %4265 = vmatprep.subr.bf16.mxu0 %v5090_v15 }
 0x2d1   :  { %4266 = vmatpush3.bf16.msra.mxu0 %v4726_v26  ;;  %v4740_v26 = vld [vmem:[#allocation10 + $0x1c] ss:$12 sps:$4 sm:$0xff]  }
 0x2d2   :  { %4267 = vmatprep.subr.bf16.mxu0 %v5090_v15 }
 0x2d5   :  { %4268 = vmatpush3.bf16.msra.mxu0 %v4728_v30  ;;  %v4742_v30 = vld [vmem:[#allocation10 + $0x34] ss:$12 sps:$4 sm:$0xff]  }
 0x2d6   :  { %4293 = vmatprep.subr.bf16.mxu0 %v5090_v15 }
 0x36b   :  { %v1126_v32 = vpop.f32.mrb[28].mxu0  ;;  %v1230_v34 = vpop.f32.mrb[20].mxu1 }
 0x36c   :  { %v1252_v36 = vadd.f32 %v1126_v32, %v5304_v21  ;;  %v1259_v40 = vadd.f32 %v1230_v34, %v5306_v23  ;;  %v4191_v42 = vpop.f32.mrb[29].mxu0  ;;  %v4211_v16 = vpop.f32.mrb[21].mxu1  ;;  %v4743_v32 = vld [vmem:[#allocation10 + $0x48] ss:$12 sps:$4 sm:$0xff]   ;;  %v4744_v34 = vld [vmem:[#allocation10 + $0x4c] ss:$12 sps:$4 sm:$0xff]  }
 0x36d   :  { %v1129_v2 = vpop.f32.mrb[30].mxu0  ;;  %v1233_v19 = vpop.f32.mrb[22].mxu1  ;;  %v4747_v42 = vld [vmem:[#allocation10 + $0x78] ss:$12 sps:$4 sm:$0xff]   ;;  %v4748_v16 = vld [vmem:[#allocation10 + $0x7c] ss:$12 sps:$4 sm:$0xff]  }
 0x36e   :  { %v3618_v8 = vmul.f32 -1.442695, %v1252_v36  ;;  %v4192_v44 = vpop.f32.mrb[31].mxu0  ;;  %v4212_v46 = vpop.f32.mrb[23].mxu1  ;;  %v3619_v48 = vmul.f32 -1.442695, %v1259_v40 }
 0x36f   :  { %v4745_v36 = vld [vmem:[#allocation10 + $0x60] ss:$12 sps:$4 sm:$0xff]   ;;  %v4746_v40 = vld [vmem:[#allocation10 + $0x64] ss:$12 sps:$4 sm:$0xff]  }
 0x370   :  { %4877 = vpow2.f32 %v3618_v8  ;;  %v4749_v2 = vld [vmem:[#allocation10 + $0x90] ss:$12 sps:$4 sm:$0xff]   ;;  %v4750_v19 = vld [vmem:[#allocation10 + $0x94] ss:$12 sps:$4 sm:$0xff]   ;;  %v4752_v44 = vld [vmem:[#allocation10 + $0xac] ss:$12 sps:$4 sm:$0xff]  }
 0x371   :  { %4879 = vpow2.f32 %v3619_v48  ;;  %v4751_v8 = vld [vmem:[#allocation10 + $0xa8] ss:$12 sps:$4 sm:$0xff]  }
 0x37a   :  { %v4878_v50 = vpop.eup %4877 }
 0x37b   :  { %v1256_v52 = vadd.f32 1.0, %v4878_v50  ;;  %v4880_v53 = vpop.eup %4879 }
 0x37c   :  { %v1263_v54 = vadd.f32 1.0, %v4880_v53 }
 0x37d   :  { %4881 = vrcp.f32 %v1256_v52 }
 0x37e   :  { %4883 = vrcp.f32 %v1263_v54 }
 0x387   :  { %v4882_v23 = vpop.eup %4881 }
 0x388   :  { %v4884_v61 = vpop.eup %4883 }
 0x389   :  { %v1357_v62 = vsub.f32 1.0, %v4884_v61  ;;  %v1359_v1 = vmul.f32 %v4884_v61, %v5387_v56 }
 0x38b   :  { %v1348_v55 = vpop.f32.mrb[32].mxu0 }
 0x38c   :  { %v1349_v21 = vadd.f32 %v5343_v4, %v1348_v55  ;;  %v4231_v57 = vpop.f32.mrb[33].mxu0 }
 0x38d   :  { %v1351_v58 = vpop.f32.mrb[34].mxu0 }
 0x38e   :  { %v1354_v59 = vmul.f32 %v4882_v23, %v1349_v21  ;;  %v4232_v18 = vpop.f32.mrb[35].mxu0 }
 0x390   :  { %v1355_v60 = vadd.f32 %v1354_v59, %v5290_v7  ;;  %v4731_v7 = vld [vmem:[#allocation10 + $0x38] ss:$12 sps:$4 sm:$0xff]  }
 0x392   :  { %4885 = vtanh.f32 %v1355_v60 }
 0x39c   :  { %v4886_v63 = vpop.eup %4885 }
 0x39d   :  { %v1358_v0 = vmul.f32 %v4886_v63, %v1357_v62 }
 0x39f   :  { %v5426_v3 = vadd.f32 %v1359_v1, %v1358_v0 }
 0x3a1   :  { %v1367_v10 = vpack.c.bf16 %v5426_v3, %v5426_v3 }
 0x3a3   :  { %4250 = vmatmul.mubr.bf16.vlgmr.msra.gmra.mrb[24].mxu1 %v1367_v10  ;;  %4270 = vmatmul.mubr.bf16.vlgmr.msra.gmra.mrb[36].mxu0 %v1367_v10 }
 0x3a4   :  { %4274 = vmatpush3.bf16.msra.mxu1 %v4729_v5  ;;  %4289 = vmatprep.mubr.msk.bf16.mxu1 %vm5091_vm2, %v5090_v15 }
 0x3a5   :  { %4275 = vmatprep.subr.bf16.mxu1 %v5090_v15  ;;  %4309 = vmatprep.mubr.msk.bf16.mxu0 %vm5091_vm2, %v5090_v15 }
 0x3a6   :  { %4294 = vmatpush3.bf16.msra.mxu0 %v4737_v20  ;;  %v4753_v20 = vld [vmem:[#allocation10 + $0x8] ss:$12 sps:$4 sm:$0xff]  }
 0x3a7   :  { %4295 = vmatprep.subr.bf16.mxu0 %v5090_v15 }
 0x3a8   :  { %4276 = vmatpush3.bf16.msra.mxu1 %v4730_v6 }
 0x3a9   :  { %4277 = vmatprep.subr.bf16.mxu1 %v5090_v15 }
 0x3aa   :  { %4296 = vmatpush3.bf16.msra.mxu0 %v4739_v24  ;;  %v4754_v24 = vld [vmem:[#allocation10 + $0x20] ss:$12 sps:$4 sm:$0xff]  }
 0x3ab   :  { %4297 = vmatprep.subr.bf16.mxu0 %v5090_v15 }
 0x3ac   :  { %4278 = vmatpush3.bf16.msra.mxu1 %v4731_v7 }
 0x3ad   :  { %4279 = vmatprep.subr.bf16.mxu1 %v5090_v15 }
 0x3ae   :  { %4298 = vmatpush3.bf16.msra.mxu0 %v4741_v27  ;;  %v4757_v27 = vld [vmem:[#allocation10 + $0x68] ss:$12 sps:$4 sm:$0xff]  }
 0x3af   :  { %4299 = vmatprep.subr.bf16.mxu0 %v5090_v15 }
 0x3b0   :  { %4280 = vmatpush3.bf16.msra.mxu1 %v4732_v9 }
 0x3b1   :  { %4281 = vmatprep.subr.bf16.mxu1 %v5090_v15 }
 0x3b2   :  { %4300 = vmatpush3.bf16.msra.mxu0 %v4743_v32  ;;  %v4759_v32 = vld [vmem:[#allocation10 + $0x98] ss:$12 sps:$4 sm:$0xff]  }
 0x3b3   :  { %4301 = vmatprep.subr.bf16.mxu0 %v5090_v15 }
 0x3b4   :  { %4282 = vmatpush3.bf16.msra.mxu1 %v4733_v11 }
 0x3b5   :  { %4283 = vmatprep.subr.bf16.mxu1 %v5090_v15 }
 0x3b6   :  { %4302 = vmatpush3.bf16.msra.mxu0 %v4745_v36  ;;  %v4761_v36 = vld [vmem:[#allocation10] ss:$12 sps:$4 sm:$0xff]  }
 0x3b7   :  { %4303 = vmatprep.subr.bf16.mxu0 %v5090_v15 }
 0x3b8   :  { %4284 = vmatpush3.bf16.msra.mxu1 %v4734_v12 }
 0x3b9   :  { %4285 = vmatprep.subr.bf16.mxu1 %v5090_v15 }
 0x3ba   :  { %4304 = vmatpush3.bf16.msra.mxu0 %v4747_v42  ;;  %v4763_v42 = vld [vmem:[#allocation10 + $0x18] ss:$12 sps:$4 sm:$0xff]  }
 0x3bb   :  { %4305 = vmatprep.subr.bf16.mxu0 %v5090_v15 }
 0x3bc   :  { %4286 = vmatpush3.bf16.msra.mxu1 %v4735_v14 }
 0x3bd   :  { %4287 = vmatprep.subr.bf16.mxu1 %v5090_v15 }
 0x3be   :  { %4306 = vmatpush3.bf16.msra.mxu0 %v4749_v2  ;;  %v4765_v2 = vld [vmem:[#allocation10 + $0x30] ss:$12 sps:$4 sm:$0xff]  }
 0x3bf   :  { %4307 = vmatprep.subr.bf16.mxu0 %v5090_v15 }
 0x3c0   :  { %4288 = vmatpush3.bf16.msra.mxu1 %v4736_v17 }
 0x3c1   :  { %4313 = vmatprep.subr.bf16.mxu1 %v5090_v15 }
 0x3c2   :  { %4308 = vmatpush3.bf16.msra.mxu0 %v4751_v8  ;;  %v4767_v8 = vld [vmem:[#allocation10 + $0x48] ss:$12 sps:$4 sm:$0xff]  }
 0x3c3   :  { %4290 = vmatmul.mubr.bf16.vlgmr.msra.gmra.mrb[28].mxu1 %v1367_v10  ;;  %4333 = vmatprep.subr.bf16.mxu0 %v5090_v15 }
 0x3c4   :  { %4329 = vmatprep.mubr.msk.bf16.mxu1 %vm5091_vm2, %v5090_v15  ;;  %4314 = vmatpush3.bf16.msra.mxu1 %v4738_v22 }
 0x3c5   :  { %4315 = vmatprep.subr.bf16.mxu1 %v5090_v15 }
 0x3c8   :  { %4316 = vmatpush3.bf16.msra.mxu1 %v4740_v26  ;;  %v4756_v26 = vld [vmem:[#allocation10 + $0x50] ss:$12 sps:$4 sm:$0xff]  }
 0x3c9   :  { %4317 = vmatprep.subr.bf16.mxu1 %v5090_v15 }
 0x3cc   :  { %4318 = vmatpush3.bf16.msra.mxu1 %v4742_v30  ;;  %v4758_v30 = vld [vmem:[#allocation10 + $0x80] ss:$12 sps:$4 sm:$0xff]  }
 0x3cd   :  { %4319 = vmatprep.subr.bf16.mxu1 %v5090_v15 }
 0x3d0   :  { %4320 = vmatpush3.bf16.msra.mxu1 %v4744_v34  ;;  %v4760_v34 = vld [vmem:[#allocation10 + $0xb0] ss:$12 sps:$4 sm:$0xff]  }
 0x3d1   :  { %4321 = vmatprep.subr.bf16.mxu1 %v5090_v15 }
 0x3d4   :  { %4322 = vmatpush3.bf16.msra.mxu1 %v4746_v40  ;;  %v4762_v40 = vld [vmem:[#allocation10 + $0x4] ss:$12 sps:$4 sm:$0xff]  }
 0x3d5   :  { %4323 = vmatprep.subr.bf16.mxu1 %v5090_v15 }
 0x3d8   :  { %4324 = vmatpush3.bf16.msra.mxu1 %v4748_v16  ;;  %v4764_v16 = vld [vmem:[#allocation10 + $0x1c] ss:$12 sps:$4 sm:$0xff]  }
 0x3d9   :  { %4325 = vmatprep.subr.bf16.mxu1 %v5090_v15 }
 0x3dc   :  { %4326 = vmatpush3.bf16.msra.mxu1 %v4750_v19  ;;  %v4766_v19 = vld [vmem:[#allocation10 + $0x34] ss:$12 sps:$4 sm:$0xff]  }
 0x3dd   :  { %4327 = vmatprep.subr.bf16.mxu1 %v5090_v15 }
 0x3e0   :  { %4328 = vmatpush3.bf16.msra.mxu1 %v4752_v44  ;;  %v4768_v44 = vld [vmem:[#allocation10 + $0x4c] ss:$12 sps:$4 sm:$0xff]  }
 0x3e1   :  { %4353 = vmatprep.subr.bf16.mxu1 %v5090_v15 }
 0x476   :  { %v1466_v46 = vpop.f32.mrb[24].mxu1  ;;  %v1570_v48 = vpop.f32.mrb[36].mxu0 }
 0x477   :  { %v1592_v50 = vadd.f32 %v1466_v46, %v5308_v25  ;;  %v1599_v52 = vadd.f32 %v1570_v48, %v5310_v28  ;;  %v4251_v53 = vpop.f32.mrb[25].mxu1  ;;  %v4271_v54 = vpop.f32.mrb[37].mxu0  ;;  %v4769_v46 = vld [vmem:[#allocation10 + $0x60] ss:$12 sps:$4 sm:$0xff]   ;;  %v4770_v48 = vld [vmem:[#allocation10 + $0x64] ss:$12 sps:$4 sm:$0xff]  }
 0x478   :  { %v1469_v55 = vpop.f32.mrb[26].mxu1  ;;  %v1573_v21 = vpop.f32.mrb[38].mxu0  ;;  %v4773_v53 = vld [vmem:[#allocation10 + $0x90] ss:$12 sps:$4 sm:$0xff]   ;;  %v4774_v54 = vld [vmem:[#allocation10 + $0x94] ss:$12 sps:$4 sm:$0xff]  }
 0x479   :  { %v3644_v57 = vmul.f32 -1.442695, %v1592_v50  ;;  %v4252_v23 = vpop.f32.mrb[27].mxu1  ;;  %v4272_v58 = vpop.f32.mrb[39].mxu0  ;;  %v3645_v59 = vmul.f32 -1.442695, %v1599_v52 }
 0x47a   :  { %v4771_v50 = vld [vmem:[#allocation10 + $0x78] ss:$12 sps:$4 sm:$0xff]   ;;  %v4772_v52 = vld [vmem:[#allocation10 + $0x7c] ss:$12 sps:$4 sm:$0xff]  }
 0x47b   :  { %4887 = vpow2.f32 %v3644_v57  ;;  %v4775_v55 = vld [vmem:[#allocation10 + $0xa8] ss:$12 sps:$4 sm:$0xff]   ;;  %v4776_v21 = vld [vmem:[#allocation10 + $0xac] ss:$12 sps:$4 sm:$0xff]  }
 0x47c   :  { %4889 = vpow2.f32 %v3645_v59 }
 0x485   :  { %v4888_v18 = vpop.eup %4887 }
 0x486   :  { %v1596_v60 = vadd.f32 1.0, %v4888_v18  ;;  %v4890_v61 = vpop.eup %4889 }
 0x487   :  { %v1603_v62 = vadd.f32 1.0, %v4890_v61 }
 0x488   :  { %4891 = vrcp.f32 %v1596_v60 }
 0x489   :  { %4893 = vrcp.f32 %v1603_v62 }
 0x492   :  { %v4892_v28 = vpop.eup %4891 }
 0x493   :  { %v4894_v7 = vpop.eup %4893 }
 0x494   :  { %v1697_v9 = vsub.f32 1.0, %v4894_v7  ;;  %v1699_v14 = vmul.f32 %v4894_v7, %v5426_v3 }
 0x496   :  { %v1688_v63 = vpop.f32.mrb[28].mxu1 }
 0x497   :  { %v1689_v25 = vadd.f32 %v5343_v4, %v1688_v63  ;;  %v4291_v0 = vpop.f32.mrb[29].mxu1 }
 0x498   :  { %v1691_v1 = vpop.f32.mrb[30].mxu1 }
 0x499   :  { %v1694_v5 = vmul.f32 %v4892_v28, %v1689_v25  ;;  %v4292_v10 = vpop.f32.mrb[31].mxu1 }
 0x49b   :  { %v1695_v6 = vadd.f32 %v1694_v5, %v5295_v13  ;;  %v4755_v13 = vld [vmem:[#allocation10 + $0x38] ss:$12 sps:$4 sm:$0xff]  }
 0x49d   :  { %4895 = vtanh.f32 %v1695_v6 }
 0x4a7   :  { %v4896_v11 = vpop.eup %4895 }
 0x4a8   :  { %v1698_v12 = vmul.f32 %v4896_v11, %v1697_v9 }
 0x4aa   :  { %v5465_v17 = vadd.f32 %v1699_v14, %v1698_v12 }
 0x4ac   :  { %v1707_v22 = vpack.c.bf16 %v5465_v17, %v5465_v17 }
 0x4ae   :  { %4310 = vmatmul.mubr.bf16.vlgmr.msra.gmra.mrb[40].mxu0 %v1707_v22  ;;  %4330 = vmatmul.mubr.bf16.vlgmr.msra.gmra.mrb[32].mxu1 %v1707_v22 }
 0x4af   :  { %4334 = vmatpush3.bf16.msra.mxu0 %v4753_v20  ;;  %4349 = vmatprep.mubr.msk.bf16.mxu0 %vm5091_vm2, %v5090_v15 }
 0x4b0   :  { %4335 = vmatprep.subr.bf16.mxu0 %v5090_v15  ;;  %4369 = vmatprep.mubr.msk.bf16.mxu1 %vm5091_vm2, %v5090_v15 }
 0x4b1   :  { %4354 = vmatpush3.bf16.msra.mxu1 %v4761_v36  ;;  %v4780_v36 = vld [vmem:[#allocation10 + $0x50] ss:$12 sps:$4 sm:$0xff]  }
 0x4b2   :  { %4355 = vmatprep.subr.bf16.mxu1 %v5090_v15 }
 0x4b3   :  { %4336 = vmatpush3.bf16.msra.mxu0 %v4754_v24 }
 0x4b4   :  { %4337 = vmatprep.subr.bf16.mxu0 %v5090_v15 }
 0x4b5   :  { %4356 = vmatpush3.bf16.msra.mxu1 %v4763_v42  ;;  %v4782_v42 = vld [vmem:[#allocation10 + $0x80] ss:$12 sps:$4 sm:$0xff]  }
 0x4b6   :  { %4357 = vmatprep.subr.bf16.mxu1 %v5090_v15 }
 0x4b7   :  { %4338 = vmatpush3.bf16.msra.mxu0 %v4755_v13 }
 0x4b8   :  { %4339 = vmatprep.subr.bf16.mxu0 %v5090_v15 }
 0x4b9   :  { %4358 = vmatpush3.bf16.msra.mxu1 %v4765_v2  ;;  %v4784_v2 = vld [vmem:[#allocation10 + $0xb0] ss:$12 sps:$4 sm:$0xff]  }
 0x4ba   :  { %4359 = vmatprep.subr.bf16.mxu1 %v5090_v15 }
 0x4bb   :  { %4340 = vmatpush3.bf16.msra.mxu0 %v4756_v26 }
 0x4bc   :  { %4341 = vmatprep.subr.bf16.mxu0 %v5090_v15 }
 0x4bd   :  { %4360 = vmatpush3.bf16.msra.mxu1 %v4767_v8  ;;  %v4786_v8 = vld [vmem:[#allocation10 + $0x4] ss:$12 sps:$4 sm:$0xff]  }
 0x4be   :  { %4361 = vmatprep.subr.bf16.mxu1 %v5090_v15 }
 0x4bf   :  { %4342 = vmatpush3.bf16.msra.mxu0 %v4757_v27 }
 0x4c0   :  { %4343 = vmatprep.subr.bf16.mxu0 %v5090_v15 }
 0x4c1   :  { %4362 = vmatpush3.bf16.msra.mxu1 %v4769_v46  ;;  %v4788_v46 = vld [vmem:[#allocation10 + $0x1c] ss:$12 sps:$4 sm:$0xff]  }
 0x4c2   :  { %4363 = vmatprep.subr.bf16.mxu1 %v5090_v15 }
 0x4c3   :  { %4344 = vmatpush3.bf16.msra.mxu0 %v4758_v30 }
 0x4c4   :  { %4345 = vmatprep.subr.bf16.mxu0 %v5090_v15 }
 0x4c5   :  { %4364 = vmatpush3.bf16.msra.mxu1 %v4771_v50  ;;  %v4790_v50 = vld [vmem:[#allocation10 + $0x34] ss:$12 sps:$4 sm:$0xff]  }
 0x4c6   :  { %4365 = vmatprep.subr.bf16.mxu1 %v5090_v15 }
 0x4c7   :  { %4346 = vmatpush3.bf16.msra.mxu0 %v4759_v32  ;;  %v4777_v32 = vld [vmem:[#allocation10 + $0x8] ss:$12 sps:$4 sm:$0xff]  }
 0x4c8   :  { %4347 = vmatprep.subr.bf16.mxu0 %v5090_v15 }
 0x4c9   :  { %4366 = vmatpush3.bf16.msra.mxu1 %v4773_v53  ;;  %v4792_v53 = vld [vmem:[#allocation10 + $0x4c] ss:$12 sps:$4 sm:$0xff]  }
 0x4ca   :  { %4367 = vmatprep.subr.bf16.mxu1 %v5090_v15 }
 0x4cb   :  { %4348 = vmatpush3.bf16.msra.mxu0 %v4760_v34  ;;  %v4778_v34 = vld [vmem:[#allocation10 + $0x20] ss:$12 sps:$4 sm:$0xff]  }
 0x4cc   :  { %4373 = vmatprep.subr.bf16.mxu0 %v5090_v15 }
 0x4cd   :  { %4368 = vmatpush3.bf16.msra.mxu1 %v4775_v55  ;;  %v4794_v55 = vld [vmem:[#allocation10 + $0x64] ss:$12 sps:$4 sm:$0xff]  }
 0x4ce   :  { %4350 = vmatmul.mubr.bf16.vlgmr.msra.gmra.mrb[44].mxu0 %v1707_v22  ;;  %4393 = vmatprep.subr.bf16.mxu1 %v5090_v15 }
 0x4cf   :  { %4389 = vmatprep.mubr.msk.bf16.mxu0 %vm5091_vm2, %v5090_v15  ;;  %4374 = vmatpush3.bf16.msra.mxu0 %v4762_v40  ;;  %v4781_v40 = vld [vmem:[#allocation10 + $0x68] ss:$12 sps:$4 sm:$0xff]  }
 0x4d0   :  { %4375 = vmatprep.subr.bf16.mxu0 %v5090_v15 }
 0x4d3   :  { %4376 = vmatpush3.bf16.msra.mxu0 %v4764_v16  ;;  %v4783_v16 = vld [vmem:[#allocation10 + $0x98] ss:$12 sps:$4 sm:$0xff]  }
 0x4d4   :  { %4377 = vmatprep.subr.bf16.mxu0 %v5090_v15 }
 0x4d7   :  { %4378 = vmatpush3.bf16.msra.mxu0 %v4766_v19  ;;  %v4785_v19 = vld [vmem:[#allocation10] ss:$12 sps:$4 sm:$0xff]  }
 0x4d8   :  { %4379 = vmatprep.subr.bf16.mxu0 %v5090_v15 }
 0x4db   :  { %4380 = vmatpush3.bf16.msra.mxu0 %v4768_v44  ;;  %v4787_v44 = vld [vmem:[#allocation10 + $0x18] ss:$12 sps:$4 sm:$0xff]  }
 0x4dc   :  { %4381 = vmatprep.subr.bf16.mxu0 %v5090_v15 }
 0x4df   :  { %4382 = vmatpush3.bf16.msra.mxu0 %v4770_v48  ;;  %v4789_v48 = vld [vmem:[#allocation10 + $0x30] ss:$12 sps:$4 sm:$0xff]  }
 0x4e0   :  { %4383 = vmatprep.subr.bf16.mxu0 %v5090_v15 }
 0x4e3   :  { %4384 = vmatpush3.bf16.msra.mxu0 %v4772_v52  ;;  %v4791_v52 = vld [vmem:[#allocation10 + $0x48] ss:$12 sps:$4 sm:$0xff]  }
 0x4e4   :  { %4385 = vmatprep.subr.bf16.mxu0 %v5090_v15 }
 0x4e7   :  { %4386 = vmatpush3.bf16.msra.mxu0 %v4774_v54  ;;  %v4793_v54 = vld [vmem:[#allocation10 + $0x60] ss:$12 sps:$4 sm:$0xff]  }
 0x4e8   :  { %4387 = vmatprep.subr.bf16.mxu0 %v5090_v15 }
 0x4eb   :  { %4388 = vmatpush3.bf16.msra.mxu0 %v4776_v21  ;;  %v4795_v21 = vld [vmem:[#allocation10 + $0x78] ss:$12 sps:$4 sm:$0xff]  }
 0x4ec   :  { %4413 = vmatprep.subr.bf16.mxu0 %v5090_v15 }
 0x581   :  { %v1806_v57 = vpop.f32.mrb[40].mxu0  ;;  %v1910_v23 = vpop.f32.mrb[32].mxu1 }
 0x582   :  { %v1932_v58 = vadd.f32 %v1806_v57, %v5324_v37  ;;  %v1939_v59 = vadd.f32 %v1910_v23, %v5326_v39  ;;  %v4311_v18 = vpop.f32.mrb[41].mxu0  ;;  %v4331_v60 = vpop.f32.mrb[33].mxu1  ;;  %v4796_v57 = vld [vmem:[#allocation10 + $0x7c] ss:$12 sps:$4 sm:$0xff]  }
 0x583   :  { %v1809_v61 = vpop.f32.mrb[42].mxu0  ;;  %v1913_v62 = vpop.f32.mrb[34].mxu1  ;;  %v4797_v23 = vld [vmem:[#allocation10 + $0x90] ss:$12 sps:$4 sm:$0xff]   ;;  %v4800_v18 = vld [vmem:[#allocation10 + $0xac] ss:$12 sps:$4 sm:$0xff]  }
 0x584   :  { %v3670_v63 = vmul.f32 -1.442695, %v1932_v58  ;;  %v4312_v25 = vpop.f32.mrb[43].mxu0  ;;  %v4332_v0 = vpop.f32.mrb[35].mxu1  ;;  %v3671_v28 = vmul.f32 -1.442695, %v1939_v59 }
 0x585   :  { %v4798_v58 = vld [vmem:[#allocation10 + $0x94] ss:$12 sps:$4 sm:$0xff]  }
 0x586   :  { %4897 = vpow2.f32 %v3670_v63  ;;  %v4799_v59 = vld [vmem:[#allocation10 + $0xa8] ss:$12 sps:$4 sm:$0xff]  }
 0x587   :  { %4899 = vpow2.f32 %v3671_v28 }
 0x590   :  { %v4898_v1 = vpop.eup %4897 }
 0x591   :  { %v1936_v5 = vadd.f32 1.0, %v4898_v1  ;;  %v4900_v10 = vpop.eup %4899 }
 0x592   :  { %v1943_v6 = vadd.f32 1.0, %v4900_v10 }
 0x593   :  { %4901 = vrcp.f32 %v1936_v5 }
 0x594   :  { %4903 = vrcp.f32 %v1943_v6 }
 0x59d   :  { %v4902_v39 = vpop.eup %4901 }
 0x59e   :  { %v4904_v22 = vpop.eup %4903 }
 0x59f   :  { %v2037_v24 = vsub.f32 1.0, %v4904_v22  ;;  %v2039_v27 = vmul.f32 %v4904_v22, %v5465_v17 }
 0x5a1   :  { %v2028_v7 = vpop.f32.mrb[44].mxu0 }
 0x5a2   :  { %v2029_v37 = vadd.f32 %v5343_v4, %v2028_v7  ;;  %v4351_v9 = vpop.f32.mrb[45].mxu0 }
 0x5a3   :  { %v2031_v11 = vpop.f32.mrb[46].mxu0 }
 0x5a4   :  { %v2034_v12 = vmul.f32 %v4902_v39, %v2029_v37  ;;  %v4352_v14 = vpop.f32.mrb[47].mxu0 }
 0x5a6   :  { %v2035_v20 = vadd.f32 %v2034_v12, %v5316_v31  ;;  %v4779_v31 = vld [vmem:[#allocation10 + $0x38] ss:$12 sps:$4 sm:$0xff]  }
 0x5a8   :  { %4905 = vtanh.f32 %v2035_v20 }
 0x5b2   :  { %v4906_v13 = vpop.eup %4905 }
 0x5b3   :  { %v2038_v26 = vmul.f32 %v4906_v13, %v2037_v24 }
 0x5b5   :  { %v5504_v30 = vadd.f32 %v2039_v27, %v2038_v26 }
 0x5b7   :  { %v2047_v4 = vpack.c.bf16 %v5504_v30, %v5504_v30 }
 0x5b9   :  { %4370 = vmatmul.mubr.bf16.vlgmr.msra.gmra.mrb[36].mxu1 %v2047_v4  ;;  %4390 = vmatmul.mubr.bf16.vlgmr.msra.gmra.mrb[48].mxu0 %v2047_v4 }
 0x5ba   :  { %4394 = vmatpush3.bf16.msra.mxu1 %v4777_v32  ;;  %4409 = vmatprep.mubr.msk.bf16.mxu1 %vm5091_vm2, %v5090_v15 }
 0x5bb   :  { %4395 = vmatprep.subr.bf16.mxu1 %v5090_v15  ;;  %4429 = vmatprep.mubr.msk.bf16.mxu0 %vm5091_vm2, %v5090_v15 }
 0x5bc   :  { %4414 = vmatpush3.bf16.msra.mxu0 %v4785_v19  ;;  %v4805_v19 = vld [vmem:[#allocation10 + $0x68] ss:$12 sps:$4 sm:$0xff]  }
 0x5bd   :  { %4415 = vmatprep.subr.bf16.mxu0 %v5090_v15 }
 0x5be   :  { %4396 = vmatpush3.bf16.msra.mxu1 %v4778_v34 }
 0x5bf   :  { %4397 = vmatprep.subr.bf16.mxu1 %v5090_v15 }
 0x5c0   :  { %4416 = vmatpush3.bf16.msra.mxu0 %v4787_v44  ;;  %v4807_v44 = vld [vmem:[#allocation10 + $0x98] ss:$12 sps:$4 sm:$0xff]  }
 0x5c1   :  { %4417 = vmatprep.subr.bf16.mxu0 %v5090_v15 }
 0x5c2   :  { %4398 = vmatpush3.bf16.msra.mxu1 %v4779_v31 }
 0x5c3   :  { %4399 = vmatprep.subr.bf16.mxu1 %v5090_v15 }
 0x5c4   :  { %4418 = vmatpush3.bf16.msra.mxu0 %v4789_v48  ;;  %v4809_v48 = vld [vmem:[#allocation10] ss:$12 sps:$4 sm:$0xff]  }
 0x5c5   :  { %4419 = vmatprep.subr.bf16.mxu0 %v5090_v15 }
 0x5c6   :  { %4400 = vmatpush3.bf16.msra.mxu1 %v4780_v36 }
 0x5c7   :  { %4401 = vmatprep.subr.bf16.mxu1 %v5090_v15 }
 0x5c8   :  { %4420 = vmatpush3.bf16.msra.mxu0 %v4791_v52  ;;  %v4811_v52 = vld [vmem:[#allocation10 + $0x18] ss:$12 sps:$4 sm:$0xff]  }
 0x5c9   :  { %4421 = vmatprep.subr.bf16.mxu0 %v5090_v15 }
 0x5ca   :  { %4402 = vmatpush3.bf16.msra.mxu1 %v4781_v40  ;;  %v4801_v40 = vld [vmem:[#allocation10 + $0x8] ss:$12 sps:$4 sm:$0xff]  }
 0x5cb   :  { %4403 = vmatprep.subr.bf16.mxu1 %v5090_v15 }
 0x5cc   :  { %4422 = vmatpush3.bf16.msra.mxu0 %v4793_v54  ;;  %v4813_v54 = vld [vmem:[#allocation10 + $0x30] ss:$12 sps:$4 sm:$0xff]  }
 0x5cd   :  { %4423 = vmatprep.subr.bf16.mxu0 %v5090_v15 }
 0x5ce   :  { %4404 = vmatpush3.bf16.msra.mxu1 %v4782_v42 }
 0x5cf   :  { %4405 = vmatprep.subr.bf16.mxu1 %v5090_v15 }
 0x5d0   :  { %4424 = vmatpush3.bf16.msra.mxu0 %v4795_v21  ;;  %v4815_v21 = vld [vmem:[#allocation10 + $0x48] ss:$12 sps:$4 sm:$0xff]  }
 0x5d1   :  { %4425 = vmatprep.subr.bf16.mxu0 %v5090_v15 }
 0x5d2   :  { %4406 = vmatpush3.bf16.msra.mxu1 %v4783_v16  ;;  %v4802_v16 = vld [vmem:[#allocation10 + $0x20] ss:$12 sps:$4 sm:$0xff]  }
 0x5d3   :  { %4407 = vmatprep.subr.bf16.mxu1 %v5090_v15 }
 0x5d4   :  { %4426 = vmatpush3.bf16.msra.mxu0 %v4797_v23  ;;  %v4817_v23 = vld [vmem:[#allocation10 + $0x60] ss:$12 sps:$4 sm:$0xff]  }
 0x5d5   :  { %4427 = vmatprep.subr.bf16.mxu0 %v5090_v15 }
 0x5d6   :  { %4408 = vmatpush3.bf16.msra.mxu1 %v4784_v2  ;;  %v4804_v2 = vld [vmem:[#allocation10 + $0x50] ss:$12 sps:$4 sm:$0xff]  }
 0x5d7   :  { %4433 = vmatprep.subr.bf16.mxu1 %v5090_v15 }
 0x5d8   :  { %4428 = vmatpush3.bf16.msra.mxu0 %v4799_v59  ;;  %v4819_v59 = vld [vmem:[#allocation10 + $0x78] ss:$12 sps:$4 sm:$0xff]  }
 0x5d9   :  { %4410 = vmatmul.mubr.bf16.vlgmr.msra.gmra.mrb[40].mxu1 %v2047_v4  ;;  %4453 = vmatprep.subr.bf16.mxu0 %v5090_v15 }
 0x5da   :  { %4449 = vmatprep.mubr.msk.bf16.mxu1 %vm5091_vm2, %v5090_v15  ;;  %4434 = vmatpush3.bf16.msra.mxu1 %v4786_v8  ;;  %v4806_v8 = vld [vmem:[#allocation10 + $0x80] ss:$12 sps:$4 sm:$0xff]  }
 0x5db   :  { %4435 = vmatprep.subr.bf16.mxu1 %v5090_v15 }
 0x5de   :  { %4436 = vmatpush3.bf16.msra.mxu1 %v4788_v46  ;;  %v4808_v46 = vld [vmem:[#allocation10 + $0xb0] ss:$12 sps:$4 sm:$0xff]  }
 0x5df   :  { %4437 = vmatprep.subr.bf16.mxu1 %v5090_v15 }
 0x5e2   :  { %4438 = vmatpush3.bf16.msra.mxu1 %v4790_v50  ;;  %v4810_v50 = vld [vmem:[#allocation10 + $0x4] ss:$12 sps:$4 sm:$0xff]  }
 0x5e3   :  { %4439 = vmatprep.subr.bf16.mxu1 %v5090_v15 }
 0x5e6   :  { %4440 = vmatpush3.bf16.msra.mxu1 %v4792_v53  ;;  %v4812_v53 = vld [vmem:[#allocation10 + $0x1c] ss:$12 sps:$4 sm:$0xff]  }
 0x5e7   :  { %4441 = vmatprep.subr.bf16.mxu1 %v5090_v15 }
 0x5ea   :  { %4442 = vmatpush3.bf16.msra.mxu1 %v4794_v55  ;;  %v4814_v55 = vld [vmem:[#allocation10 + $0x34] ss:$12 sps:$4 sm:$0xff]  }
 0x5eb   :  { %4443 = vmatprep.subr.bf16.mxu1 %v5090_v15 }
 0x5ee   :  { %4444 = vmatpush3.bf16.msra.mxu1 %v4796_v57  ;;  %v4816_v57 = vld [vmem:[#allocation10 + $0x4c] ss:$12 sps:$4 sm:$0xff]  }
 0x5ef   :  { %4445 = vmatprep.subr.bf16.mxu1 %v5090_v15 }
 0x5f2   :  { %4446 = vmatpush3.bf16.msra.mxu1 %v4798_v58  ;;  %v4818_v58 = vld [vmem:[#allocation10 + $0x64] ss:$12 sps:$4 sm:$0xff]  }
 0x5f3   :  { %4447 = vmatprep.subr.bf16.mxu1 %v5090_v15 }
 0x5f6   :  { %4448 = vmatpush3.bf16.msra.mxu1 %v4800_v18  ;;  %v4820_v18 = vld [vmem:[#allocation10 + $0x7c] ss:$12 sps:$4 sm:$0xff]  }
 0x5f7   :  { %4473 = vmatprep.subr.bf16.mxu1 %v5090_v15 }
 0x68c   :  { %v2146_v60 = vpop.f32.mrb[36].mxu1  ;;  %v2250_v61 = vpop.f32.mrb[48].mxu0 }
 0x68d   :  { %v2272_v62 = vadd.f32 %v2146_v60, %v5328_v41  ;;  %v2279_v63 = vadd.f32 %v2250_v61, %v5330_v43  ;;  %v4371_v25 = vpop.f32.mrb[37].mxu1  ;;  %v4391_v0 = vpop.f32.mrb[49].mxu0  ;;  %v5543_v41 = vld [vmem:[%s5685_s4] ss:$0 sm:$0xff]  ;;  %v4821_v60 = vld [vmem:[#allocation10 + $0x90] ss:$12 sps:$4 sm:$0xff]  }
 0x68e   :  { %v2149_v28 = vpop.f32.mrb[38].mxu1  ;;  %v2253_v1 = vpop.f32.mrb[50].mxu0  ;;  %v4822_v61 = vld [vmem:[#allocation10 + $0x94] ss:$12 sps:$4 sm:$0xff]  }
 0x68f   :  { %v3696_v5 = vmul.f32 -1.442695, %v2272_v62  ;;  %v4372_v10 = vpop.f32.mrb[39].mxu1  ;;  %v4392_v6 = vpop.f32.mrb[51].mxu0  ;;  %v3697_v7 = vmul.f32 -1.442695, %v2279_v63 }
 0x690   :  { %v4823_v62 = vld [vmem:[#allocation10 + $0xa8] ss:$12 sps:$4 sm:$0xff]   ;;  %v4824_v63 = vld [vmem:[#allocation10 + $0xac] ss:$12 sps:$4 sm:$0xff]   ;;  %v4825_v25 = vld [vmem:[#allocation11] sm:$0xff]  }
 0x691   :  { %4907 = vpow2.f32 %v3696_v5 }
 0x692   :  { %4909 = vpow2.f32 %v3697_v7 }
 0x69b   :  { %v4908_v37 = vpop.eup %4907 }
 0x69c   :  { %v2276_v9 = vadd.f32 1.0, %v4908_v37  ;;  %v4910_v39 = vpop.eup %4909 }
 0x69d   :  { %v2283_v11 = vadd.f32 1.0, %v4910_v39 }
 0x69e   :  { %4911 = vrcp.f32 %v2276_v9 }
 0x69f   :  { %4913 = vrcp.f32 %v2283_v11 }
 0x6a8   :  { %v4912_v20 = vpop.eup %4911 }
 0x6a9   :  { %v4914_v27 = vpop.eup %4913 }
 0x6aa   :  { %v2377_v32 = vsub.f32 1.0, %v4914_v27  ;;  %v2379_v31 = vmul.f32 %v4914_v27, %v5504_v30 }
 0x6ac   :  { %v2368_v12 = vpop.f32.mrb[40].mxu1 }
 0x6ad   :  { %v2369_v43 = vadd.f32 %v5543_v41, %v2368_v12  ;;  %v4411_v14 = vpop.f32.mrb[41].mxu1 }
 0x6ae   :  { %v2371_v22 = vpop.f32.mrb[42].mxu1 }
 0x6af   :  { %v2374_v24 = vmul.f32 %v4912_v20, %v2369_v43  ;;  %v4412_v13 = vpop.f32.mrb[43].mxu1 }
 0x6b1   :  { %v2375_v26 = vadd.f32 %v2374_v24, %v5322_v35  ;;  %v4803_v35 = vld [vmem:[#allocation10 + $0x38] ss:$12 sps:$4 sm:$0xff]  }
 0x6b3   :  { %4915 = vtanh.f32 %v2375_v26 }
 0x6bd   :  { %v4916_v4 = vpop.eup %4915 }
 0x6be   :  { %v2378_v34 = vmul.f32 %v4916_v4, %v2377_v32 }
 0x6c0   :  { %v5548_v36 = vadd.f32 %v2379_v31, %v2378_v34 }
 0x6c2   :  { %v2387_v42 = vpack.c.bf16 %v5548_v36, %v5548_v36 }
 0x6c4   :  { %4430 = vmatmul.mubr.bf16.vlgmr.msra.gmra.mrb[52].mxu0 %v2387_v42  ;;  %4450 = vmatmul.mubr.bf16.vlgmr.msra.gmra.mrb[44].mxu1 %v2387_v42 }
 0x6c5   :  { %4454 = vmatpush3.bf16.msra.mxu0 %v4801_v40  ;;  %4469 = vmatprep.mubr.msk.bf16.mxu0 %vm5091_vm2, %v5090_v15 }
 0x6c6   :  { %4455 = vmatprep.subr.bf16.mxu0 %v5090_v15  ;;  %4489 = vmatprep.mubr.msk.bf16.mxu1 %vm5091_vm2, %v5090_v15 }
 0x6c7   :  { %4474 = vmatpush3.bf16.msra.mxu1 %v4809_v48  ;;  %v4830_v48 = vld [vmem:[#allocation10 + $0x38] ss:$12 sps:$4 sm:$0xff]  }
 0x6c8   :  { %4475 = vmatprep.subr.bf16.mxu1 %v5090_v15 }
 0x6c9   :  { %4456 = vmatpush3.bf16.msra.mxu0 %v4802_v16 }
 0x6ca   :  { %4457 = vmatprep.subr.bf16.mxu0 %v5090_v15 }
 0x6cb   :  { %4476 = vmatpush3.bf16.msra.mxu1 %v4811_v52  ;;  %v4834_v52 = vld [vmem:[#allocation10 + $0x68] ss:$12 sps:$4 sm:$0xff]  }
 0x6cc   :  { %4477 = vmatprep.subr.bf16.mxu1 %v5090_v15 }
 0x6cd   :  { %4458 = vmatpush3.bf16.msra.mxu0 %v4803_v35 }
 0x6ce   :  { %4459 = vmatprep.subr.bf16.mxu0 %v5090_v15 }
 0x6cf   :  { %4478 = vmatpush3.bf16.msra.mxu1 %v4813_v54  ;;  %v4836_v54 = vld [vmem:[#allocation10 + $0x80] ss:$12 sps:$4 sm:$0xff]  }
 0x6d0   :  { %4479 = vmatprep.subr.bf16.mxu1 %v5090_v15 }
 0x6d1   :  { %4460 = vmatpush3.bf16.msra.mxu0 %v4804_v2  ;;  %v4826_v2 = vld [vmem:[#allocation10 + $0x8] ss:$12 sps:$4 sm:$0xff]  }
 0x6d2   :  { %4461 = vmatprep.subr.bf16.mxu0 %v5090_v15 }
 0x6d3   :  { %4480 = vmatpush3.bf16.msra.mxu1 %v4815_v21  ;;  %v4838_v21 = vld [vmem:[#allocation10 + $0x98] ss:$12 sps:$4 sm:$0xff]  }
 0x6d4   :  { %4481 = vmatprep.subr.bf16.mxu1 %v5090_v15 }
 0x6d5   :  { %4462 = vmatpush3.bf16.msra.mxu0 %v4805_v19 }
 0x6d6   :  { %4463 = vmatprep.subr.bf16.mxu0 %v5090_v15 }
 0x6d7   :  { %4482 = vmatpush3.bf16.msra.mxu1 %v4817_v23  ;;  %v4840_v23 = vld [vmem:[#allocation10 + $0xb0] ss:$12 sps:$4 sm:$0xff]  }
 0x6d8   :  { %4483 = vmatprep.subr.bf16.mxu1 %v5090_v15 }
 0x6d9   :  { %4464 = vmatpush3.bf16.msra.mxu0 %v4806_v8  ;;  %v4827_v8 = vld [vmem:[#allocation11 + $0x8] sm:$0xff]  }
 0x6da   :  { %4465 = vmatprep.subr.bf16.mxu0 %v5090_v15 }
 0x6db   :  { %4484 = vmatpush3.bf16.msra.mxu1 %v4819_v59  ;;  %v3074_v59 = vpack.c.bf16 %v5548_v36, %v5504_v30  ;;  %v4848_v30 = vld [vmem:[#allocation11 + $0x78] sm:$0xff]  }
 0x6dc   :  { %4485 = vmatprep.subr.bf16.mxu1 %v5090_v15 }
 0x6dd   :  { %4466 = vmatpush3.bf16.msra.mxu0 %v4807_v44  ;;  %v3072_v44 = vpack.c.bf16 %v5387_v56, %v5348_v38  ;;  %v4832_v38 = vld [vmem:[#allocation10 + $0x50] ss:$12 sps:$4 sm:$0xff]   ;;  %v4833_v56 = vld [vmem:[#allocation11 + $0x20] sm:$0xff]  }
 0x6de   :  { %4467 = vmatprep.subr.bf16.mxu0 %v5090_v15 }
 0x6df   :  { %4486 = vmatpush3.bf16.msra.mxu1 %v4821_v60  ;;  %v4842_v60 = vld [vmem:[#allocation11 + $0x48] sm:$0xff]  }
 0x6e0   :  { %4487 = vmatprep.subr.bf16.mxu1 %v5090_v15 }
 0x6e1   :  { %4468 = vmatpush3.bf16.msra.mxu0 %v4808_v46  ;;  %v4829_v46 = vld [vmem:[#allocation11 + $0x10] sm:$0xff]  }
 0x6e2   :  { %4493 = vmatprep.subr.bf16.mxu0 %v5090_v15 }
 0x6e3   :  { %4488 = vmatpush3.bf16.msra.mxu1 %v4823_v62  ;;  %v4845_v62 = vld [vmem:[#allocation11 + $0x60] sm:$0xff]  }
 0x6e4   :  { %4470 = vmatmul.mubr.bf16.vlgmr.msra.gmra.mrb[56].mxu0 %v2387_v42  ;;  %4513 = vmatprep.subr.bf16.mxu1 %v5090_v15 }
 0x6e5   :  { %4509 = vmatprep.mubr.msk.bf16.mxu0 %vm5091_vm2, %v5090_v15  ;;  %4494 = vmatpush3.bf16.msra.mxu0 %v4810_v50  ;;  %v4831_v50 = vld [vmem:[#allocation11 + $0x18] sm:$0xff]  }
 0x6e6   :  { %4495 = vmatprep.subr.bf16.mxu0 %v5090_v15 }
 0x6e9   :  { %4496 = vmatpush3.bf16.msra.mxu0 %v4812_v53  ;;  %v4835_v53 = vld [vmem:[#allocation11 + $0x28] sm:$0xff]  }
 0x6ea   :  { %4497 = vmatprep.subr.bf16.mxu0 %v5090_v15 }
 0x6ed   :  { %4498 = vmatpush3.bf16.msra.mxu0 %v4814_v55  ;;  %v4837_v55 = vld [vmem:[#allocation11 + $0x30] sm:$0xff]  }
 0x6ee   :  { %4499 = vmatprep.subr.bf16.mxu0 %v5090_v15 }
 0x6f1   :  { %4500 = vmatpush3.bf16.msra.mxu0 %v4816_v57  ;;  %v4839_v57 = vld [vmem:[#allocation11 + $0x38] sm:$0xff]  }
 0x6f2   :  { %4501 = vmatprep.subr.bf16.mxu0 %v5090_v15 }
 0x6f5   :  { %4502 = vmatpush3.bf16.msra.mxu0 %v4818_v58  ;;  %v3073_v58 = vpack.c.bf16 %v5465_v17, %v5426_v3  ;;  %v4846_v3 = vld [vmem:[#allocation11 + $0x68] sm:$0xff]   ;;  %v4847_v17 = vld [vmem:[#allocation11 + $0x70] sm:$0xff]  }
 0x6f6   :  { %4503 = vmatprep.subr.bf16.mxu0 %v5090_v15 }
 0x6f9   :  { %4504 = vmatpush3.bf16.msra.mxu0 %v4820_v18  ;;  %v4841_v18 = vld [vmem:[#allocation11 + $0x40] sm:$0xff]  }
 0x6fa   :  { %4505 = vmatprep.subr.bf16.mxu0 %v5090_v15 }
 0x6fd   :  { %4506 = vmatpush3.bf16.msra.mxu0 %v4822_v61  ;;  %v4843_v61 = vld [vmem:[#allocation11 + $0x50] sm:$0xff]  }
 0x6fe   :  { %4507 = vmatprep.subr.bf16.mxu0 %v5090_v15 }
 0x701   :  { %4508 = vmatpush3.bf16.msra.mxu0 %v4824_v63  ;;  %v5607_v63 = vld [vmem:[#allocation13 + $0x8] sm:$0xff]  }
 0x702   :  { %4533 = vmatprep.subr.bf16.mxu0 %v4825_v25 }
 0x797   :  { %v2486_v0 = vpop.f32.mrb[52].mxu0  ;;  %v2590_v28 = vpop.f32.mrb[44].mxu1 }
 0x798   :  { %v2612_v1 = vadd.f32 %v2486_v0, %v5332_v45  ;;  %v2619_v5 = vadd.f32 %v2590_v28, %v5334_v47  ;;  %v4431_v10 = vpop.f32.mrb[53].mxu0  ;;  %v4451_v6 = vpop.f32.mrb[45].mxu1  ;;  %v5617_v0 = vld [vmem:[#allocation13 + $0x18] sm:$0xff]   ;;  %v5621_v28 = vld [vmem:[#allocation13 + $0x20] sm:$0xff]  }
 0x799   :  { %v2489_v7 = vpop.f32.mrb[54].mxu0  ;;  %v2593_v37 = vpop.f32.mrb[46].mxu1 }
 0x79a   :  { %v3722_v9 = vmul.f32 -1.442695, %v2612_v1  ;;  %v4432_v39 = vpop.f32.mrb[55].mxu0  ;;  %v4452_v11 = vpop.f32.mrb[47].mxu1  ;;  %v3723_v12 = vmul.f32 -1.442695, %v2619_v5 }
 0x79b   :  { %v5625_v1 = vld [vmem:[#allocation13 + $0x28] sm:$0xff]  }
 0x79c   :  { %4917 = vpow2.f32 %v3722_v9 }
 0x79d   :  { %4919 = vpow2.f32 %v3723_v12 }
 0x7a6   :  { %v4918_v43 = vpop.eup %4917 }
 0x7a7   :  { %v2616_v14 = vadd.f32 1.0, %v4918_v43  ;;  %v4920_v20 = vpop.eup %4919 }
 0x7a8   :  { %v2623_v22 = vadd.f32 1.0, %v4920_v20 }
 0x7a9   :  { %4921 = vrcp.f32 %v2616_v14 }
 0x7aa   :  { %4923 = vrcp.f32 %v2623_v22 }
 0x7b3   :  { %v4922_v47 = vpop.eup %4921 }
 0x7b4   :  { %v4924_v34 = vpop.eup %4923 }
 0x7b5   :  { %v2717_v31 = vsub.f32 1.0, %v4924_v34  ;;  %v2719_v16 = vmul.f32 %v4924_v34, %v5548_v36  ;;  %v5605_v36 = vld [vmem:[#allocation13] sm:$0xff]  }
 0x7b7   :  { %v2708_v24 = vpop.f32.mrb[56].mxu0 }
 0x7b8   :  { %v2709_v45 = vadd.f32 %v5543_v41, %v2708_v24  ;;  %v4471_v13 = vpop.f32.mrb[57].mxu0 }
 0x7b9   :  { %v2711_v26 = vpop.f32.mrb[58].mxu0 }
 0x7ba   :  { %v2714_v27 = vmul.f32 %v4922_v47, %v2709_v45  ;;  %v4472_v32 = vpop.f32.mrb[59].mxu0 }
 0x7bc   :  { %v2715_v4 = vadd.f32 %v2714_v27, %v5313_v29  ;;  %v4828_v29 = vld [vmem:[#allocation10 + $0x20] ss:$12 sps:$4 sm:$0xff]  }
 0x7be   :  { %4925 = vtanh.f32 %v2715_v4 }
 0x7c8   :  { %v4926_v40 = vpop.eup %4925 }
 0x7c9   :  { %v2718_v42 = vmul.f32 %v4926_v40, %v2717_v31 }
 0x7cb   :  { %v5586_v35 = vadd.f32 %v2719_v16, %v2718_v42 }
 0x7cd   :  { %v2727_v19 = vpack.c.bf16 %v5586_v35, %v5586_v35 }
 0x7cf   :  { %4490 = vmatmul.mubr.bf16.vlgmr.msra.gmra.mrb[48].mxu1 %v2727_v19  ;;  %4510 = vmatmul.mubr.bf16.vlgmr.msra.gmra.mrb[60].mxu0 %v2727_v19 }
 0x7d0   :  { %4514 = vmatpush3.bf16.msra.mxu1 %v4826_v2  ;;  %4534 = vmatpush3.bf16.msra.mxu0 %v4825_v25  ;;  %v5613_v25 = vld [vmem:[#allocation13 + $0x10] sm:$0xff]  }
 0x7d1   :  { %4549 = vmatprep.mubr.bf16.mxu0 %v3072_v44  ;;  %4515 = vmatprep.subr.bf16.mxu1 %v5090_v15 }
 0x7d2   :  { %4535 = vmatprep.subr.bf16.mxu0 %v4827_v8  ;;  %4529 = vmatprep.mubr.msk.bf16.mxu1 %vm5091_vm2, %v5090_v15 }
 0x7d4   :  { %4516 = vmatpush3.bf16.msra.mxu1 %v4828_v29  ;;  %4536 = vmatpush3.bf16.msra.mxu0 %v4827_v8 }
 0x7d5   :  { %4517 = vmatprep.subr.bf16.mxu1 %v5090_v15  ;;  %4537 = vmatprep.subr.bf16.mxu0 %v4829_v46 }
 0x7d8   :  { %4518 = vmatpush3.bf16.msra.mxu1 %v4830_v48  ;;  %4538 = vmatpush3.bf16.msra.mxu0 %v4829_v46 }
 0x7d9   :  { %4519 = vmatprep.subr.bf16.mxu1 %v5090_v15  ;;  %4539 = vmatprep.subr.bf16.mxu0 %v4831_v50 }
 0x7dc   :  { %4520 = vmatpush3.bf16.msra.mxu1 %v4832_v38  ;;  %4540 = vmatpush3.bf16.msra.mxu0 %v4831_v50 }
 0x7dd   :  { %4521 = vmatprep.subr.bf16.mxu1 %v5090_v15  ;;  %4541 = vmatprep.subr.bf16.mxu0 %v4833_v56 }
 0x7e0   :  { %4522 = vmatpush3.bf16.msra.mxu1 %v4834_v52  ;;  %4542 = vmatpush3.bf16.msra.mxu0 %v4833_v56 }
 0x7e1   :  { %4523 = vmatprep.subr.bf16.mxu1 %v5090_v15  ;;  %4543 = vmatprep.subr.bf16.mxu0 %v4835_v53 }
 0x7e4   :  { %4524 = vmatpush3.bf16.msra.mxu1 %v4836_v54  ;;  %4544 = vmatpush3.bf16.msra.mxu0 %v4835_v53 }
 0x7e5   :  { %4525 = vmatprep.subr.bf16.mxu1 %v5090_v15  ;;  %4545 = vmatprep.subr.bf16.mxu0 %v4837_v55 }
 0x7e8   :  { %4526 = vmatpush3.bf16.msra.mxu1 %v4838_v21  ;;  %4546 = vmatpush3.bf16.msra.mxu0 %v4837_v55 }
 0x7e9   :  { %4527 = vmatprep.subr.bf16.mxu1 %v5090_v15  ;;  %4547 = vmatprep.subr.bf16.mxu0 %v4839_v57  ;;  %v4844_v15 = vld [vmem:[#allocation11 + $0x58] sm:$0xff]  }
 0x7ec   :  { %4528 = vmatpush3.bf16.msra.mxu1 %v4840_v23  ;;  %4548 = vmatpush3.bf16.msra.mxu0 %v4839_v57  ;;  %v4855_v23 = vld [vmem:[#allocation13 + $0x30] sm:$0xff]  }
 0x7ed   :  { %4557 = vmatprep.subr.bf16.mxu1 %v4841_v18  ;;  %4581 = vmatprep.subr.bf16.mxu0 %v5605_v36 }
 0x7ef   :  { %4530 = vmatmul.mubr.bf16.vlgmr.msra.gmra.mrb[52].mxu1 %v2727_v19  ;;  %4550 = vmatmul.mubr.bf16.vlgmr.msra.gmra.mrb[64].mxu0 %v3073_v58  ;;  %v4856_v58 = vld [vmem:[#allocation13 + $0x38] sm:$0xff]  }
 0x7f0   :  { %4553 = vmatprep.mubr.bf16.mxu0 %v3074_v59  ;;  %4558 = vmatpush3.bf16.msra.mxu1 %v4841_v18 }
 0x7f1   :  { %4559 = vmatprep.subr.bf16.mxu1 %v4842_v60  ;;  %4582 = vmatpush3.bf16.msra.mxu0 %v5605_v36 }
 0x7f2   :  { %4583 = vmatprep.subr.bf16.mxu0 %v5607_v63 }
 0x7f4   :  { %4560 = vmatpush3.bf16.msra.mxu1 %v4842_v60 }
 0x7f5   :  { %4561 = vmatprep.subr.bf16.mxu1 %v4843_v61  ;;  %4584 = vmatpush3.bf16.msra.mxu0 %v5607_v63 }
 0x7f6   :  { %4585 = vmatprep.subr.bf16.mxu0 %v5613_v25 }
 0x7f8   :  { %4562 = vmatpush3.bf16.msra.mxu1 %v4843_v61 }
 0x7f9   :  { %4563 = vmatprep.subr.bf16.mxu1 %v4844_v15  ;;  %4586 = vmatpush3.bf16.msra.mxu0 %v5613_v25 }
 0x7fa   :  { %4587 = vmatprep.subr.bf16.mxu0 %v5617_v0 }
 0x7fc   :  { %4564 = vmatpush3.bf16.msra.mxu1 %v4844_v15 }
 0x7fd   :  { %4565 = vmatprep.subr.bf16.mxu1 %v4845_v62  ;;  %4588 = vmatpush3.bf16.msra.mxu0 %v5617_v0 }
 0x7fe   :  { %4589 = vmatprep.subr.bf16.mxu0 %v5621_v28 }
 0x800   :  { %4566 = vmatpush3.bf16.msra.mxu1 %v4845_v62 }
 0x801   :  { %4567 = vmatprep.subr.bf16.mxu1 %v4846_v3  ;;  %4590 = vmatpush3.bf16.msra.mxu0 %v5621_v28 }
 0x802   :  { %4591 = vmatprep.subr.bf16.mxu0 %v5625_v1 }
 0x804   :  { %4568 = vmatpush3.bf16.msra.mxu1 %v4846_v3 }
 0x805   :  { %4569 = vmatprep.subr.bf16.mxu1 %v4847_v17  ;;  %4592 = vmatpush3.bf16.msra.mxu0 %v5625_v1 }
 0x806   :  { %4593 = vmatprep.subr.bf16.mxu0 %v4855_v23 }
 0x808   :  { %4570 = vmatpush3.bf16.msra.mxu1 %v4847_v17 }
 0x809   :  { %4571 = vmatprep.subr.bf16.mxu1 %v4848_v30  ;;  %4594 = vmatpush3.bf16.msra.mxu0 %v4855_v23 }
 0x80a   :  { %4595 = vmatprep.subr.bf16.mxu0 %v4856_v58 }
 0x80c   :  { %4572 = vmatpush3.bf16.msra.mxu1 %v4848_v30 }
 0x80d   :  { %4605 = vmatprep.subr.bf16.mxu1 %v5605_v36  ;;  %4596 = vmatpush3.bf16.msra.mxu0 %v4856_v58 }
 0x8a2   :  { %v2826_v5 = vpop.f32.mrb[48].mxu1  ;;  %v2930_v10 = vpop.f32.mrb[60].mxu0 }
 0x8a3   :  { %v2952_v6 = vadd.f32 %v2826_v5, %v5336_v49  ;;  %v2959_v7 = vadd.f32 %v2930_v10, %v5338_v51  ;;  %v4491_v37 = vpop.f32.mrb[49].mxu1  ;;  %v4511_v9 = vpop.f32.mrb[61].mxu0  ;;  %v5635_v49 = vld [vmem:[%s5687_s6] ss:$0 sm:$0xff] }
 0x8a4   :  { %v2829_v39 = vpop.f32.mrb[50].mxu1  ;;  %v2933_v11 = vpop.f32.mrb[62].mxu0 }
 0x8a5   :  { %v3748_v12 = vmul.f32 -1.442695, %v2952_v6  ;;  %v4492_v43 = vpop.f32.mrb[51].mxu1  ;;  %v4512_v14 = vpop.f32.mrb[63].mxu0  ;;  %v3749_v20 = vmul.f32 -1.442695, %v2959_v7 }
 0x8a7   :  { %4927 = vpow2.f32 %v3748_v12 }
 0x8a8   :  { %4929 = vpow2.f32 %v3749_v20 }
 0x8b1   :  { %v4928_v22 = vpop.eup %4927 }
 0x8b2   :  { %v2956_v24 = vadd.f32 1.0, %v4928_v22  ;;  %v4930_v45 = vpop.eup %4929 }
 0x8b3   :  { %v2963_v51 = vadd.f32 1.0, %v4930_v45 }
 0x8b4   :  { %4931 = vrcp.f32 %v2956_v24  ;;  %v3777_v24 = vld [vmem:[%s5689_s8] ss:$0 sm:$0xff]  ;;  %s5093_s8 = smov [#allocation14]  }
 0x8b5   :  { %4933 = vrcp.f32 %v2963_v51  ;;  %s3523_s15 = sshll.u32 %s5093_s8, 4  ;;  %s3524_s15 = int_to_ptr.vmem [resolvable:$true] %s3523_s15 }
 0x8b6   :  { %s5048_s18 = scalar_lea.vmem %s3524_s15, 1024  ;;  %p5053_p13 = scmp.lt.s32.totalorder %s3524_s15, %s3524_s15 }
 0x8b7   :  { %p5049_p12 = scmp.ne.s32.totalorder %s3524_s15, %s5048_s18  ;;  %p5054_p0 = scmp.lt.s32.totalorder %s5048_s18, %s5048_s18 }
 0x8b9   :  { %p5055_p1 = por %p5054_p0, %p5053_p13 }
 0x8bb   :  { %p5056_p2 = pnand %p5055_p1, %p5049_p12 }
 0x8be   :  { %v4932_v34 = vpop.eup %4931 }
 0x8bf   :  { %v4934_v52 = vpop.eup %4933 }
 0x8c0   :  { %v3057_v53 = vsub.f32 1.0, %v4934_v52  ;;  %v3059_v55 = vmul.f32 %v4934_v52, %v5586_v35 }
 0x8c2   :  { %v3048_v13 = vpop.f32.mrb[52].mxu1  ;;  %v4551_v47 = vpop.f32.mrb[64].mxu0 }
 0x8c3   :  { %v3049_v26 = vadd.f32 %v5543_v41, %v3048_v13  ;;  %v3190_v27 = vadd.f32 %v4551_v47, %v5635_v49  ;;  %v4531_v32 = vpop.f32.mrb[53].mxu1  ;;  %v3181_v4 = vpop.f32.mrb[65].mxu0 }
 0x8c4   :  { %v3182_v31 = vadd.f32 %v5635_v49, %v3181_v4  ;;  %v3051_v40 = vpop.f32.mrb[54].mxu1  ;;  %v4552_v42 = vpop.f32.mrb[66].mxu0 }
 0x8c5   :  { %v3054_v16 = vmul.f32 %v4932_v34, %v3049_v26  ;;  %v3193_v2 = vadd.f32 %v4552_v42, %v5635_v49  ;;  %v4532_v19 = vpop.f32.mrb[55].mxu1  ;;  %v3184_v8 = vpop.f32.mrb[67].mxu0  ;;  %v3214_v41 = vmax.f32 %v3190_v27, 0.0 }
 0x8c6   :  { %v3185_v44 = vadd.f32 %v5635_v49, %v3184_v8  ;;  %v3212_v48 = vmax.f32 %v3182_v31, 0.0 }
 0x8c7   :  { %v3055_v29 = vadd.f32 %v3054_v16, %v5319_v33  ;;  %v3215_v46 = vmax.f32 %v3193_v2, 0.0 }
 0x8c8   :  { %v3213_v50 = vmax.f32 %v3185_v44, 0.0 }
 0x8c9   :  { %4935 = vtanh.f32 %v3055_v29  ;;  %v3221_v38 = vpack.c.bf16 %v3215_v46, %v3214_v41 }
 0x8ca   :  { %v3220_v56 = vpack.c.bf16 %v3213_v50, %v3212_v48 }
 0x8cc   :  { %4573 = vmatprep.mubr.bf16.mxu1 %v3220_v56 }
 0x8cd   :  { %4574 = vmatmul.mubr.bf16.vlgmr.msra.gmra.mrb[56].mxu1 %v3221_v38 }
 0x8ce   :  { %4613 = vmatpush3.bf16.msra.mxu1 %v5605_v36 }
 0x8cf   :  { %4606 = vmatprep.subr.bf16.mxu1 %v5607_v63 }
 0x8d2   :  { %4614 = vmatpush3.bf16.msra.mxu1 %v5607_v63 }
 0x8d3   :  { %v4936_v54 = vpop.eup %4935  ;;  %4607 = vmatprep.subr.bf16.mxu1 %v5613_v25 }
 0x8d4   :  { %v3058_v33 = vmul.f32 %v4936_v54, %v3057_v53 }
 0x8d6   :  { %v3060_v21 = vadd.f32 %v3059_v55, %v3058_v33  ;;  %4615 = vmatpush3.bf16.msra.mxu1 %v5613_v25 }
 0x8d7   :  { %4608 = vmatprep.subr.bf16.mxu1 %v5617_v0 }
 0x8d8   :  { %v3075_v57 = vpack.c.bf16 %v3060_v21, %v5586_v35  ;;  %v3768_v35 = vld [vmem:[%s5687_s6 + $0x1] ss:$0 sm:$0xff] }
 0x8da   :  { %4554 = vmatmul.mubr.bf16.gmra.mrb[68].mxu0 %v3075_v57  ;;  %4616 = vmatpush3.bf16.msra.mxu1 %v5617_v0 }
 0x8db   :  { %4609 = vmatprep.subr.bf16.mxu1 %v5621_v28 }
 0x8de   :  { %4617 = vmatpush3.bf16.msra.mxu1 %v5621_v28 }
 0x8df   :  { %4610 = vmatprep.subr.bf16.mxu1 %v5625_v1 }
 0x8e2   :  { %4618 = vmatpush3.bf16.msra.mxu1 %v5625_v1 }
 0x8e3   :  { %4611 = vmatprep.subr.bf16.mxu1 %v4855_v23 }
 0x8e6   :  { %4619 = vmatpush3.bf16.msra.mxu1 %v4855_v23 }
 0x8e7   :  { %4612 = vmatprep.subr.bf16.mxu1 %v4856_v58 }
 0x8ea   :  { %4620 = vmatpush3.bf16.msra.mxu1 %v4856_v58 }
 0x9a0   :  { %v4575_v59 = vpop.f32.mrb[56].mxu1 }
 0x9a1   :  { %v3340_v18 = vadd.f32 %v4575_v59, %v3768_v35  ;;  %v3331_v60 = vpop.f32.mrb[57].mxu1 }
 0x9a2   :  { %v3332_v61 = vadd.f32 %v3768_v35, %v3331_v60  ;;  %v4576_v15 = vpop.f32.mrb[58].mxu1 }
 0x9a3   :  { %v3343_v62 = vadd.f32 %v4576_v15, %v3768_v35  ;;  %v3334_v3 = vpop.f32.mrb[59].mxu1  ;;  %v3364_v30 = vmax.f32 %v3340_v18, 0.0 }
 0x9a4   :  { %v3335_v17 = vadd.f32 %v3768_v35, %v3334_v3  ;;  %v3362_v63 = vmax.f32 %v3332_v61, 0.0 }
 0x9a5   :  { %v3365_v36 = vmax.f32 %v3343_v62, 0.0 }
 0x9a6   :  { %v3363_v25 = vmax.f32 %v3335_v17, 0.0 }
 0x9a7   :  { %v3371_v0 = vpack.c.bf16 %v3365_v36, %v3364_v30 }
 0x9a8   :  { %v3370_v28 = vpack.c.bf16 %v3363_v25, %v3362_v63 }
 0x9aa   :  { %4597 = vmatprep.mubr.bf16.mxu0 %v3370_v28 }
 0x9ab   :  { %4598 = vmatmul.mubr.bf16.vlgmr.msra.gmra.mrb[72].mxu0 %v3371_v0 }
 0x9ad   :  { %v4555_v1 = vpop.f32.mrb[68].mxu0 }
 0x9ae   :  { %v3206_v5 = vadd.f32 %v4555_v1, %v5635_v49  ;;  %v3197_v10 = vpop.f32.mrb[69].mxu0 }
 0x9af   :  { %v3198_v6 = vadd.f32 %v5635_v49, %v3197_v10  ;;  %v4556_v7 = vpop.f32.mrb[70].mxu0 }
 0x9b0   :  { %v3209_v37 = vadd.f32 %v4556_v7, %v5635_v49  ;;  %v3200_v9 = vpop.f32.mrb[71].mxu0  ;;  %v3218_v11 = vmax.f32 %v3206_v5, 0.0 }
 0x9b1   :  { %v3201_v39 = vadd.f32 %v5635_v49, %v3200_v9  ;;  %v3216_v43 = vmax.f32 %v3198_v6, 0.0 }
 0x9b2   :  { %v3219_v12 = vmax.f32 %v3209_v37, 0.0 }
 0x9b3   :  { %v3217_v14 = vmax.f32 %v3201_v39, 0.0 }
 0x9b4   :  { %v3223_v20 = vpack.c.bf16 %v3219_v12, %v3218_v11 }
 0x9b5   :  { %v3222_v22 = vpack.c.bf16 %v3217_v14, %v3216_v43 }
 0x9b7   :  { %4577 = vmatprep.mubr.bf16.mxu1 %v3222_v22 }
 0x9b8   :  { %4578 = vmatmul.mubr.bf16.gmra.mrb[60].mxu1 %v3223_v20 }
 0xa7e   :  { %v4599_v45 = vpop.f32.mrb[72].mxu0 }
 0xa7f   :  { %v3488_v51 = vadd.f32 %v4599_v45, %v3777_v24  ;;  %v3479_v13 = vpop.f32.mrb[73].mxu0 }
 0xa80   :  { %v3480_v47 = vadd.f32 %v3777_v24, %v3479_v13  ;;  %v4600_v26 = vpop.f32.mrb[74].mxu0 }
 0xa81   :  { %3512 = vst [vmem:[#allocation14 + $0x10] sm:$0xff] %v3488_v51  ;;  %v3491_v27 = vadd.f32 %v4600_v26, %v3777_v24  ;;  %v3482_v49 = vpop.f32.mrb[75].mxu0 }
 0xa82   :  { %3510 = vst [vmem:[#allocation14] sm:$0xff] %v3480_v47  ;;  %v3483_v32 = vadd.f32 %v3777_v24, %v3482_v49 }
 0xa83   :  { %3513 = vst [vmem:[#allocation14 + $0x18] sm:$0xff] %v3491_v27 }
 0xa84   :  { %3511 = vst [vmem:[#allocation14 + $0x8] sm:$0xff] %v3483_v32 }
 0xa8b   :  { %v4579_v4 = vpop.f32.mrb[60].mxu1 }
 0xa8c   :  { %v3356_v34 = vadd.f32 %v4579_v4, %v3768_v35  ;;  %v3347_v31 = vpop.f32.mrb[61].mxu1 }
 0xa8d   :  { %v3348_v40 = vadd.f32 %v3768_v35, %v3347_v31  ;;  %v4580_v42 = vpop.f32.mrb[62].mxu1 }
 0xa8e   :  { %v3359_v16 = vadd.f32 %v4580_v42, %v3768_v35  ;;  %v3350_v2 = vpop.f32.mrb[63].mxu1  ;;  %v3368_v8 = vmax.f32 %v3356_v34, 0.0 }
 0xa8f   :  { %v3351_v19 = vadd.f32 %v3768_v35, %v3350_v2  ;;  %v3366_v29 = vmax.f32 %v3348_v40, 0.0 }
 0xa90   :  { %v3369_v44 = vmax.f32 %v3359_v16, 0.0 }
 0xa91   :  { %v3367_v41 = vmax.f32 %v3351_v19, 0.0 }
 0xa92   :  { %v3373_v46 = vpack.c.bf16 %v3369_v44, %v3368_v8 }
 0xa93   :  { %v3372_v48 = vpack.c.bf16 %v3367_v41, %v3366_v29 }
 0xa95   :  { %4601 = vmatprep.mubr.bf16.mxu1 %v3372_v48 }
 0xa96   :  { %4602 = vmatmul.mubr.bf16.vlgmr.msra.gmra.mrb[64].mxu1 %v3373_v46 }
 0xb69   :  { %v4603_v50 = vpop.f32.mrb[64].mxu1 }
 0xb6a   :  { %v3504_v38 = vadd.f32 %v4603_v50, %v3777_v24  ;;  %v3495_v56 = vpop.f32.mrb[65].mxu1 }
 0xb6b   :  { %v3496_v52 = vadd.f32 %v3777_v24, %v3495_v56  ;;  %v4604_v53 = vpop.f32.mrb[66].mxu1 }
 0xb6c   :  { %3516 = vst [vmem:[#allocation14 + $0x30] sm:$0xff] %v3504_v38  ;;  %v3507_v54 = vadd.f32 %v4604_v53, %v3777_v24  ;;  %v3498_v33 = vpop.f32.mrb[67].mxu1 }
 0xb6d   :  { %3514 = vst [vmem:[#allocation14 + $0x20] sm:$0xff] %v3496_v52  ;;  %v3499_v55 = vadd.f32 %v3777_v24, %v3498_v33 }
 0xb6e   :  { %3517 = vst [vmem:[#allocation14 + $0x38] sm:$0xff] %v3507_v54 }
 0xb6f   :  { %3515 = vst [vmem:[#allocation14 + $0x28] sm:$0xff] %v3499_v55 }
 0xb70   :  { %5059 = shalt.err (!%p5056_p2)
}
 0xb71   :  { %s5060_s21 = scalar_lea.hbm %s5690_s9, 1024 }
 0xb72   :  { %p5061_p3 = scmp.ne.s32.totalorder %s5690_s9, %s5060_s21  ;;  %p5064_p4 = scmp.lt.u32.totalorder %s5060_s21, %s5690_s9 }
 0xb74   :  { %p5066_p5 = pnand %p5064_p4, %p5061_p3 }
 0xb76   :  { %5069 = shalt.err (!%p5066_p5)
}
 0xb77   :  { %3529 = dma.vmem_to_hbm [thread:$0]  %s3524_s15, 1024, %s5690_s9, [#allocation7], %s5083_s5, %s5083_s5, %s5084_s12  }
 0xb78   :  { %5076 = dma.done.wait [#allocation7], 1024  }
 0xb79   :  { %5077 = vsyncadd [#allocation7], 4294966272 }
 0xb7a   :  { %3533 = vsyncpa [#allocation6], 1 }
 0xb7b   :  { %3534 = vsyncpa [#allocation9], 1 }
 0xb7c   :  { %3535 = vsyncpa [#allocation12], 1 }
 0xb7d   :  { %3536 = vsyncpa [#allocation7], 1 }

</bundles_post_ra>
